<compile_context>
chip_gen: v7x
topology: tpu7x:2x2x1
jax: 0.10.0
libtpu: 0.0.40
codegen_flags: <defaults>
</compile_context>

<pallas_src>
import functools

import jax
import jax.numpy as jnp
from jax.experimental import pallas as pl
from jax.experimental.pallas import tpu as pltpu

LN_EPS = 1e-6


def _default_vmem_limit():
    # ~80% of physical per-core VMEM; leaves headroom for Mosaic internal scratch.
    try:
        return int(pltpu.get_tpu_info().vmem_capacity_bytes * 0.8)
    except Exception:
        return 64 * 1024 * 1024


_VMEM_LIMIT = _default_vmem_limit()

_PARAMS_1D = pltpu.CompilerParams(
    dimension_semantics=("parallel",), vmem_limit_bytes=_VMEM_LIMIT)
_PARAMS_2D = pltpu.CompilerParams(
    dimension_semantics=("parallel", "arbitrary"), vmem_limit_bytes=_VMEM_LIMIT)

_BLOCK_PARAM_ORDER = (
    "n1w", "n1b", "qkv_w", "qkv_b", "proj_w", "proj_b",
    "n2w", "n2b", "fc1_w", "fc1_b", "fc2_w", "fc2_b",
)


# ----------------------------------------------------------------------------
# Pallas kernels
# ----------------------------------------------------------------------------
def _layernorm(v, w_ref, b_ref, eps):
    # f32 statistics regardless of matmul dtype
    mu = jnp.mean(v, axis=-1, keepdims=True)
    var = jnp.mean(jnp.square(v - mu), axis=-1, keepdims=True)
    return (v - mu) * jax.lax.rsqrt(var + eps) * w_ref[...] + b_ref[...]


def patch_embed_kernel(p_ref, w_ref, b_ref, o_ref):
    # p_ref: (rows_tile, C*ps*ps) f32, w_ref: (C*ps*ps, D) bf16, b_ref: (1, D) f32
    o_ref[...] = (
        jnp.dot(p_ref[...].astype(jnp.bfloat16), w_ref[...],
                preferred_element_type=jnp.float32)
        + b_ref[...]
    )


def vit_blocks_kernel(
    x_ref,
    n1w_ref, n1b_ref,
    qkvw_ref, qkvb_ref,       # attention scale pre-folded into the q columns
    projw_ref, projb_ref,     # (D, D) / (1, D)
    n2w_ref, n2b_ref,
    fc1w_ref, fc1b_ref,
    fc2w_ref, fc2b_ref,
    o_ref,
    *,
    num_heads: int,
    eps: float = LN_EPS,
):
    # grid = (B, depth): b parallel, l sequential. x_ref / o_ref: (N, D) f32 per batch
    # element; the residual stream lives in o_ref across the depth axis (same block
    # index for every l), so it never round-trips HBM between blocks.
    l = pl.program_id(1)

    @pl.when(l == 0)
    def _():
        o_ref[...] = x_ref[...]

    x = o_ref[...]                             # (N, D) f32 residual stream
    n_tok, dim = x.shape
    head_dim = dim // num_heads

    # --- attention branch ---
    xn = _layernorm(x, n1w_ref, n1b_ref, eps)
    qkv = (
        jnp.dot(xn.astype(jnp.bfloat16), qkvw_ref[...],
                preferred_element_type=jnp.float32)
        + qkvb_ref[...]
    )                                          # (N, 3D) f32 (q already scaled)

    # cast to bf16 BEFORE the per-head relayout (halves the relayout bytes)
    q = qkv[:, 0 * dim:1 * dim].astype(jnp.bfloat16)
    k = qkv[:, 1 * dim:2 * dim].astype(jnp.bfloat16)
    v = qkv[:, 2 * dim:3 * dim].astype(jnp.bfloat16)

    q_h = jnp.stack([q[:, h * head_dim:(h + 1) * head_dim] for h in range(num_heads)], axis=0)
    k_h = jnp.stack([k[:, h * head_dim:(h + 1) * head_dim] for h in range(num_heads)], axis=0)
    v_h = jnp.stack([v[:, h * head_dim:(h + 1) * head_dim] for h in range(num_heads)], axis=0)

    # batched scores over all heads at once: (H, N, N), f32 accumulation
    # TODO(synk): flash-style q tiling of the (H, N, N) scores for long-sequence configs
    # (e.g. ViT-L/384, 577 tokens) so the score tensor fits v7x's 64 MiB VMEM.
    s = jnp.einsum("hqd,hkd->hqk", q_h, k_h, preferred_element_type=jnp.float32)
    s = s - jnp.max(s, axis=-1, keepdims=True)
    p = jnp.exp(s)
    p = p * pl.reciprocal(jnp.sum(p, axis=-1, keepdims=True), approx=True)

    # batched P@V: (H, N, hd) f32
    o_h = jnp.einsum("hqk,hkd->hqd", p.astype(jnp.bfloat16), v_h,
                     preferred_element_type=jnp.float32)

    # merge heads in bf16 (lane concat, head order matches PyTorch reshape) and apply the
    # output projection as a single K=D matmul on the MXU.
    o_b = o_h.astype(jnp.bfloat16)
    o_cat = jnp.concatenate([o_b[h] for h in range(num_heads)], axis=-1)   # (N, D) bf16
    attn = (
        jnp.dot(o_cat, projw_ref[...], preferred_element_type=jnp.float32)
        + projb_ref[...]
    )
    x = x + attn                               # residual (init_values=None -> no layerscale)

    # --- MLP branch ---
    xn2 = _layernorm(x, n2w_ref, n2b_ref, eps)
    h1 = (
        jnp.dot(xn2.astype(jnp.bfloat16), fc1w_ref[...],
                preferred_element_type=jnp.float32)
        + fc1b_ref[...]
    )
    # tanh GELU routes through the EUP slot (nearly free next to the MXU); ~1e-3 vs exact erf.
    h1 = jax.nn.gelu(h1, approximate=True)
    h2 = (
        jnp.dot(h1.astype(jnp.bfloat16), fc2w_ref[...],
                preferred_element_type=jnp.float32)
        + fc2b_ref[...]
    )
    o_ref[...] = x + h2


def head_kernel(x_ref, nw_ref, nb_ref, hw_ref, hb_ref, logits_ref, feat_ref, *, eps=LN_EPS):
    # x_ref: (B, D) cls tokens only (norm is per-token so norm(x)[:,0] == norm(x[:,0])).
    xn = _layernorm(x_ref[...], nw_ref, nb_ref, eps)        # fc_norm / head_drop identity
    feat_ref[...] = xn
    logits_ref[...] = (
        jnp.dot(xn.astype(jnp.bfloat16), hw_ref[...],
                preferred_element_type=jnp.float32)
        + hb_ref[...]
    )


# ----------------------------------------------------------------------------
# Pallas wrappers
# ----------------------------------------------------------------------------
def run_patch_embed(patches, w_bf16, b):
    # patches: (B, P, C*ps*ps) f32 -> flatten to one big (B*P, PD) matmul, row-tiled.
    B, P, PD = patches.shape
    D = w_bf16.shape[1]
    rows = B * P
    pf = patches.reshape(rows, PD)
    tr = min(512, max(8, ((rows + 7) // 8) * 8))          # 512-row tiles, 8-row minimum
    rows_p = ((rows + tr - 1) // tr) * tr                 # pad instead of one giant block
    if rows_p != rows:
        pf = jnp.pad(pf, ((0, rows_p - rows), (0, 0)))
    out = pl.pallas_call(
        patch_embed_kernel,
        out_shape=jax.ShapeDtypeStruct((rows_p, D), jnp.float32),
        grid=(rows_p // tr,),
        in_specs=[
            pl.BlockSpec((tr, PD), lambda i: (i, 0)),
            pl.BlockSpec((PD, D), lambda i: (0, 0)),
            pl.BlockSpec((1, D), lambda i: (0, 0)),
        ],
        out_specs=pl.BlockSpec((tr, D), lambda i: (i, 0)),
        compiler_params=_PARAMS_1D,
    )(pf, w_bf16, b)
    return out[:rows].reshape(B, P, D)


def _stack_spec(p):
    # stacked per-depth parameter: block = one layer's slab, indexed by the depth axis.
    zeros = (0,) * (p.ndim - 1)
    return pl.BlockSpec((None,) + tuple(p.shape[1:]),
                        lambda b, l, _z=zeros: (l,) + _z)


def run_blocks(x, stack, num_heads):
    """Run a stack of transformer blocks (depth = leading axis of every stacked param)
    in ONE pallas_call with grid (B, depth). The residual stays resident in VMEM across
    depth; the next layer's weights are prefetched behind the current layer's compute."""
    B, N, D = x.shape
    plist = [stack[k] for k in _BLOCK_PARAM_ORDER]
    L = plist[2].shape[0]          # qkv_w: (L, D, 3D)
    # TODO(synk): when B < number of TensorCores (v7x has 2), add a q-token / row-tile
    # parallel grid axis so both cores stay busy at tiny batch sizes.
    return pl.pallas_call(
        functools.partial(vit_blocks_kernel, num_heads=num_heads),
        out_shape=jax.ShapeDtypeStruct((B, N, D), jnp.float32),
        grid=(B, L),
        in_specs=[pl.BlockSpec((None, N, D), lambda b, l: (b, 0, 0))]
        + [_stack_spec(p) for p in plist],
        out_specs=pl.BlockSpec((None, N, D), lambda b, l: (b, 0, 0)),
        compiler_params=_PARAMS_2D,
    )(x, *plist)


def run_head(x_cls, norm_w, norm_b, head_w_bf16, head_b):
    # x_cls: (B, D) cls tokens only (avoid DMAing the full (B, N, D) token block).
    B, D = x_cls.shape
    C = head_w_bf16.shape[1]
    Cp = ((C + 127) // 128) * 128              # lane-dense logits buffer
    hw = jnp.pad(head_w_bf16, ((0, 0), (0, Cp - C)))
    hb = jnp.pad(head_b, ((0, 0), (0, Cp - C)))
    logits_p, feat = pl.pallas_call(
        head_kernel,
        out_shape=(
            jax.ShapeDtypeStruct((B, Cp), jnp.float32),
            jax.ShapeDtypeStruct((B, D), jnp.float32),
        ),
        grid=(1,),                              # all B rows in a single grid step
        in_specs=[
            pl.BlockSpec((B, D), lambda i: (0, 0)),
            pl.BlockSpec((1, D), lambda i: (0, 0)),
            pl.BlockSpec((1, D), lambda i: (0, 0)),
            pl.BlockSpec((D, Cp), lambda i: (0, 0)),
            pl.BlockSpec((1, Cp), lambda i: (0, 0)),
        ],
        out_specs=[
            pl.BlockSpec((B, Cp), lambda i: (0, 0)),
            pl.BlockSpec((B, D), lambda i: (0, 0)),
        ],
        compiler_params=_PARAMS_1D,
    )(x_cls, norm_w, norm_b, hw, hb)
    return logits_p[:, :C], feat


# ----------------------------------------------------------------------------
# Parameter construction (deterministic, synthetic)
# ----------------------------------------------------------------------------
def _dense(key, d_in, d_out):
    kw, kb = jax.random.split(key)
    # matmul weights stored bf16 (halves weight DMA, bf16 MXU); bias stays f32
    w = (0.02 * jax.random.normal(kw, (d_in, d_out), jnp.float32)).astype(jnp.bfloat16)
    b = 0.02 * jax.random.normal(kb, (1, d_out), jnp.float32)
    return w, b


def _make_block_stack(key, depth, dim, num_heads, mlp_ratio):
    """Per-block params stacked along a leading depth axis (so depth can be a grid axis)."""
    hidden = int(dim * mlp_ratio)
    scale = (dim // num_heads) ** -0.5
    per = []
    for k in jax.random.split(key, depth):
        k1, k2, k3, k4 = jax.random.split(k, 4)
        qkv_w, qkv_b = _dense(k1, dim, 3 * dim)
        # fold the attention scale into the q columns (removes an in-kernel multiply);
        # for loaded PyTorch weights this fold happens once at conversion time.
        qkv_w = qkv_w.at[:, :dim].multiply(scale)
        qkv_b = qkv_b.at[:, :dim].multiply(scale)
        proj_w, proj_b = _dense(k2, dim, dim)
        fc1_w, fc1_b = _dense(k3, dim, hidden)
        fc2_w, fc2_b = _dense(k4, hidden, dim)
        per.append(dict(
            n1w=jnp.ones((1, dim), jnp.float32), n1b=jnp.zeros((1, dim), jnp.float32),
            qkv_w=qkv_w, qkv_b=qkv_b, proj_w=proj_w, proj_b=proj_b,
            n2w=jnp.ones((1, dim), jnp.float32), n2b=jnp.zeros((1, dim), jnp.float32),
            fc1_w=fc1_w, fc1_b=fc1_b, fc2_w=fc2_w, fc2_b=fc2_b,
        ))
    return {k: jnp.stack([p[k] for p in per], axis=0) for k in per[0]}


def init_params(key, *, in_chans, img_size, patch, dim, num_heads, mlp_ratio,
                depth, selected_layers, aux_depth, num_classes):
    n_patches = (img_size // patch) ** 2
    n_tok = n_patches + 1
    keys = jax.random.split(key, 5 + 2 * len(selected_layers))
    ki = iter(keys)

    patch_w, patch_b = _dense(next(ki), in_chans * patch * patch, dim)
    cls_token = 0.02 * jax.random.normal(next(ki), (1, 1, dim), jnp.float32)
    pos_embed = 0.02 * jax.random.normal(next(ki), (1, n_tok, dim), jnp.float32)
    blocks = _make_block_stack(next(ki), depth, dim, num_heads, mlp_ratio)
    head_w, head_b = _dense(next(ki), dim, num_classes)

    backbone = dict(
        patch_w=patch_w, patch_b=patch_b, cls_token=cls_token, pos_embed=pos_embed,
        blocks=blocks,
        norm_w=jnp.ones((1, dim), jnp.float32), norm_b=jnp.zeros((1, dim), jnp.float32),
        head_w=head_w, head_b=head_b,
    )

    aux_layers = []
    for _ in selected_layers:
        ablocks = _make_block_stack(next(ki), aux_depth, dim, num_heads, mlp_ratio)
        hw, hb = _dense(next(ki), dim, num_classes)   # normalized=False -> nn.Linear head
        aux_layers.append(dict(
            blocks=ablocks,
            norm_w=jnp.ones((1, dim), jnp.float32),
            norm_b=jnp.zeros((1, dim), jnp.float32),
            head_w=hw, head_b=hb,
        ))
    return dict(backbone=backbone, aux=aux_layers)


# ----------------------------------------------------------------------------
# Forward pass (mirrors VisionTransformer.forward)
# ----------------------------------------------------------------------------
def im2col(x, patch):
    # x: (B, C, H, W) -> (B, num_patches, C*patch*patch), patches row-major, (C, kh, kw) order
    B, C, H, W = x.shape
    gh, gw = H // patch, W // patch
    x = x.reshape(B, C, gh, patch, gw, patch)
    x = jnp.transpose(x, (0, 2, 4, 1, 3, 5))           # (B, gh, gw, C, p, p)
    return x.reshape(B, gh * gw, C * patch * patch)


def _split_segments(depth, selected_layers):
    # segment boundaries right AFTER each selected layer (feature tap points)
    bounds = sorted(set(int(i) + 1 for i in selected_layers if 0 <= int(i) < depth))
    segs, start = [], 0
    for b in bounds:
        segs.append((start, b))
        start = b
    if start < depth:
        segs.append((start, depth))
    return segs


def vit_ensemble_forward(x_img, params, *, patch, num_heads, selected_layers):
    bb = params["backbone"]
    B = x_img.shape[0]
    D = bb["cls_token"].shape[-1]

    # patch_embed (conv == matmul on im2col'd patches, done in Pallas)
    tokens = run_patch_embed(im2col(x_img, patch), bb["patch_w"], bb["patch_b"])
    # _pos_embed: prepend cls token, add positional embedding (glue)
    cls = jnp.broadcast_to(bb["cls_token"], (B, 1, D))
    x = jnp.concatenate([cls, tokens], axis=1) + bb["pos_embed"]
    # patch_drop / norm_pre: identity

    depth = bb["blocks"]["qkv_w"].shape[0]
    feat_by_layer = {}
    for (s, e) in _split_segments(depth, selected_layers):
        seg = {k: v[s:e] for k, v in bb["blocks"].items()}
        x = run_blocks(x, seg, num_heads)
        if (e - 1) in selected_layers:
            feat_by_layer[e - 1] = x

    logits_list, final_features = [], []
    for idx, aux in enumerate(params["aux"]):
        h = feat_by_layer[selected_layers[idx]]
        h = run_blocks(h, aux["blocks"], num_heads)
        logit, feat = run_head(h[:, 0, :], aux["norm_w"], aux["norm_b"],
                               aux["head_w"], aux["head_b"])
        logits_list.append(logit)
        final_features.append(feat)

    # backbone: norm -> token pool -> fc_norm(identity) -> head
    logit, feat = run_head(x[:, 0, :], bb["norm_w"], bb["norm_b"], bb["head_w"], bb["head_b"])
    final_features.append(feat)
    logits_list.append(logit)
    return logits_list, final_features


# ----------------------------------------------------------------------------
if __name__ == "__main__":
    # small ViT config implied by the module
    B, C_IN, IMG, PATCH = 2, 3, 16, 8
    DIM, HEADS, MLP_RATIO = 32, 4, 4.0
    DEPTH = 4
    SELECTED_LAYERS = (1, 2)
    AUX_DEPTH = 2
    NUM_CLASSES = 10

    key = jax.random.PRNGKey(0)
    k_in, k_par = jax.random.split(key)
    x_img = jax.random.normal(k_in, (B, C_IN, IMG, IMG), jnp.float32)

    params = init_params(
        k_par, in_chans=C_IN, img_size=IMG, patch=PATCH, dim=DIM, num_heads=HEADS,
        mlp_ratio=MLP_RATIO, depth=DEPTH, selected_layers=SELECTED_LAYERS,
        aux_depth=AUX_DEPTH, num_classes=NUM_CLASSES,
    )

    fwd = jax.jit(functools.partial(
        vit_ensemble_forward, patch=PATCH, num_heads=HEADS, selected_layers=SELECTED_LAYERS))

    logits, feats = fwd(x_img, params)
    jax.block_until_ready(logits)
    jax.block_until_ready(feats)

    assert len(logits) == len(SELECTED_LAYERS) + 1
    assert all(l.shape == (B, NUM_CLASSES) for l in logits)
    assert all(f.shape == (B, DIM) for f in feats)
    print("KERNEL_OK")
</pallas_src>

<mosaic_0001>
module attributes {stable_mosaic.version = 11 : i64} {
  func.func @patch_embed_kernel(%arg0: i32, %arg1: memref<8x192xf32, #tpu.memory_space<vmem>>, %arg2: memref<192x32xbf16, #tpu.memory_space<vmem>>, %arg3: memref<1x32xf32, #tpu.memory_space<vmem>>, %arg4: memref<8x32xf32, #tpu.memory_space<vmem>>) attributes {dimension_semantics = [#tpu.dimension_semantics<parallel>], iteration_bounds = array<i64: 1>, scalar_prefetch = 0 : i64, scratch_operands = 0 : i64, tpu.core_type = #tpu.core_type<tc>, window_params = [{transform_indices = @transform_0, window_bounds = array<i64: 8, 192>}, {pipeline_mode = #tpu.pipeline_mode<synchronous>, transform_indices = @transform_1, window_bounds = array<i64: 192, 32>}, {pipeline_mode = #tpu.pipeline_mode<synchronous>, transform_indices = @transform_2, window_bounds = array<i64: 1, 32>}, {transform_indices = @transform_3, window_bounds = array<i64: 8, 32>}]} {
    %c0 = arith.constant 0 : index
    %c0_0 = arith.constant 0 : index
    %0 = vector.load %arg1[%c0, %c0_0] : memref<8x192xf32, #tpu.memory_space<vmem>>, vector<8x192xf32>
    %1 = arith.truncf %0 : vector<8x192xf32> to vector<8x192xbf16>
    %c0_1 = arith.constant 0 : index
    %c0_2 = arith.constant 0 : index
    %2 = vector.load %arg2[%c0_1, %c0_2] : memref<192x32xbf16, #tpu.memory_space<vmem>>, vector<192x32xbf16>
    %cst = arith.constant dense<0.000000e+00> : vector<8x32xf32>
    %3 = tpu.matmul %1, %2, %cst {dimension_numbers = #tpu.dot_dimension_numbers<[1], [0], [0], [1], [0, 0, 1, 1], [], []>} : vector<8x192xbf16>, vector<192x32xbf16>, vector<8x32xf32> -> vector<8x32xf32>
    %c0_3 = arith.constant 0 : index
    %c0_4 = arith.constant 0 : index
    %4 = vector.load %arg3[%c0_3, %c0_4] : memref<1x32xf32, #tpu.memory_space<vmem>>, vector<1x32xf32>
    %5 = vector.broadcast %4 : vector<1x32xf32> to vector<8x32xf32>
    %6 = arith.addf %3, %5 : vector<8x32xf32>
    %c0_5 = arith.constant 0 : index
    %c0_6 = arith.constant 0 : index
    %7 = vector.load %arg4[%c0_5, %c0_6] : memref<8x32xf32, #tpu.memory_space<vmem>>, vector<8x32xf32>
    tpu.vector_store %arg4[%c0_5, %c0_6], %6 {strides = array<i32>} : memref<8x32xf32, #tpu.memory_space<vmem>>, vector<8x32xf32>,
    return
  }
  func.func @transform_0(%arg0: i32) -> (i32, i32) {
    %c0_i32 = arith.constant 0 : i32
    %c0_i32_0 = arith.constant 0 : i32
    return %arg0, %c0_i32 : i32, i32
  }
  func.func @transform_1(%arg0: i32) -> (i32, i32) {
    %c0_i32 = arith.constant 0 : i32
    %c0_i32_0 = arith.constant 0 : i32
    %c0_i32_1 = arith.constant 0 : i32
    return %c0_i32, %c0_i32_0 : i32, i32
  }
  func.func @transform_2(%arg0: i32) -> (i32, i32) {
    %c0_i32 = arith.constant 0 : i32
    %c0_i32_0 = arith.constant 0 : i32
    %c0_i32_1 = arith.constant 0 : i32
    return %c0_i32, %c0_i32_0 : i32, i32
  }
  func.func @transform_3(%arg0: i32) -> (i32, i32) {
    %c0_i32 = arith.constant 0 : i32
    %c0_i32_0 = arith.constant 0 : i32
    return %arg0, %c0_i32 : i32, i32
  }
}

module attributes {stable_mosaic.version = 11 : i64} {
  func.func @vit_blocks_kernel(%arg0: i32, %arg1: i32, %arg2: memref<1x5x32xf32, #tpu.memory_space<vmem>>, %arg3: memref<1x1x32xf32, #tpu.memory_space<vmem>>, %arg4: memref<1x1x32xf32, #tpu.memory_space<vmem>>, %arg5: memref<1x32x96xbf16, #tpu.memory_space<vmem>>, %arg6: memref<1x1x96xf32, #tpu.memory_space<vmem>>, %arg7: memref<1x32x32xbf16, #tpu.memory_space<vmem>>, %arg8: memref<1x1x32xf32, #tpu.memory_space<vmem>>, %arg9: memref<1x1x32xf32, #tpu.memory_space<vmem>>, %arg10: memref<1x1x32xf32, #tpu.memory_space<vmem>>, %arg11: memref<1x32x128xbf16, #tpu.memory_space<vmem>>, %arg12: memref<1x1x128xf32, #tpu.memory_space<vmem>>, %arg13: memref<1x128x32xbf16, #tpu.memory_space<vmem>>, %arg14: memref<1x1x32xf32, #tpu.memory_space<vmem>>, %arg15: memref<1x5x32xf32, #tpu.memory_space<vmem>>) attributes {dimension_semantics = [#tpu.dimension_semantics<parallel>, #tpu.dimension_semantics<arbitrary>], iteration_bounds = array<i64: 2, 2>, scalar_prefetch = 0 : i64, scratch_operands = 0 : i64, tpu.core_type = #tpu.core_type<tc>, window_params = [{transform_indices = @transform_0, window_bounds = array<i64: 1, 5, 32>}, {transform_indices = @transform_1, window_bounds = array<i64: 1, 1, 32>}, {transform_indices = @transform_2, window_bounds = array<i64: 1, 1, 32>}, {transform_indices = @transform_3, window_bounds = array<i64: 1, 32, 96>}, {transform_indices = @transform_4, window_bounds = array<i64: 1, 1, 96>}, {transform_indices = @transform_5, window_bounds = array<i64: 1, 32, 32>}, {transform_indices = @transform_6, window_bounds = array<i64: 1, 1, 32>}, {transform_indices = @transform_7, window_bounds = array<i64: 1, 1, 32>}, {transform_indices = @transform_8, window_bounds = array<i64: 1, 1, 32>}, {transform_indices = @transform_9, window_bounds = array<i64: 1, 32, 128>}, {transform_indices = @transform_10, window_bounds = array<i64: 1, 1, 128>}, {transform_indices = @transform_11, window_bounds = array<i64: 1, 128, 32>}, {transform_indices = @transform_12, window_bounds = array<i64: 1, 1, 32>}, {transform_indices = @transform_13, window_bounds = array<i64: 1, 5, 32>}]} {
    %c0_i32 = arith.constant 0 : i32
    %0 = arith.cmpi eq, %arg1, %c0_i32 : i32
    %1 = arith.extui %0 : i1 to i32
    %c0_i32_0 = arith.constant 0 : i32
    %2 = arith.cmpi ne, %1, %c0_i32_0 : i32
    scf.if %2 {
      %c0_63 = arith.constant 0 : index
      %c0_64 = arith.constant 0 : index
      %c0_65 = arith.constant 0 : index
      %162 = vector.load %arg2[%c0_63, %c0_64, %c0_65] : memref<1x5x32xf32, #tpu.memory_space<vmem>>, vector<1x5x32xf32>
      %163 = vector.shape_cast %162 : vector<1x5x32xf32> to vector<5x32xf32>
      %c0_66 = arith.constant 0 : index
      %c0_67 = arith.constant 0 : index
      %c0_68 = arith.constant 0 : index
      %164 = vector.load %arg15[%c0_66, %c0_67, %c0_68] : memref<1x5x32xf32, #tpu.memory_space<vmem>>, vector<1x5x32xf32>
      %165 = vector.shape_cast %164 : vector<1x5x32xf32> to vector<5x32xf32>
      %166 = vector.shape_cast %163 : vector<5x32xf32> to vector<1x5x32xf32>
      tpu.vector_store %arg15[%c0_66, %c0_67, %c0_68], %166 {strides = array<i32>} : memref<1x5x32xf32, #tpu.memory_space<vmem>>, vector<1x5x32xf32>,
    } else {
    }
    %c0 = arith.constant 0 : index
    %c0_1 = arith.constant 0 : index
    %c0_2 = arith.constant 0 : index
    %3 = vector.load %arg15[%c0, %c0_1, %c0_2] : memref<1x5x32xf32, #tpu.memory_space<vmem>>, vector<1x5x32xf32>
    %4 = vector.shape_cast %3 : vector<1x5x32xf32> to vector<5x32xf32>
    %cst = arith.constant dense<0.000000e+00> : vector<5xf32>
    %5 = vector.multi_reduction <add>, %4, %cst [1] : vector<5x32xf32> to vector<5xf32>
    %6 = vector.shape_cast %5 : vector<5xf32> to vector<5x1xf32>
    %cst_3 = arith.constant 3.200000e+01 : f32
    %7 = vector.broadcast %cst_3 : f32 to vector<5x1xf32>
    %8 = arith.divf %6, %7 : vector<5x1xf32>
    %9 = vector.broadcast %8 : vector<5x1xf32> to vector<5x32xf32>
    %10 = arith.subf %4, %9 : vector<5x32xf32>
    %11 = arith.mulf %10, %10 : vector<5x32xf32>
    %cst_4 = arith.constant dense<0.000000e+00> : vector<5xf32>
    %12 = vector.multi_reduction <add>, %11, %cst_4 [1] : vector<5x32xf32> to vector<5xf32>
    %13 = vector.shape_cast %12 : vector<5xf32> to vector<5x1xf32>
    %cst_5 = arith.constant 3.200000e+01 : f32
    %14 = vector.broadcast %cst_5 : f32 to vector<5x1xf32>
    %15 = arith.divf %13, %14 : vector<5x1xf32>
    %16 = vector.broadcast %8 : vector<5x1xf32> to vector<5x32xf32>
    %17 = arith.subf %4, %16 : vector<5x32xf32>
    %cst_6 = arith.constant 9.99999997E-7 : f32
    %18 = vector.broadcast %cst_6 : f32 to vector<5x1xf32>
    %19 = arith.addf %15, %18 : vector<5x1xf32>
    %20 = math.rsqrt %19 : vector<5x1xf32>
    %21 = vector.broadcast %20 : vector<5x1xf32> to vector<5x32xf32>
    %22 = arith.mulf %17, %21 : vector<5x32xf32>
    %c0_7 = arith.constant 0 : index
    %c0_8 = arith.constant 0 : index
    %c0_9 = arith.constant 0 : index
    %23 = vector.load %arg3[%c0_7, %c0_8, %c0_9] : memref<1x1x32xf32, #tpu.memory_space<vmem>>, vector<1x1x32xf32>
    %24 = vector.shape_cast %23 : vector<1x1x32xf32> to vector<1x32xf32>
    %25 = vector.broadcast %24 : vector<1x32xf32> to vector<5x32xf32>
    %26 = arith.mulf %22, %25 : vector<5x32xf32>
    %c0_10 = arith.constant 0 : index
    %c0_11 = arith.constant 0 : index
    %c0_12 = arith.constant 0 : index
    %27 = vector.load %arg4[%c0_10, %c0_11, %c0_12] : memref<1x1x32xf32, #tpu.memory_space<vmem>>, vector<1x1x32xf32>
    %28 = vector.shape_cast %27 : vector<1x1x32xf32> to vector<1x32xf32>
    %29 = vector.broadcast %28 : vector<1x32xf32> to vector<5x32xf32>
    %30 = arith.addf %26, %29 : vector<5x32xf32>
    %31 = arith.truncf %30 : vector<5x32xf32> to vector<5x32xbf16>
    %c0_13 = arith.constant 0 : index
    %c0_14 = arith.constant 0 : index
    %c0_15 = arith.constant 0 : index
    %32 = vector.load %arg5[%c0_13, %c0_14, %c0_15] : memref<1x32x96xbf16, #tpu.memory_space<vmem>>, vector<1x32x96xbf16>
    %33 = vector.shape_cast %32 : vector<1x32x96xbf16> to vector<32x96xbf16>
    %cst_16 = arith.constant dense<0.000000e+00> : vector<5x96xf32>
    %34 = tpu.matmul %31, %33, %cst_16 {dimension_numbers = #tpu.dot_dimension_numbers<[1], [0], [0], [1], [0, 0, 1, 1], [], []>} : vector<5x32xbf16>, vector<32x96xbf16>, vector<5x96xf32> -> vector<5x96xf32>
    %c0_17 = arith.constant 0 : index
    %c0_18 = arith.constant 0 : index
    %c0_19 = arith.constant 0 : index
    %35 = vector.load %arg6[%c0_17, %c0_18, %c0_19] : memref<1x1x96xf32, #tpu.memory_space<vmem>>, vector<1x1x96xf32>
    %36 = vector.shape_cast %35 : vector<1x1x96xf32> to vector<1x96xf32>
    %37 = vector.broadcast %36 : vector<1x96xf32> to vector<5x96xf32>
    %38 = arith.addf %34, %37 : vector<5x96xf32>
    %39 = vector.extract_strided_slice %38 {offsets = [0, 0], sizes = [5, 32], strides = [1, 1]} : vector<5x96xf32> to vector<5x32xf32>
    %40 = arith.truncf %39 : vector<5x32xf32> to vector<5x32xbf16>
    %41 = vector.extract_strided_slice %38 {offsets = [0, 32], sizes = [5, 32], strides = [1, 1]} : vector<5x96xf32> to vector<5x32xf32>
    %42 = arith.truncf %41 : vector<5x32xf32> to vector<5x32xbf16>
    %43 = vector.extract_strided_slice %38 {offsets = [0, 64], sizes = [5, 32], strides = [1, 1]} : vector<5x96xf32> to vector<5x32xf32>
    %44 = arith.truncf %43 : vector<5x32xf32> to vector<5x32xbf16>
    %45 = vector.extract_strided_slice %40 {offsets = [0, 0], sizes = [5, 8], strides = [1, 1]} : vector<5x32xbf16> to vector<5x8xbf16>
    %46 = vector.extract_strided_slice %40 {offsets = [0, 8], sizes = [5, 8], strides = [1, 1]} : vector<5x32xbf16> to vector<5x8xbf16>
    %47 = vector.extract_strided_slice %40 {offsets = [0, 16], sizes = [5, 8], strides = [1, 1]} : vector<5x32xbf16> to vector<5x8xbf16>
    %48 = vector.extract_strided_slice %40 {offsets = [0, 24], sizes = [5, 8], strides = [1, 1]} : vector<5x32xbf16> to vector<5x8xbf16>
    %49 = vector.shape_cast %45 : vector<5x8xbf16> to vector<1x5x8xbf16>
    %50 = vector.shape_cast %46 : vector<5x8xbf16> to vector<1x5x8xbf16>
    %51 = vector.shape_cast %47 : vector<5x8xbf16> to vector<1x5x8xbf16>
    %52 = vector.shape_cast %48 : vector<5x8xbf16> to vector<1x5x8xbf16>
    %53 = tpu.concatenate %49, %50, %51, %52 in 0 : vector<1x5x8xbf16>, vector<1x5x8xbf16>, vector<1x5x8xbf16>, vector<1x5x8xbf16> -> vector<4x5x8xbf16>
    %54 = vector.extract_strided_slice %42 {offsets = [0, 0], sizes = [5, 8], strides = [1, 1]} : vector<5x32xbf16> to vector<5x8xbf16>
    %55 = vector.extract_strided_slice %42 {offsets = [0, 8], sizes = [5, 8], strides = [1, 1]} : vector<5x32xbf16> to vector<5x8xbf16>
    %56 = vector.extract_strided_slice %42 {offsets = [0, 16], sizes = [5, 8], strides = [1, 1]} : vector<5x32xbf16> to vector<5x8xbf16>
    %57 = vector.extract_strided_slice %42 {offsets = [0, 24], sizes = [5, 8], strides = [1, 1]} : vector<5x32xbf16> to vector<5x8xbf16>
    %58 = vector.shape_cast %54 : vector<5x8xbf16> to vector<1x5x8xbf16>
    %59 = vector.shape_cast %55 : vector<5x8xbf16> to vector<1x5x8xbf16>
    %60 = vector.shape_cast %56 : vector<5x8xbf16> to vector<1x5x8xbf16>
    %61 = vector.shape_cast %57 : vector<5x8xbf16> to vector<1x5x8xbf16>
    %62 = tpu.concatenate %58, %59, %60, %61 in 0 : vector<1x5x8xbf16>, vector<1x5x8xbf16>, vector<1x5x8xbf16>, vector<1x5x8xbf16> -> vector<4x5x8xbf16>
    %63 = vector.extract_strided_slice %44 {offsets = [0, 0], sizes = [5, 8], strides = [1, 1]} : vector<5x32xbf16> to vector<5x8xbf16>
    %64 = vector.extract_strided_slice %44 {offsets = [0, 8], sizes = [5, 8], strides = [1, 1]} : vector<5x32xbf16> to vector<5x8xbf16>
    %65 = vector.extract_strided_slice %44 {offsets = [0, 16], sizes = [5, 8], strides = [1, 1]} : vector<5x32xbf16> to vector<5x8xbf16>
    %66 = vector.extract_strided_slice %44 {offsets = [0, 24], sizes = [5, 8], strides = [1, 1]} : vector<5x32xbf16> to vector<5x8xbf16>
    %67 = vector.shape_cast %63 : vector<5x8xbf16> to vector<1x5x8xbf16>
    %68 = vector.shape_cast %64 : vector<5x8xbf16> to vector<1x5x8xbf16>
    %69 = vector.shape_cast %65 : vector<5x8xbf16> to vector<1x5x8xbf16>
    %70 = vector.shape_cast %66 : vector<5x8xbf16> to vector<1x5x8xbf16>
    %71 = tpu.concatenate %67, %68, %69, %70 in 0 : vector<1x5x8xbf16>, vector<1x5x8xbf16>, vector<1x5x8xbf16>, vector<1x5x8xbf16> -> vector<4x5x8xbf16>
    "tpu.trace_start"() <{level = 10 : i32, message = "hqd,hkd->hqk"}> : () -> ()
    %cst_20 = arith.constant dense<0.000000e+00> : vector<4x5x5xf32>
    %72 = tpu.matmul %53, %62, %cst_20 {dimension_numbers = #tpu.dot_dimension_numbers<[2], [2], [1], [1], [0, 0, 0, 1, 1, 1], [0], [0]>} : vector<4x5x8xbf16>, vector<4x5x8xbf16>, vector<4x5x5xf32> -> vector<4x5x5xf32>
    "tpu.trace_stop"() : () -> ()
    %cst_21 = arith.constant dense<0xFF800000> : vector<4x5xf32>
    %73 = vector.multi_reduction <maximumf>, %72, %cst_21 [2] : vector<4x5x5xf32> to vector<4x5xf32>
    %74 = vector.shape_cast %73 : vector<4x5xf32> to vector<4x5x1xf32>
    %75 = vector.broadcast %74 : vector<4x5x1xf32> to vector<4x5x5xf32>
    %76 = arith.subf %72, %75 : vector<4x5x5xf32>
    %77 = math.exp %76 : vector<4x5x5xf32>
    %cst_22 = arith.constant dense<0.000000e+00> : vector<4x5xf32>
    %78 = vector.multi_reduction <add>, %77, %cst_22 [2] : vector<4x5x5xf32> to vector<4x5xf32>
    %79 = vector.shape_cast %78 : vector<4x5xf32> to vector<4x5x1xf32>
    %80 = tpu.reciprocal %79 {approx = true} : vector<4x5x1xf32> -> vector<4x5x1xf32>
    %81 = vector.broadcast %80 : vector<4x5x1xf32> to vector<4x5x5xf32>
    %82 = arith.mulf %77, %81 : vector<4x5x5xf32>
    %83 = arith.truncf %82 : vector<4x5x5xf32> to vector<4x5x5xbf16>
    "tpu.trace_start"() <{level = 10 : i32, message = "hqk,hkd->hqd"}> : () -> ()
    %cst_23 = arith.constant dense<0.000000e+00> : vector<4x5x8xf32>
    %84 = tpu.matmul %83, %71, %cst_23 {dimension_numbers = #tpu.dot_dimension_numbers<[2], [1], [1], [2], [0, 0, 0, 1, 1, 2], [0], [0]>} : vector<4x5x5xbf16>, vector<4x5x8xbf16>, vector<4x5x8xf32> -> vector<4x5x8xf32>
    "tpu.trace_stop"() : () -> ()
    %85 = arith.truncf %84 : vector<4x5x8xf32> to vector<4x5x8xbf16>
    %86 = vector.extract_strided_slice %85 {offsets = [0, 0, 0], sizes = [1, 5, 8], strides = [1, 1, 1]} : vector<4x5x8xbf16> to vector<1x5x8xbf16>
    %87 = vector.shape_cast %86 : vector<1x5x8xbf16> to vector<5x8xbf16>
    %88 = vector.extract_strided_slice %85 {offsets = [1, 0, 0], sizes = [1, 5, 8], strides = [1, 1, 1]} : vector<4x5x8xbf16> to vector<1x5x8xbf16>
    %89 = vector.shape_cast %88 : vector<1x5x8xbf16> to vector<5x8xbf16>
    %90 = vector.extract_strided_slice %85 {offsets = [2, 0, 0], sizes = [1, 5, 8], strides = [1, 1, 1]} : vector<4x5x8xbf16> to vector<1x5x8xbf16>
    %91 = vector.shape_cast %90 : vector<1x5x8xbf16> to vector<5x8xbf16>
    %92 = vector.extract_strided_slice %85 {offsets = [3, 0, 0], sizes = [1, 5, 8], strides = [1, 1, 1]} : vector<4x5x8xbf16> to vector<1x5x8xbf16>
    %93 = vector.shape_cast %92 : vector<1x5x8xbf16> to vector<5x8xbf16>
    %94 = tpu.concatenate %87, %89, %91, %93 in 1 : vector<5x8xbf16>, vector<5x8xbf16>, vector<5x8xbf16>, vector<5x8xbf16> -> vector<5x32xbf16>
    %c0_24 = arith.constant 0 : index
    %c0_25 = arith.constant 0 : index
    %c0_26 = arith.constant 0 : index
    %95 = vector.load %arg7[%c0_24, %c0_25, %c0_26] : memref<1x32x32xbf16, #tpu.memory_space<vmem>>, vector<1x32x32xbf16>
    %96 = vector.shape_cast %95 : vector<1x32x32xbf16> to vector<32x32xbf16>
    %cst_27 = arith.constant dense<0.000000e+00> : vector<5x32xf32>
    %97 = tpu.matmul %94, %96, %cst_27 {dimension_numbers = #tpu.dot_dimension_numbers<[1], [0], [0], [1], [0, 0, 1, 1], [], []>} : vector<5x32xbf16>, vector<32x32xbf16>, vector<5x32xf32> -> vector<5x32xf32>
    %c0_28 = arith.constant 0 : index
    %c0_29 = arith.constant 0 : index
    %c0_30 = arith.constant 0 : index
    %98 = vector.load %arg8[%c0_28, %c0_29, %c0_30] : memref<1x1x32xf32, #tpu.memory_space<vmem>>, vector<1x1x32xf32>
    %99 = vector.shape_cast %98 : vector<1x1x32xf32> to vector<1x32xf32>
    %100 = vector.broadcast %99 : vector<1x32xf32> to vector<5x32xf32>
    %101 = arith.addf %97, %100 : vector<5x32xf32>
    %102 = arith.addf %4, %101 : vector<5x32xf32>
    %cst_31 = arith.constant dense<0.000000e+00> : vector<5xf32>
    %103 = vector.multi_reduction <add>, %102, %cst_31 [1] : vector<5x32xf32> to vector<5xf32>
    %104 = vector.shape_cast %103 : vector<5xf32> to vector<5x1xf32>
    %cst_32 = arith.constant 3.200000e+01 : f32
    %105 = vector.broadcast %cst_32 : f32 to vector<5x1xf32>
    %106 = arith.divf %104, %105 : vector<5x1xf32>
    %107 = vector.broadcast %106 : vector<5x1xf32> to vector<5x32xf32>
    %108 = arith.subf %102, %107 : vector<5x32xf32>
    %109 = arith.mulf %108, %108 : vector<5x32xf32>
    %cst_33 = arith.constant dense<0.000000e+00> : vector<5xf32>
    %110 = vector.multi_reduction <add>, %109, %cst_33 [1] : vector<5x32xf32> to vector<5xf32>
    %111 = vector.shape_cast %110 : vector<5xf32> to vector<5x1xf32>
    %cst_34 = arith.constant 3.200000e+01 : f32
    %112 = vector.broadcast %cst_34 : f32 to vector<5x1xf32>
    %113 = arith.divf %111, %112 : vector<5x1xf32>
    %114 = vector.broadcast %106 : vector<5x1xf32> to vector<5x32xf32>
    %115 = arith.subf %102, %114 : vector<5x32xf32>
    %cst_35 = arith.constant 9.99999997E-7 : f32
    %116 = vector.broadcast %cst_35 : f32 to vector<5x1xf32>
    %117 = arith.addf %113, %116 : vector<5x1xf32>
    %118 = math.rsqrt %117 : vector<5x1xf32>
    %119 = vector.broadcast %118 : vector<5x1xf32> to vector<5x32xf32>
    %120 = arith.mulf %115, %119 : vector<5x32xf32>
    %c0_36 = arith.constant 0 : index
    %c0_37 = arith.constant 0 : index
    %c0_38 = arith.constant 0 : index
    %121 = vector.load %arg9[%c0_36, %c0_37, %c0_38] : memref<1x1x32xf32, #tpu.memory_space<vmem>>, vector<1x1x32xf32>
    %122 = vector.shape_cast %121 : vector<1x1x32xf32> to vector<1x32xf32>
    %123 = vector.broadcast %122 : vector<1x32xf32> to vector<5x32xf32>
    %124 = arith.mulf %120, %123 : vector<5x32xf32>
    %c0_39 = arith.constant 0 : index
    %c0_40 = arith.constant 0 : index
    %c0_41 = arith.constant 0 : index
    %125 = vector.load %arg10[%c0_39, %c0_40, %c0_41] : memref<1x1x32xf32, #tpu.memory_space<vmem>>, vector<1x1x32xf32>
    %126 = vector.shape_cast %125 : vector<1x1x32xf32> to vector<1x32xf32>
    %127 = vector.broadcast %126 : vector<1x32xf32> to vector<5x32xf32>
    %128 = arith.addf %124, %127 : vector<5x32xf32>
    %129 = arith.truncf %128 : vector<5x32xf32> to vector<5x32xbf16>
    %c0_42 = arith.constant 0 : index
    %c0_43 = arith.constant 0 : index
    %c0_44 = arith.constant 0 : index
    %130 = vector.load %arg11[%c0_42, %c0_43, %c0_44] : memref<1x32x128xbf16, #tpu.memory_space<vmem>>, vector<1x32x128xbf16>
    %131 = vector.shape_cast %130 : vector<1x32x128xbf16> to vector<32x128xbf16>
    %cst_45 = arith.constant dense<0.000000e+00> : vector<5x128xf32>
    %132 = tpu.matmul %129, %131, %cst_45 {dimension_numbers = #tpu.dot_dimension_numbers<[1], [0], [0], [1], [0, 0, 1, 1], [], []>} : vector<5x32xbf16>, vector<32x128xbf16>, vector<5x128xf32> -> vector<5x128xf32>
    %c0_46 = arith.constant 0 : index
    %c0_47 = arith.constant 0 : index
    %c0_48 = arith.constant 0 : index
    %133 = vector.load %arg12[%c0_46, %c0_47, %c0_48] : memref<1x1x128xf32, #tpu.memory_space<vmem>>, vector<1x1x128xf32>
    %134 = vector.shape_cast %133 : vector<1x1x128xf32> to vector<1x128xf32>
    %135 = vector.broadcast %134 : vector<1x128xf32> to vector<5x128xf32>
    %136 = arith.addf %132, %135 : vector<5x128xf32>
    %137 = arith.mulf %136, %136 : vector<5x128xf32>
    %138 = arith.mulf %136, %137 : vector<5x128xf32>
    %cst_49 = arith.constant 4.471500e-02 : f32
    %139 = vector.broadcast %cst_49 : f32 to vector<5x128xf32>
    %140 = arith.mulf %139, %138 : vector<5x128xf32>
    %141 = arith.addf %136, %140 : vector<5x128xf32>
    %cst_50 = arith.constant 0.797884583 : f32
    %142 = vector.broadcast %cst_50 : f32 to vector<5x128xf32>
    %143 = arith.mulf %142, %141 : vector<5x128xf32>
    %144 = math.tanh %143 : vector<5x128xf32>
    %cst_51 = arith.constant 1.000000e+00 : f32
    %145 = vector.broadcast %cst_51 : f32 to vector<5x128xf32>
    %146 = arith.addf %145, %144 : vector<5x128xf32>
    %cst_52 = arith.constant 5.000000e-01 : f32
    %147 = vector.broadcast %cst_52 : f32 to vector<5x128xf32>
    %148 = arith.mulf %147, %146 : vector<5x128xf32>
    %149 = arith.mulf %136, %148 : vector<5x128xf32>
    %150 = arith.truncf %149 : vector<5x128xf32> to vector<5x128xbf16>
    %c0_53 = arith.constant 0 : index
    %c0_54 = arith.constant 0 : index
    %c0_55 = arith.constant 0 : index
    %151 = vector.load %arg13[%c0_53, %c0_54, %c0_55] : memref<1x128x32xbf16, #tpu.memory_space<vmem>>, vector<1x128x32xbf16>
    %152 = vector.shape_cast %151 : vector<1x128x32xbf16> to vector<128x32xbf16>
    %cst_56 = arith.constant dense<0.000000e+00> : vector<5x32xf32>
    %153 = tpu.matmul %150, %152, %cst_56 {dimension_numbers = #tpu.dot_dimension_numbers<[1], [0], [0], [1], [0, 0, 1, 1], [], []>} : vector<5x128xbf16>, vector<128x32xbf16>, vector<5x32xf32> -> vector<5x32xf32>
    %c0_57 = arith.constant 0 : index
    %c0_58 = arith.constant 0 : index
    %c0_59 = arith.constant 0 : index
    %154 = vector.load %arg14[%c0_57, %c0_58, %c0_59] : memref<1x1x32xf32, #tpu.memory_space<vmem>>, vector<1x1x32xf32>
    %155 = vector.shape_cast %154 : vector<1x1x32xf32> to vector<1x32xf32>
    %156 = vector.broadcast %155 : vector<1x32xf32> to vector<5x32xf32>
    %157 = arith.addf %153, %156 : vector<5x32xf32>
    %158 = arith.addf %102, %157 : vector<5x32xf32>
    %c0_60 = arith.constant 0 : index
    %c0_61 = arith.constant 0 : index
    %c0_62 = arith.constant 0 : index
    %159 = vector.load %arg15[%c0_60, %c0_61, %c0_62] : memref<1x5x32xf32, #tpu.memory_space<vmem>>, vector<1x5x32xf32>
    %160 = vector.shape_cast %159 : vector<1x5x32xf32> to vector<5x32xf32>
    %161 = vector.shape_cast %158 : vector<5x32xf32> to vector<1x5x32xf32>
    tpu.vector_store %arg15[%c0_60, %c0_61, %c0_62], %161 {strides = array<i32>} : memref<1x5x32xf32, #tpu.memory_space<vmem>>, vector<1x5x32xf32>,
    return
  }
  func.func @transform_0(%arg0: i32, %arg1: i32) -> (i32, i32, i32) {
    %c0_i32 = arith.constant 0 : i32
    %c0_i32_0 = arith.constant 0 : i32
    %c0_i32_1 = arith.constant 0 : i32
    return %arg0, %c0_i32, %c0_i32_0 : i32, i32, i32
  }
  func.func @transform_1(%arg0: i32, %arg1: i32) -> (i32, i32, i32) {
    %c0_i32 = arith.constant 0 : i32
    %c0_i32_0 = arith.constant 0 : i32
    %c0_i32_1 = arith.constant 0 : i32
    return %arg1, %c0_i32, %c0_i32_0 : i32, i32, i32
  }
  func.func @transform_2(%arg0: i32, %arg1: i32) -> (i32, i32, i32) {
    %c0_i32 = arith.constant 0 : i32
    %c0_i32_0 = arith.constant 0 : i32
    %c0_i32_1 = arith.constant 0 : i32
    return %arg1, %c0_i32, %c0_i32_0 : i32, i32, i32
  }
  func.func @transform_3(%arg0: i32, %arg1: i32) -> (i32, i32, i32) {
    %c0_i32 = arith.constant 0 : i32
    %c0_i32_0 = arith.constant 0 : i32
    %c0_i32_1 = arith.constant 0 : i32
    return %arg1, %c0_i32, %c0_i32_0 : i32, i32, i32
  }
  func.func @transform_4(%arg0: i32, %arg1: i32) -> (i32, i32, i32) {
    %c0_i32 = arith.constant 0 : i32
    %c0_i32_0 = arith.constant 0 : i32
    %c0_i32_1 = arith.constant 0 : i32
    return %arg1, %c0_i32, %c0_i32_0 : i32, i32, i32
  }
  func.func @transform_5(%arg0: i32, %arg1: i32) -> (i32, i32, i32) {
    %c0_i32 = arith.constant 0 : i32
    %c0_i32_0 = arith.constant 0 : i32
    %c0_i32_1 = arith.constant 0 : i32
    return %arg1, %c0_i32, %c0_i32_0 : i32, i32, i32
  }
  func.func @transform_6(%arg0: i32, %arg1: i32) -> (i32, i32, i32) {
    %c0_i32 = arith.constant 0 : i32
    %c0_i32_0 = arith.constant 0 : i32
    %c0_i32_1 = arith.constant 0 : i32
    return %arg1, %c0_i32, %c0_i32_0 : i32, i32, i32
  }
  func.func @transform_7(%arg0: i32, %arg1: i32) -> (i32, i32, i32) {
    %c0_i32 = arith.constant 0 : i32
    %c0_i32_0 = arith.constant 0 : i32
    %c0_i32_1 = arith.constant 0 : i32
    return %arg1, %c0_i32, %c0_i32_0 : i32, i32, i32
  }
  func.func @transform_8(%arg0: i32, %arg1: i32) -> (i32, i32, i32) {
    %c0_i32 = arith.constant 0 : i32
    %c0_i32_0 = arith.constant 0 : i32
    %c0_i32_1 = arith.constant 0 : i32
    return %arg1, %c0_i32, %c0_i32_0 : i32, i32, i32
  }
  func.func @transform_9(%arg0: i32, %arg1: i32) -> (i32, i32, i32) {
    %c0_i32 = arith.constant 0 : i32
    %c0_i32_0 = arith.constant 0 : i32
    %c0_i32_1 = arith.constant 0 : i32
    return %arg1, %c0_i32, %c0_i32_0 : i32, i32, i32
  }
  func.func @transform_10(%arg0: i32, %arg1: i32) -> (i32, i32, i32) {
    %c0_i32 = arith.constant 0 : i32
    %c0_i32_0 = arith.constant 0 : i32
    %c0_i32_1 = arith.constant 0 : i32
    return %arg1, %c0_i32, %c0_i32_0 : i32, i32, i32
  }
  func.func @transform_11(%arg0: i32, %arg1: i32) -> (i32, i32, i32) {
    %c0_i32 = arith.constant 0 : i32
    %c0_i32_0 = arith.constant 0 : i32
    %c0_i32_1 = arith.constant 0 : i32
    return %arg1, %c0_i32, %c0_i32_0 : i32, i32, i32
  }
  func.func @transform_12(%arg0: i32, %arg1: i32) -> (i32, i32, i32) {
    %c0_i32 = arith.constant 0 : i32
    %c0_i32_0 = arith.constant 0 : i32
    %c0_i32_1 = arith.constant 0 : i32
    return %arg1, %c0_i32, %c0_i32_0 : i32, i32, i32
  }
  func.func @transform_13(%arg0: i32, %arg1: i32) -> (i32, i32, i32) {
    %c0_i32 = arith.constant 0 : i32
    %c0_i32_0 = arith.constant 0 : i32
    %c0_i32_1 = arith.constant 0 : i32
    return %arg0, %c0_i32, %c0_i32_0 : i32, i32, i32
  }
}

module attributes {stable_mosaic.version = 11 : i64} {
  func.func @head_kernel(%arg0: i32, %arg1: memref<2x32xf32, #tpu.memory_space<vmem>>, %arg2: memref<1x32xf32, #tpu.memory_space<vmem>>, %arg3: memref<1x32xf32, #tpu.memory_space<vmem>>, %arg4: memref<32x128xbf16, #tpu.memory_space<vmem>>, %arg5: memref<1x128xf32, #tpu.memory_space<vmem>>, %arg6: memref<2x128xf32, #tpu.memory_space<vmem>>, %arg7: memref<2x32xf32, #tpu.memory_space<vmem>>) attributes {dimension_semantics = [#tpu.dimension_semantics<parallel>], iteration_bounds = array<i64: 1>, scalar_prefetch = 0 : i64, scratch_operands = 0 : i64, tpu.core_type = #tpu.core_type<tc>, window_params = [{pipeline_mode = #tpu.pipeline_mode<synchronous>, transform_indices = @transform_0, window_bounds = array<i64: 2, 32>}, {pipeline_mode = #tpu.pipeline_mode<synchronous>, transform_indices = @transform_1, window_bounds = array<i64: 1, 32>}, {pipeline_mode = #tpu.pipeline_mode<synchronous>, transform_indices = @transform_2, window_bounds = array<i64: 1, 32>}, {pipeline_mode = #tpu.pipeline_mode<synchronous>, transform_indices = @transform_3, window_bounds = array<i64: 32, 128>}, {pipeline_mode = #tpu.pipeline_mode<synchronous>, transform_indices = @transform_4, window_bounds = array<i64: 1, 128>}, {pipeline_mode = #tpu.pipeline_mode<synchronous>, transform_indices = @transform_5, window_bounds = array<i64: 2, 128>}, {pipeline_mode = #tpu.pipeline_mode<synchronous>, transform_indices = @transform_6, window_bounds = array<i64: 2, 32>}]} {
    %c0 = arith.constant 0 : index
    %c0_0 = arith.constant 0 : index
    %0 = vector.load %arg1[%c0, %c0_0] : memref<2x32xf32, #tpu.memory_space<vmem>>, vector<2x32xf32>
    %cst = arith.constant dense<0.000000e+00> : vector<2xf32>
    %1 = vector.multi_reduction <add>, %0, %cst [1] : vector<2x32xf32> to vector<2xf32>
    %2 = vector.shape_cast %1 : vector<2xf32> to vector<2x1xf32>
    %cst_1 = arith.constant 3.200000e+01 : f32
    %3 = vector.broadcast %cst_1 : f32 to vector<2x1xf32>
    %4 = arith.divf %2, %3 : vector<2x1xf32>
    %5 = vector.broadcast %4 : vector<2x1xf32> to vector<2x32xf32>
    %6 = arith.subf %0, %5 : vector<2x32xf32>
    %7 = arith.mulf %6, %6 : vector<2x32xf32>
    %cst_2 = arith.constant dense<0.000000e+00> : vector<2xf32>
    %8 = vector.multi_reduction <add>, %7, %cst_2 [1] : vector<2x32xf32> to vector<2xf32>
    %9 = vector.shape_cast %8 : vector<2xf32> to vector<2x1xf32>
    %cst_3 = arith.constant 3.200000e+01 : f32
    %10 = vector.broadcast %cst_3 : f32 to vector<2x1xf32>
    %11 = arith.divf %9, %10 : vector<2x1xf32>
    %12 = vector.broadcast %4 : vector<2x1xf32> to vector<2x32xf32>
    %13 = arith.subf %0, %12 : vector<2x32xf32>
    %cst_4 = arith.constant 9.99999997E-7 : f32
    %14 = vector.broadcast %cst_4 : f32 to vector<2x1xf32>
    %15 = arith.addf %11, %14 : vector<2x1xf32>
    %16 = math.rsqrt %15 : vector<2x1xf32>
    %17 = vector.broadcast %16 : vector<2x1xf32> to vector<2x32xf32>
    %18 = arith.mulf %13, %17 : vector<2x32xf32>
    %c0_5 = arith.constant 0 : index
    %c0_6 = arith.constant 0 : index
    %19 = vector.load %arg2[%c0_5, %c0_6] : memref<1x32xf32, #tpu.memory_space<vmem>>, vector<1x32xf32>
    %20 = vector.broadcast %19 : vector<1x32xf32> to vector<2x32xf32>
    %21 = arith.mulf %18, %20 : vector<2x32xf32>
    %c0_7 = arith.constant 0 : index
    %c0_8 = arith.constant 0 : index
    %22 = vector.load %arg3[%c0_7, %c0_8] : memref<1x32xf32, #tpu.memory_space<vmem>>, vector<1x32xf32>
    %23 = vector.broadcast %22 : vector<1x32xf32> to vector<2x32xf32>
    %24 = arith.addf %21, %23 : vector<2x32xf32>
    %c0_9 = arith.constant 0 : index
    %c0_10 = arith.constant 0 : index
    %25 = vector.load %arg7[%c0_9, %c0_10] : memref<2x32xf32, #tpu.memory_space<vmem>>, vector<2x32xf32>
    tpu.vector_store %arg7[%c0_9, %c0_10], %24 {strides = array<i32>} : memref<2x32xf32, #tpu.memory_space<vmem>>, vector<2x32xf32>,
    %26 = arith.truncf %24 : vector<2x32xf32> to vector<2x32xbf16>
    %c0_11 = arith.constant 0 : index
    %c0_12 = arith.constant 0 : index
    %27 = vector.load %arg4[%c0_11, %c0_12] : memref<32x128xbf16, #tpu.memory_space<vmem>>, vector<32x128xbf16>
    %cst_13 = arith.constant dense<0.000000e+00> : vector<2x128xf32>
    %28 = tpu.matmul %26, %27, %cst_13 {dimension_numbers = #tpu.dot_dimension_numbers<[1], [0], [0], [1], [0, 0, 1, 1], [], []>} : vector<2x32xbf16>, vector<32x128xbf16>, vector<2x128xf32> -> vector<2x128xf32>
    %c0_14 = arith.constant 0 : index
    %c0_15 = arith.constant 0 : index
    %29 = vector.load %arg5[%c0_14, %c0_15] : memref<1x128xf32, #tpu.memory_space<vmem>>, vector<1x128xf32>
    %30 = vector.broadcast %29 : vector<1x128xf32> to vector<2x128xf32>
    %31 = arith.addf %28, %30 : vector<2x128xf32>
    %c0_16 = arith.constant 0 : index
    %c0_17 = arith.constant 0 : index
    %32 = vector.load %arg6[%c0_16, %c0_17] : memref<2x128xf32, #tpu.memory_space<vmem>>, vector<2x128xf32>
    tpu.vector_store %arg6[%c0_16, %c0_17], %31 {strides = array<i32>} : memref<2x128xf32, #tpu.memory_space<vmem>>, vector<2x128xf32>,
    return
  }
  func.func @transform_0(%arg0: i32) -> (i32, i32) {
    %c0_i32 = arith.constant 0 : i32
    %c0_i32_0 = arith.constant 0 : i32
    %c0_i32_1 = arith.constant 0 : i32
    return %c0_i32, %c0_i32_0 : i32, i32
  }
  func.func @transform_1(%arg0: i32) -> (i32, i32) {
    %c0_i32 = arith.constant 0 : i32
    %c0_i32_0 = arith.constant 0 : i32
    %c0_i32_1 = arith.constant 0 : i32
    return %c0_i32, %c0_i32_0 : i32, i32
  }
  func.func @transform_2(%arg0: i32) -> (i32, i32) {
    %c0_i32 = arith.constant 0 : i32
    %c0_i32_0 = arith.constant 0 : i32
    %c0_i32_1 = arith.constant 0 : i32
    return %c0_i32, %c0_i32_0 : i32, i32
  }
  func.func @transform_3(%arg0: i32) -> (i32, i32) {
    %c0_i32 = arith.constant 0 : i32
    %c0_i32_0 = arith.constant 0 : i32
    %c0_i32_1 = arith.constant 0 : i32
    return %c0_i32, %c0_i32_0 : i32, i32
  }
  func.func @transform_4(%arg0: i32) -> (i32, i32) {
    %c0_i32 = arith.constant 0 : i32
    %c0_i32_0 = arith.constant 0 : i32
    %c0_i32_1 = arith.constant 0 : i32
    return %c0_i32, %c0_i32_0 : i32, i32
  }
  func.func @transform_5(%arg0: i32) -> (i32, i32) {
    %c0_i32 = arith.constant 0 : i32
    %c0_i32_0 = arith.constant 0 : i32
    %c0_i32_1 = arith.constant 0 : i32
    return %c0_i32, %c0_i32_0 : i32, i32
  }
  func.func @transform_6(%arg0: i32) -> (i32, i32) {
    %c0_i32 = arith.constant 0 : i32
    %c0_i32_0 = arith.constant 0 : i32
    %c0_i32_1 = arith.constant 0 : i32
    return %c0_i32, %c0_i32_0 : i32, i32
  }
}

module attributes {stable_mosaic.version = 11 : i64} {
  func.func @vit_blocks_kernel(%arg0: i32, %arg1: i32, %arg2: memref<1x5x32xf32, #tpu.memory_space<vmem>>, %arg3: memref<1x1x32xf32, #tpu.memory_space<vmem>>, %arg4: memref<1x1x32xf32, #tpu.memory_space<vmem>>, %arg5: memref<1x32x96xbf16, #tpu.memory_space<vmem>>, %arg6: memref<1x1x96xf32, #tpu.memory_space<vmem>>, %arg7: memref<1x32x32xbf16, #tpu.memory_space<vmem>>, %arg8: memref<1x1x32xf32, #tpu.memory_space<vmem>>, %arg9: memref<1x1x32xf32, #tpu.memory_space<vmem>>, %arg10: memref<1x1x32xf32, #tpu.memory_space<vmem>>, %arg11: memref<1x32x128xbf16, #tpu.memory_space<vmem>>, %arg12: memref<1x1x128xf32, #tpu.memory_space<vmem>>, %arg13: memref<1x128x32xbf16, #tpu.memory_space<vmem>>, %arg14: memref<1x1x32xf32, #tpu.memory_space<vmem>>, %arg15: memref<1x5x32xf32, #tpu.memory_space<vmem>>) attributes {dimension_semantics = [#tpu.dimension_semantics<parallel>, #tpu.dimension_semantics<arbitrary>], iteration_bounds = array<i64: 2, 1>, scalar_prefetch = 0 : i64, scratch_operands = 0 : i64, tpu.core_type = #tpu.core_type<tc>, window_params = [{transform_indices = @transform_0, window_bounds = array<i64: 1, 5, 32>}, {transform_indices = @transform_1, window_bounds = array<i64: 1, 1, 32>}, {transform_indices = @transform_2, window_bounds = array<i64: 1, 1, 32>}, {transform_indices = @transform_3, window_bounds = array<i64: 1, 32, 96>}, {transform_indices = @transform_4, window_bounds = array<i64: 1, 1, 96>}, {transform_indices = @transform_5, window_bounds = array<i64: 1, 32, 32>}, {transform_indices = @transform_6, window_bounds = array<i64: 1, 1, 32>}, {transform_indices = @transform_7, window_bounds = array<i64: 1, 1, 32>}, {transform_indices = @transform_8, window_bounds = array<i64: 1, 1, 32>}, {transform_indices = @transform_9, window_bounds = array<i64: 1, 32, 128>}, {transform_indices = @transform_10, window_bounds = array<i64: 1, 1, 128>}, {transform_indices = @transform_11, window_bounds = array<i64: 1, 128, 32>}, {transform_indices = @transform_12, window_bounds = array<i64: 1, 1, 32>}, {transform_indices = @transform_13, window_bounds = array<i64: 1, 5, 32>}]} {
    %c0_i32 = arith.constant 0 : i32
    %0 = arith.cmpi eq, %arg1, %c0_i32 : i32
    %1 = arith.extui %0 : i1 to i32
    %c0_i32_0 = arith.constant 0 : i32
    %2 = arith.cmpi ne, %1, %c0_i32_0 : i32
    scf.if %2 {
      %c0_63 = arith.constant 0 : index
      %c0_64 = arith.constant 0 : index
      %c0_65 = arith.constant 0 : index
      %162 = vector.load %arg2[%c0_63, %c0_64, %c0_65] : memref<1x5x32xf32, #tpu.memory_space<vmem>>, vector<1x5x32xf32>
      %163 = vector.shape_cast %162 : vector<1x5x32xf32> to vector<5x32xf32>
      %c0_66 = arith.constant 0 : index
      %c0_67 = arith.constant 0 : index
      %c0_68 = arith.constant 0 : index
      %164 = vector.load %arg15[%c0_66, %c0_67, %c0_68] : memref<1x5x32xf32, #tpu.memory_space<vmem>>, vector<1x5x32xf32>
      %165 = vector.shape_cast %164 : vector<1x5x32xf32> to vector<5x32xf32>
      %166 = vector.shape_cast %163 : vector<5x32xf32> to vector<1x5x32xf32>
      tpu.vector_store %arg15[%c0_66, %c0_67, %c0_68], %166 {strides = array<i32>} : memref<1x5x32xf32, #tpu.memory_space<vmem>>, vector<1x5x32xf32>,
    } else {
    }
    %c0 = arith.constant 0 : index
    %c0_1 = arith.constant 0 : index
    %c0_2 = arith.constant 0 : index
    %3 = vector.load %arg15[%c0, %c0_1, %c0_2] : memref<1x5x32xf32, #tpu.memory_space<vmem>>, vector<1x5x32xf32>
    %4 = vector.shape_cast %3 : vector<1x5x32xf32> to vector<5x32xf32>
    %cst = arith.constant dense<0.000000e+00> : vector<5xf32>
    %5 = vector.multi_reduction <add>, %4, %cst [1] : vector<5x32xf32> to vector<5xf32>
    %6 = vector.shape_cast %5 : vector<5xf32> to vector<5x1xf32>
    %cst_3 = arith.constant 3.200000e+01 : f32
    %7 = vector.broadcast %cst_3 : f32 to vector<5x1xf32>
    %8 = arith.divf %6, %7 : vector<5x1xf32>
    %9 = vector.broadcast %8 : vector<5x1xf32> to vector<5x32xf32>
    %10 = arith.subf %4, %9 : vector<5x32xf32>
    %11 = arith.mulf %10, %10 : vector<5x32xf32>
    %cst_4 = arith.constant dense<0.000000e+00> : vector<5xf32>
    %12 = vector.multi_reduction <add>, %11, %cst_4 [1] : vector<5x32xf32> to vector<5xf32>
    %13 = vector.shape_cast %12 : vector<5xf32> to vector<5x1xf32>
    %cst_5 = arith.constant 3.200000e+01 : f32
    %14 = vector.broadcast %cst_5 : f32 to vector<5x1xf32>
    %15 = arith.divf %13, %14 : vector<5x1xf32>
    %16 = vector.broadcast %8 : vector<5x1xf32> to vector<5x32xf32>
    %17 = arith.subf %4, %16 : vector<5x32xf32>
    %cst_6 = arith.constant 9.99999997E-7 : f32
    %18 = vector.broadcast %cst_6 : f32 to vector<5x1xf32>
    %19 = arith.addf %15, %18 : vector<5x1xf32>
    %20 = math.rsqrt %19 : vector<5x1xf32>
    %21 = vector.broadcast %20 : vector<5x1xf32> to vector<5x32xf32>
    %22 = arith.mulf %17, %21 : vector<5x32xf32>
    %c0_7 = arith.constant 0 : index
    %c0_8 = arith.constant 0 : index
    %c0_9 = arith.constant 0 : index
    %23 = vector.load %arg3[%c0_7, %c0_8, %c0_9] : memref<1x1x32xf32, #tpu.memory_space<vmem>>, vector<1x1x32xf32>
    %24 = vector.shape_cast %23 : vector<1x1x32xf32> to vector<1x32xf32>
    %25 = vector.broadcast %24 : vector<1x32xf32> to vector<5x32xf32>
    %26 = arith.mulf %22, %25 : vector<5x32xf32>
    %c0_10 = arith.constant 0 : index
    %c0_11 = arith.constant 0 : index
    %c0_12 = arith.constant 0 : index
    %27 = vector.load %arg4[%c0_10, %c0_11, %c0_12] : memref<1x1x32xf32, #tpu.memory_space<vmem>>, vector<1x1x32xf32>
    %28 = vector.shape_cast %27 : vector<1x1x32xf32> to vector<1x32xf32>
    %29 = vector.broadcast %28 : vector<1x32xf32> to vector<5x32xf32>
    %30 = arith.addf %26, %29 : vector<5x32xf32>
    %31 = arith.truncf %30 : vector<5x32xf32> to vector<5x32xbf16>
    %c0_13 = arith.constant 0 : index
    %c0_14 = arith.constant 0 : index
    %c0_15 = arith.constant 0 : index
    %32 = vector.load %arg5[%c0_13, %c0_14, %c0_15] : memref<1x32x96xbf16, #tpu.memory_space<vmem>>, vector<1x32x96xbf16>
    %33 = vector.shape_cast %32 : vector<1x32x96xbf16> to vector<32x96xbf16>
    %cst_16 = arith.constant dense<0.000000e+00> : vector<5x96xf32>
    %34 = tpu.matmul %31, %33, %cst_16 {dimension_numbers = #tpu.dot_dimension_numbers<[1], [0], [0], [1], [0, 0, 1, 1], [], []>} : vector<5x32xbf16>, vector<32x96xbf16>, vector<5x96xf32> -> vector<5x96xf32>
    %c0_17 = arith.constant 0 : index
    %c0_18 = arith.constant 0 : index
    %c0_19 = arith.constant 0 : index
    %35 = vector.load %arg6[%c0_17, %c0_18, %c0_19] : memref<1x1x96xf32, #tpu.memory_space<vmem>>, vector<1x1x96xf32>
    %36 = vector.shape_cast %35 : vector<1x1x96xf32> to vector<1x96xf32>
    %37 = vector.broadcast %36 : vector<1x96xf32> to vector<5x96xf32>
    %38 = arith.addf %34, %37 : vector<5x96xf32>
    %39 = vector.extract_strided_slice %38 {offsets = [0, 0], sizes = [5, 32], strides = [1, 1]} : vector<5x96xf32> to vector<5x32xf32>
    %40 = arith.truncf %39 : vector<5x32xf32> to vector<5x32xbf16>
    %41 = vector.extract_strided_slice %38 {offsets = [0, 32], sizes = [5, 32], strides = [1, 1]} : vector<5x96xf32> to vector<5x32xf32>
    %42 = arith.truncf %41 : vector<5x32xf32> to vector<5x32xbf16>
    %43 = vector.extract_strided_slice %38 {offsets = [0, 64], sizes = [5, 32], strides = [1, 1]} : vector<5x96xf32> to vector<5x32xf32>
    %44 = arith.truncf %43 : vector<5x32xf32> to vector<5x32xbf16>
    %45 = vector.extract_strided_slice %40 {offsets = [0, 0], sizes = [5, 8], strides = [1, 1]} : vector<5x32xbf16> to vector<5x8xbf16>
    %46 = vector.extract_strided_slice %40 {offsets = [0, 8], sizes = [5, 8], strides = [1, 1]} : vector<5x32xbf16> to vector<5x8xbf16>
    %47 = vector.extract_strided_slice %40 {offsets = [0, 16], sizes = [5, 8], strides = [1, 1]} : vector<5x32xbf16> to vector<5x8xbf16>
    %48 = vector.extract_strided_slice %40 {offsets = [0, 24], sizes = [5, 8], strides = [1, 1]} : vector<5x32xbf16> to vector<5x8xbf16>
    %49 = vector.shape_cast %45 : vector<5x8xbf16> to vector<1x5x8xbf16>
    %50 = vector.shape_cast %46 : vector<5x8xbf16> to vector<1x5x8xbf16>
    %51 = vector.shape_cast %47 : vector<5x8xbf16> to vector<1x5x8xbf16>
    %52 = vector.shape_cast %48 : vector<5x8xbf16> to vector<1x5x8xbf16>
    %53 = tpu.concatenate %49, %50, %51, %52 in 0 : vector<1x5x8xbf16>, vector<1x5x8xbf16>, vector<1x5x8xbf16>, vector<1x5x8xbf16> -> vector<4x5x8xbf16>
    %54 = vector.extract_strided_slice %42 {offsets = [0, 0], sizes = [5, 8], strides = [1, 1]} : vector<5x32xbf16> to vector<5x8xbf16>
    %55 = vector.extract_strided_slice %42 {offsets = [0, 8], sizes = [5, 8], strides = [1, 1]} : vector<5x32xbf16> to vector<5x8xbf16>
    %56 = vector.extract_strided_slice %42 {offsets = [0, 16], sizes = [5, 8], strides = [1, 1]} : vector<5x32xbf16> to vector<5x8xbf16>
    %57 = vector.extract_strided_slice %42 {offsets = [0, 24], sizes = [5, 8], strides = [1, 1]} : vector<5x32xbf16> to vector<5x8xbf16>
    %58 = vector.shape_cast %54 : vector<5x8xbf16> to vector<1x5x8xbf16>
    %59 = vector.shape_cast %55 : vector<5x8xbf16> to vector<1x5x8xbf16>
    %60 = vector.shape_cast %56 : vector<5x8xbf16> to vector<1x5x8xbf16>
    %61 = vector.shape_cast %57 : vector<5x8xbf16> to vector<1x5x8xbf16>
    %62 = tpu.concatenate %58, %59, %60, %61 in 0 : vector<1x5x8xbf16>, vector<1x5x8xbf16>, vector<1x5x8xbf16>, vector<1x5x8xbf16> -> vector<4x5x8xbf16>
    %63 = vector.extract_strided_slice %44 {offsets = [0, 0], sizes = [5, 8], strides = [1, 1]} : vector<5x32xbf16> to vector<5x8xbf16>
    %64 = vector.extract_strided_slice %44 {offsets = [0, 8], sizes = [5, 8], strides = [1, 1]} : vector<5x32xbf16> to vector<5x8xbf16>
    %65 = vector.extract_strided_slice %44 {offsets = [0, 16], sizes = [5, 8], strides = [1, 1]} : vector<5x32xbf16> to vector<5x8xbf16>
    %66 = vector.extract_strided_slice %44 {offsets = [0, 24], sizes = [5, 8], strides = [1, 1]} : vector<5x32xbf16> to vector<5x8xbf16>
    %67 = vector.shape_cast %63 : vector<5x8xbf16> to vector<1x5x8xbf16>
    %68 = vector.shape_cast %64 : vector<5x8xbf16> to vector<1x5x8xbf16>
    %69 = vector.shape_cast %65 : vector<5x8xbf16> to vector<1x5x8xbf16>
    %70 = vector.shape_cast %66 : vector<5x8xbf16> to vector<1x5x8xbf16>
    %71 = tpu.concatenate %67, %68, %69, %70 in 0 : vector<1x5x8xbf16>, vector<1x5x8xbf16>, vector<1x5x8xbf16>, vector<1x5x8xbf16> -> vector<4x5x8xbf16>
    "tpu.trace_start"() <{level = 10 : i32, message = "hqd,hkd->hqk"}> : () -> ()
    %cst_20 = arith.constant dense<0.000000e+00> : vector<4x5x5xf32>
    %72 = tpu.matmul %53, %62, %cst_20 {dimension_numbers = #tpu.dot_dimension_numbers<[2], [2], [1], [1], [0, 0, 0, 1, 1, 1], [0], [0]>} : vector<4x5x8xbf16>, vector<4x5x8xbf16>, vector<4x5x5xf32> -> vector<4x5x5xf32>
    "tpu.trace_stop"() : () -> ()
    %cst_21 = arith.constant dense<0xFF800000> : vector<4x5xf32>
    %73 = vector.multi_reduction <maximumf>, %72, %cst_21 [2] : vector<4x5x5xf32> to vector<4x5xf32>
    %74 = vector.shape_cast %73 : vector<4x5xf32> to vector<4x5x1xf32>
    %75 = vector.broadcast %74 : vector<4x5x1xf32> to vector<4x5x5xf32>
    %76 = arith.subf %72, %75 : vector<4x5x5xf32>
    %77 = math.exp %76 : vector<4x5x5xf32>
    %cst_22 = arith.constant dense<0.000000e+00> : vector<4x5xf32>
    %78 = vector.multi_reduction <add>, %77, %cst_22 [2] : vector<4x5x5xf32> to vector<4x5xf32>
    %79 = vector.shape_cast %78 : vector<4x5xf32> to vector<4x5x1xf32>
    %80 = tpu.reciprocal %79 {approx = true} : vector<4x5x1xf32> -> vector<4x5x1xf32>
    %81 = vector.broadcast %80 : vector<4x5x1xf32> to vector<4x5x5xf32>
    %82 = arith.mulf %77, %81 : vector<4x5x5xf32>
    %83 = arith.truncf %82 : vector<4x5x5xf32> to vector<4x5x5xbf16>
    "tpu.trace_start"() <{level = 10 : i32, message = "hqk,hkd->hqd"}> : () -> ()
    %cst_23 = arith.constant dense<0.000000e+00> : vector<4x5x8xf32>
    %84 = tpu.matmul %83, %71, %cst_23 {dimension_numbers = #tpu.dot_dimension_numbers<[2], [1], [1], [2], [0, 0, 0, 1, 1, 2], [0], [0]>} : vector<4x5x5xbf16>, vector<4x5x8xbf16>, vector<4x5x8xf32> -> vector<4x5x8xf32>
    "tpu.trace_stop"() : () -> ()
    %85 = arith.truncf %84 : vector<4x5x8xf32> to vector<4x5x8xbf16>
    %86 = vector.extract_strided_slice %85 {offsets = [0, 0, 0], sizes = [1, 5, 8], strides = [1, 1, 1]} : vector<4x5x8xbf16> to vector<1x5x8xbf16>
    %87 = vector.shape_cast %86 : vector<1x5x8xbf16> to vector<5x8xbf16>
    %88 = vector.extract_strided_slice %85 {offsets = [1, 0, 0], sizes = [1, 5, 8], strides = [1, 1, 1]} : vector<4x5x8xbf16> to vector<1x5x8xbf16>
    %89 = vector.shape_cast %88 : vector<1x5x8xbf16> to vector<5x8xbf16>
    %90 = vector.extract_strided_slice %85 {offsets = [2, 0, 0], sizes = [1, 5, 8], strides = [1, 1, 1]} : vector<4x5x8xbf16> to vector<1x5x8xbf16>
    %91 = vector.shape_cast %90 : vector<1x5x8xbf16> to vector<5x8xbf16>
    %92 = vector.extract_strided_slice %85 {offsets = [3, 0, 0], sizes = [1, 5, 8], strides = [1, 1, 1]} : vector<4x5x8xbf16> to vector<1x5x8xbf16>
    %93 = vector.shape_cast %92 : vector<1x5x8xbf16> to vector<5x8xbf16>
    %94 = tpu.concatenate %87, %89, %91, %93 in 1 : vector<5x8xbf16>, vector<5x8xbf16>, vector<5x8xbf16>, vector<5x8xbf16> -> vector<5x32xbf16>
    %c0_24 = arith.constant 0 : index
    %c0_25 = arith.constant 0 : index
    %c0_26 = arith.constant 0 : index
    %95 = vector.load %arg7[%c0_24, %c0_25, %c0_26] : memref<1x32x32xbf16, #tpu.memory_space<vmem>>, vector<1x32x32xbf16>
    %96 = vector.shape_cast %95 : vector<1x32x32xbf16> to vector<32x32xbf16>
    %cst_27 = arith.constant dense<0.000000e+00> : vector<5x32xf32>
    %97 = tpu.matmul %94, %96, %cst_27 {dimension_numbers = #tpu.dot_dimension_numbers<[1], [0], [0], [1], [0, 0, 1, 1], [], []>} : vector<5x32xbf16>, vector<32x32xbf16>, vector<5x32xf32> -> vector<5x32xf32>
    %c0_28 = arith.constant 0 : index
    %c0_29 = arith.constant 0 : index
    %c0_30 = arith.constant 0 : index
    %98 = vector.load %arg8[%c0_28, %c0_29, %c0_30] : memref<1x1x32xf32, #tpu.memory_space<vmem>>, vector<1x1x32xf32>
    %99 = vector.shape_cast %98 : vector<1x1x32xf32> to vector<1x32xf32>
    %100 = vector.broadcast %99 : vector<1x32xf32> to vector<5x32xf32>
    %101 = arith.addf %97, %100 : vector<5x32xf32>
    %102 = arith.addf %4, %101 : vector<5x32xf32>
    %cst_31 = arith.constant dense<0.000000e+00> : vector<5xf32>
    %103 = vector.multi_reduction <add>, %102, %cst_31 [1] : vector<5x32xf32> to vector<5xf32>
    %104 = vector.shape_cast %103 : vector<5xf32> to vector<5x1xf32>
    %cst_32 = arith.constant 3.200000e+01 : f32
    %105 = vector.broadcast %cst_32 : f32 to vector<5x1xf32>
    %106 = arith.divf %104, %105 : vector<5x1xf32>
    %107 = vector.broadcast %106 : vector<5x1xf32> to vector<5x32xf32>
    %108 = arith.subf %102, %107 : vector<5x32xf32>
    %109 = arith.mulf %108, %108 : vector<5x32xf32>
    %cst_33 = arith.constant dense<0.000000e+00> : vector<5xf32>
    %110 = vector.multi_reduction <add>, %109, %cst_33 [1] : vector<5x32xf32> to vector<5xf32>
    %111 = vector.shape_cast %110 : vector<5xf32> to vector<5x1xf32>
    %cst_34 = arith.constant 3.200000e+01 : f32
    %112 = vector.broadcast %cst_34 : f32 to vector<5x1xf32>
    %113 = arith.divf %111, %112 : vector<5x1xf32>
    %114 = vector.broadcast %106 : vector<5x1xf32> to vector<5x32xf32>
    %115 = arith.subf %102, %114 : vector<5x32xf32>
    %cst_35 = arith.constant 9.99999997E-7 : f32
    %116 = vector.broadcast %cst_35 : f32 to vector<5x1xf32>
    %117 = arith.addf %113, %116 : vector<5x1xf32>
    %118 = math.rsqrt %117 : vector<5x1xf32>
    %119 = vector.broadcast %118 : vector<5x1xf32> to vector<5x32xf32>
    %120 = arith.mulf %115, %119 : vector<5x32xf32>
    %c0_36 = arith.constant 0 : index
    %c0_37 = arith.constant 0 : index
    %c0_38 = arith.constant 0 : index
    %121 = vector.load %arg9[%c0_36, %c0_37, %c0_38] : memref<1x1x32xf32, #tpu.memory_space<vmem>>, vector<1x1x32xf32>
    %122 = vector.shape_cast %121 : vector<1x1x32xf32> to vector<1x32xf32>
    %123 = vector.broadcast %122 : vector<1x32xf32> to vector<5x32xf32>
    %124 = arith.mulf %120, %123 : vector<5x32xf32>
    %c0_39 = arith.constant 0 : index
    %c0_40 = arith.constant 0 : index
    %c0_41 = arith.constant 0 : index
    %125 = vector.load %arg10[%c0_39, %c0_40, %c0_41] : memref<1x1x32xf32, #tpu.memory_space<vmem>>, vector<1x1x32xf32>
    %126 = vector.shape_cast %125 : vector<1x1x32xf32> to vector<1x32xf32>
    %127 = vector.broadcast %126 : vector<1x32xf32> to vector<5x32xf32>
    %128 = arith.addf %124, %127 : vector<5x32xf32>
    %129 = arith.truncf %128 : vector<5x32xf32> to vector<5x32xbf16>
    %c0_42 = arith.constant 0 : index
    %c0_43 = arith.constant 0 : index
    %c0_44 = arith.constant 0 : index
    %130 = vector.load %arg11[%c0_42, %c0_43, %c0_44] : memref<1x32x128xbf16, #tpu.memory_space<vmem>>, vector<1x32x128xbf16>
    %131 = vector.shape_cast %130 : vector<1x32x128xbf16> to vector<32x128xbf16>
    %cst_45 = arith.constant dense<0.000000e+00> : vector<5x128xf32>
    %132 = tpu.matmul %129, %131, %cst_45 {dimension_numbers = #tpu.dot_dimension_numbers<[1], [0], [0], [1], [0, 0, 1, 1], [], []>} : vector<5x32xbf16>, vector<32x128xbf16>, vector<5x128xf32> -> vector<5x128xf32>
    %c0_46 = arith.constant 0 : index
    %c0_47 = arith.constant 0 : index
    %c0_48 = arith.constant 0 : index
    %133 = vector.load %arg12[%c0_46, %c0_47, %c0_48] : memref<1x1x128xf32, #tpu.memory_space<vmem>>, vector<1x1x128xf32>
    %134 = vector.shape_cast %133 : vector<1x1x128xf32> to vector<1x128xf32>
    %135 = vector.broadcast %134 : vector<1x128xf32> to vector<5x128xf32>
    %136 = arith.addf %132, %135 : vector<5x128xf32>
    %137 = arith.mulf %136, %136 : vector<5x128xf32>
    %138 = arith.mulf %136, %137 : vector<5x128xf32>
    %cst_49 = arith.constant 4.471500e-02 : f32
    %139 = vector.broadcast %cst_49 : f32 to vector<5x128xf32>
    %140 = arith.mulf %139, %138 : vector<5x128xf32>
    %141 = arith.addf %136, %140 : vector<5x128xf32>
    %cst_50 = arith.constant 0.797884583 : f32
    %142 = vector.broadcast %cst_50 : f32 to vector<5x128xf32>
    %143 = arith.mulf %142, %141 : vector<5x128xf32>
    %144 = math.tanh %143 : vector<5x128xf32>
    %cst_51 = arith.constant 1.000000e+00 : f32
    %145 = vector.broadcast %cst_51 : f32 to vector<5x128xf32>
    %146 = arith.addf %145, %144 : vector<5x128xf32>
    %cst_52 = arith.constant 5.000000e-01 : f32
    %147 = vector.broadcast %cst_52 : f32 to vector<5x128xf32>
    %148 = arith.mulf %147, %146 : vector<5x128xf32>
    %149 = arith.mulf %136, %148 : vector<5x128xf32>
    %150 = arith.truncf %149 : vector<5x128xf32> to vector<5x128xbf16>
    %c0_53 = arith.constant 0 : index
    %c0_54 = arith.constant 0 : index
    %c0_55 = arith.constant 0 : index
    %151 = vector.load %arg13[%c0_53, %c0_54, %c0_55] : memref<1x128x32xbf16, #tpu.memory_space<vmem>>, vector<1x128x32xbf16>
    %152 = vector.shape_cast %151 : vector<1x128x32xbf16> to vector<128x32xbf16>
    %cst_56 = arith.constant dense<0.000000e+00> : vector<5x32xf32>
    %153 = tpu.matmul %150, %152, %cst_56 {dimension_numbers = #tpu.dot_dimension_numbers<[1], [0], [0], [1], [0, 0, 1, 1], [], []>} : vector<5x128xbf16>, vector<128x32xbf16>, vector<5x32xf32> -> vector<5x32xf32>
    %c0_57 = arith.constant 0 : index
    %c0_58 = arith.constant 0 : index
    %c0_59 = arith.constant 0 : index
    %154 = vector.load %arg14[%c0_57, %c0_58, %c0_59] : memref<1x1x32xf32, #tpu.memory_space<vmem>>, vector<1x1x32xf32>
    %155 = vector.shape_cast %154 : vector<1x1x32xf32> to vector<1x32xf32>
    %156 = vector.broadcast %155 : vector<1x32xf32> to vector<5x32xf32>
    %157 = arith.addf %153, %156 : vector<5x32xf32>
    %158 = arith.addf %102, %157 : vector<5x32xf32>
    %c0_60 = arith.constant 0 : index
    %c0_61 = arith.constant 0 : index
    %c0_62 = arith.constant 0 : index
    %159 = vector.load %arg15[%c0_60, %c0_61, %c0_62] : memref<1x5x32xf32, #tpu.memory_space<vmem>>, vector<1x5x32xf32>
    %160 = vector.shape_cast %159 : vector<1x5x32xf32> to vector<5x32xf32>
    %161 = vector.shape_cast %158 : vector<5x32xf32> to vector<1x5x32xf32>
    tpu.vector_store %arg15[%c0_60, %c0_61, %c0_62], %161 {strides = array<i32>} : memref<1x5x32xf32, #tpu.memory_space<vmem>>, vector<1x5x32xf32>,
    return
  }
  func.func @transform_0(%arg0: i32, %arg1: i32) -> (i32, i32, i32) {
    %c0_i32 = arith.constant 0 : i32
    %c0_i32_0 = arith.constant 0 : i32
    %c0_i32_1 = arith.constant 0 : i32
    return %arg0, %c0_i32, %c0_i32_0 : i32, i32, i32
  }
  func.func @transform_1(%arg0: i32, %arg1: i32) -> (i32, i32, i32) {
    %c0_i32 = arith.constant 0 : i32
    %c0_i32_0 = arith.constant 0 : i32
    %c0_i32_1 = arith.constant 0 : i32
    return %arg1, %c0_i32, %c0_i32_0 : i32, i32, i32
  }
  func.func @transform_2(%arg0: i32, %arg1: i32) -> (i32, i32, i32) {
    %c0_i32 = arith.constant 0 : i32
    %c0_i32_0 = arith.constant 0 : i32
    %c0_i32_1 = arith.constant 0 : i32
    return %arg1, %c0_i32, %c0_i32_0 : i32, i32, i32
  }
  func.func @transform_3(%arg0: i32, %arg1: i32) -> (i32, i32, i32) {
    %c0_i32 = arith.constant 0 : i32
    %c0_i32_0 = arith.constant 0 : i32
    %c0_i32_1 = arith.constant 0 : i32
    return %arg1, %c0_i32, %c0_i32_0 : i32, i32, i32
  }
  func.func @transform_4(%arg0: i32, %arg1: i32) -> (i32, i32, i32) {
    %c0_i32 = arith.constant 0 : i32
    %c0_i32_0 = arith.constant 0 : i32
    %c0_i32_1 = arith.constant 0 : i32
    return %arg1, %c0_i32, %c0_i32_0 : i32, i32, i32
  }
  func.func @transform_5(%arg0: i32, %arg1: i32) -> (i32, i32, i32) {
    %c0_i32 = arith.constant 0 : i32
    %c0_i32_0 = arith.constant 0 : i32
    %c0_i32_1 = arith.constant 0 : i32
    return %arg1, %c0_i32, %c0_i32_0 : i32, i32, i32
  }
  func.func @transform_6(%arg0: i32, %arg1: i32) -> (i32, i32, i32) {
    %c0_i32 = arith.constant 0 : i32
    %c0_i32_0 = arith.constant 0 : i32
    %c0_i32_1 = arith.constant 0 : i32
    return %arg1, %c0_i32, %c0_i32_0 : i32, i32, i32
  }
  func.func @transform_7(%arg0: i32, %arg1: i32) -> (i32, i32, i32) {
    %c0_i32 = arith.constant 0 : i32
    %c0_i32_0 = arith.constant 0 : i32
    %c0_i32_1 = arith.constant 0 : i32
    return %arg1, %c0_i32, %c0_i32_0 : i32, i32, i32
  }
  func.func @transform_8(%arg0: i32, %arg1: i32) -> (i32, i32, i32) {
    %c0_i32 = arith.constant 0 : i32
    %c0_i32_0 = arith.constant 0 : i32
    %c0_i32_1 = arith.constant 0 : i32
    return %arg1, %c0_i32, %c0_i32_0 : i32, i32, i32
  }
  func.func @transform_9(%arg0: i32, %arg1: i32) -> (i32, i32, i32) {
    %c0_i32 = arith.constant 0 : i32
    %c0_i32_0 = arith.constant 0 : i32
    %c0_i32_1 = arith.constant 0 : i32
    return %arg1, %c0_i32, %c0_i32_0 : i32, i32, i32
  }
  func.func @transform_10(%arg0: i32, %arg1: i32) -> (i32, i32, i32) {
    %c0_i32 = arith.constant 0 : i32
    %c0_i32_0 = arith.constant 0 : i32
    %c0_i32_1 = arith.constant 0 : i32
    return %arg1, %c0_i32, %c0_i32_0 : i32, i32, i32
  }
  func.func @transform_11(%arg0: i32, %arg1: i32) -> (i32, i32, i32) {
    %c0_i32 = arith.constant 0 : i32
    %c0_i32_0 = arith.constant 0 : i32
    %c0_i32_1 = arith.constant 0 : i32
    return %arg1, %c0_i32, %c0_i32_0 : i32, i32, i32
  }
  func.func @transform_12(%arg0: i32, %arg1: i32) -> (i32, i32, i32) {
    %c0_i32 = arith.constant 0 : i32
    %c0_i32_0 = arith.constant 0 : i32
    %c0_i32_1 = arith.constant 0 : i32
    return %arg1, %c0_i32, %c0_i32_0 : i32, i32, i32
  }
  func.func @transform_13(%arg0: i32, %arg1: i32) -> (i32, i32, i32) {
    %c0_i32 = arith.constant 0 : i32
    %c0_i32_0 = arith.constant 0 : i32
    %c0_i32_1 = arith.constant 0 : i32
    return %arg0, %c0_i32, %c0_i32_0 : i32, i32, i32
  }
}

</mosaic_0001>

<bundles_post_ra>
// kernel: vit_ensemble_forward.9
= control target key start
LH: loop header
LB: loop body
LE: loop exit
PB: predicated region body
PF: predicated region fallthrough
CT: control target
= control target key end

     0   :  { %8 = vsyncpa [#allocation3], 0  ;;  %s424_s0 = inlined_call_operand.hbm [shape: f32[8,192], index: 0, kind: input, shape index: {}]   ;;  %s425_s1 = inlined_call_operand.hbm [shape: bf16[192,32], index: 1, kind: input, shape index: {}]   ;;  %s426_s2 = inlined_call_operand.hbm [shape: f32[1,32], index: 2, kind: input, shape index: {}]   ;;  %s427_s3 = inlined_call_operand.hbm [shape: f32[8,32], index: 3, kind: output, shape index: {}]  }
   0x1   :  { %9 = vsyncpa [#allocation6], 0 }
   0x2   :  { %10 = vsyncpa [#allocation4], 0  ;;  %s349_s12 = smov [#allocation5]   ;;  %s255_s16 = scalar_lea.hbm %s425_s1, 1536 }
   0x3   :  { %s26_s13 = sshll.u32 %s349_s12, 4  ;;  %p256_p0 = scmp.ne.s32.totalorder %s425_s1, %s255_s16  ;;  %s27_s13 = int_to_ptr.vmem [resolvable:$true] %s26_s13 }
   0x4   :  { %p259_p1 = scmp.lt.u32.totalorder %s255_s16, %s425_s1 }
   0x6   :  { %p261_p2 = pnand %p259_p1, %p256_p0 }
   0x8   :  { %264 = shalt.err (!%p261_p2)
}
   0x9   :  { %s265_s21 = scalar_lea.vmem %s27_s13, 1536  ;;  %p270_p4 = scmp.lt.s32.totalorder %s27_s13, %s27_s13 }
   0xa   :  { %p266_p3 = scmp.ne.s32.totalorder %s27_s13, %s265_s21  ;;  %p271_p5 = scmp.lt.s32.totalorder %s265_s21, %s265_s21 }
   0xc   :  { %p272_p6 = por %p271_p5, %p270_p4 }
   0xe   :  { %p273_p7 = pnand %p272_p6, %p266_p3 }
  0x10   :  { %276 = shalt.err (!%p273_p7)
}
  0x11   :  { %s350_s22 = smov 64   ;;  %s351_s23 = smov 4  }
  0x12   :  { %32 = dma.hbm_to_vmem [thread:$0]  %s425_s1, 1536, %s27_s13, [#allocation6], %s350_s22, %s350_s22, %s351_s23  }
  0x13   :  { %s352_s26 = smov [#allocation2]   ;;  %s353_s28 = smov [#allocation7]  }
  0x14   :  { %s17_s27 = sshll.u32 %s352_s26, 4  ;;  %s39_s29 = sshll.u32 %s353_s28, 4  ;;  %s18_s27 = int_to_ptr.vmem [resolvable:$true] %s17_s27  ;;  %s40_s29 = int_to_ptr.vmem [resolvable:$true] %s39_s29 }
  0x15   :  { %s277_s5 = scalar_lea.hbm %s424_s0, 256 }
  0x16   :  { %p278_p8 = scmp.ne.s32.totalorder %s424_s0, %s277_s5  ;;  %p281_p9 = scmp.lt.u32.totalorder %s277_s5, %s424_s0 }
  0x18   :  { %p283_p10 = pnand %p281_p9, %p278_p8 }
  0x1a   :  { %286 = shalt.err (!%p283_p10)
}
  0x1b   :  { %s287_s1 = scalar_lea.vmem %s18_s27, 256  ;;  %p292_p12 = scmp.lt.s32.totalorder %s18_s27, %s18_s27 }
  0x1c   :  { %p288_p11 = scmp.ne.s32.totalorder %s18_s27, %s287_s1  ;;  %p293_p13 = scmp.lt.s32.totalorder %s287_s1, %s287_s1 }
  0x1e   :  { %p294_p0 = por %p293_p13, %p292_p12 }
  0x20   :  { %p295_p1 = pnand %p294_p0, %p288_p11 }
  0x22   :  { %298 = shalt.err (!%p295_p1)
}
  0x23   :  { %20 = dma.hbm_to_vmem [thread:$0]  %s424_s0, 256, %s18_s27, [#allocation3]  }
  0x24   :  { %s299_s14 = scalar_lea.hbm %s426_s2, 16 }
  0x25   :  { %p300_p2 = scmp.ne.s32.totalorder %s426_s2, %s299_s14  ;;  %p303_p3 = scmp.lt.u32.totalorder %s299_s14, %s426_s2 }
  0x27   :  { %p305_p4 = pnand %p303_p3, %p300_p2 }
  0x29   :  { %308 = shalt.err (!%p305_p4)
}
  0x2a   :  { %s309_s19 = scalar_lea.vmem %s40_s29, 16  ;;  %s313_s20 = scalar_lea.vmem %s40_s29, 32 }
  0x2b   :  { %p310_p5 = scmp.ne.s32.totalorder %s40_s29, %s309_s19  ;;  %p314_p6 = scmp.lt.s32.totalorder %s40_s29, %s40_s29 }
  0x2c   :  { %p315_p7 = scmp.lt.s32.totalorder %s313_s20, %s309_s19 }
  0x2e   :  { %p316_p8 = por %p315_p7, %p314_p6 }
  0x30   :  { %p317_p9 = pnand %p316_p8, %p310_p5 }
  0x32   :  { %320 = shalt.err (!%p317_p9)
}
  0x33   :  { %42 = dma.hbm_to_vmem [thread:$0]  %s426_s2, 16, %s40_s29, [#allocation6]  }
  0x34   :  { %343 = dma.done.wait [#allocation3], 256  }
  0x35   :  { %344 = vsyncadd [#allocation3], 4294967040 }
  0x36   :  { %345 = dma.done.wait [#allocation6], 1552  }
  0x37   :  { %346 = vsyncadd [#allocation6], 4294965744  ;;  %v354_v0 = vmov 0   ;;  %v243_v1 = vld [vmem:[#allocation5] sm:$0xff]   ;;  %v244_v2 = vld [vmem:[#allocation5 + $0x8] sm:$0xff]   ;;  %vm160_vm0 = vcmask 523264  }
  0x38   :  { %164 = vmatprep.subr.bf16.mxu0 %v354_v0  ;;  %v245_v3 = vld [vmem:[#allocation5 + $0x10] sm:$0xff]   ;;  %v246_v4 = vld [vmem:[#allocation5 + $0x18] sm:$0xff]   ;;  %v247_v7 = vld [vmem:[#allocation5 + $0x20] sm:$0xff]   ;;  %s355_s2 = smov [#allocation8]   ;;  %vm204_vm1 = vcmask 261120  }
  0x39   :  { %165 = vmatpush1.bf16.msra.mxu0 %v243_v1  ;;  %v54_v5 = vld [vmem:[#allocation2 + $0x8] sm:$0xff]  ;;  %v248_v8 = vld [vmem:[#allocation5 + $0x28] sm:$0xff]   ;;  %v249_v9 = vld [vmem:[#allocation5 + $0x30] sm:$0xff]   ;;  %s212_s22 = sshll.u32 %s355_s2, 4  ;;  %s213_s22 = int_to_ptr.vmem [resolvable:$true] %s212_s22 }
  0x3a   :  { %166 = vmatprep.subr.bf16.mxu0 %v354_v0  ;;  %v56_v6 = vpack.c.bf16 %v54_v5, %v54_v5  ;;  %v250_v10 = vld [vmem:[#allocation5 + $0x38] sm:$0xff]   ;;  %v251_v11 = vld [vmem:[#allocation5 + $0x40] sm:$0xff]   ;;  %v252_v12 = vld [vmem:[#allocation5 + $0x48] sm:$0xff]   ;;  %s321_s23 = scalar_lea.vmem %s213_s22, 128  ;;  %p326_p11 = scmp.lt.s32.totalorder %s213_s22, %s213_s22 }
  0x3b   :  { %v253_v13 = vld [vmem:[#allocation5 + $0x50] sm:$0xff]   ;;  %v254_v14 = vld [vmem:[#allocation5 + $0x58] sm:$0xff]   ;;  %v222_v17 = vld [vmem:[#allocation7] ss:$0 sm:$0xff]  ;;  %p322_p10 = scmp.ne.s32.totalorder %s213_s22, %s321_s23  ;;  %p327_p12 = scmp.lt.s32.totalorder %s321_s23, %s321_s23 }
  0x3c   :  { %235 = vmatprep.mubr.msk.bf16.mxu0 %vm160_vm0, %v56_v6  ;;  %v53_v15 = vld [vmem:[#allocation2] sm:$0xff] }
  0x3d   :  { %167 = vmatpush1.bf16.msra.mxu0 %v244_v2  ;;  %v55_v16 = vpack.c.bf16 %v53_v15, %v53_v15  ;;  %p328_p13 = por %p327_p12, %p326_p11 }
  0x3e   :  { %168 = vmatprep.subr.bf16.mxu0 %v354_v0 }
  0x3f   :  { %p329_p0 = pnand %p328_p13, %p322_p10 }
  0x41   :  { %169 = vmatpush1.bf16.msra.mxu0 %v245_v3 }
  0x42   :  { %170 = vmatprep.subr.bf16.mxu0 %v354_v0 }
  0x45   :  { %171 = vmatpush1.bf16.msra.mxu0 %v246_v4 }
  0x46   :  { %172 = vmatprep.subr.bf16.mxu0 %v354_v0 }
  0x49   :  { %173 = vmatpush1.bf16.msra.mxu0 %v247_v7 }
  0x4a   :  { %174 = vmatprep.subr.bf16.mxu0 %v354_v0 }
  0x4d   :  { %175 = vmatpush1.bf16.msra.mxu0 %v248_v8 }
  0x4e   :  { %176 = vmatprep.subr.bf16.mxu0 %v354_v0 }
  0x51   :  { %177 = vmatpush1.bf16.msra.mxu0 %v249_v9 }
  0x52   :  { %178 = vmatprep.subr.bf16.mxu0 %v354_v0 }
  0x55   :  { %179 = vmatpush1.bf16.msra.mxu0 %v250_v10 }
  0x56   :  { %180 = vmatprep.subr.bf16.mxu0 %v354_v0 }
  0x59   :  { %181 = vmatpush1.bf16.msra.mxu0 %v251_v11 }
  0x5a   :  { %182 = vmatprep.subr.bf16.mxu0 %v354_v0 }
  0x5d   :  { %183 = vmatpush1.bf16.msra.mxu0 %v252_v12 }
  0x5e   :  { %184 = vmatprep.subr.bf16.mxu0 %v354_v0 }
  0x61   :  { %185 = vmatpush1.bf16.msra.mxu0 %v253_v13 }
  0x62   :  { %186 = vmatprep.subr.bf16.mxu0 %v354_v0 }
  0x65   :  { %187 = vmatpush1.bf16.msra.mxu0 %v254_v14 }
  0x68   :  { %197 = vmatmul.mubr.bf16.vlgmr.msra.gmra.mrb[0].mxu0 %v55_v16 }
 0x13b   :  { %v198_v18 = vpop.f32.mrb[0].mxu0 }
 0x13c   :  { %v199_v19 = vadd.f32 %v222_v17, %v198_v18  ;;  %v200_v20 = vpop.f32.mrb[1].mxu0 }
 0x13d   :  { %v201_v21 = vpop.f32.mrb[2].mxu0 }
 0x13e   :  { %v202_v22 = vpop.f32.mrb[3].mxu0  ;;  %205 = vst.msk [vmem:[#allocation8] sm:$0xff] %vm204_vm1, %v199_v19 }
 0x13f   :  { %332 = shalt.err (!%p329_p0)
}
 0x140   :  { %s333_s26 = scalar_lea.hbm %s427_s3, 128 }
 0x141   :  { %p334_p1 = scmp.ne.s32.totalorder %s427_s3, %s333_s26  ;;  %p337_p2 = scmp.lt.u32.totalorder %s333_s26, %s427_s3 }
 0x143   :  { %p339_p3 = pnand %p337_p2, %p334_p1 }
 0x145   :  { %342 = shalt.err (!%p339_p3)
}
 0x146   :  { %215 = dma.vmem_to_hbm [thread:$0]  %s213_s22, 128, %s427_s3, [#allocation4]  }
 0x147   :  { %347 = dma.done.wait [#allocation4], 128  }
 0x148   :  { %348 = vsyncadd [#allocation4], 4294967168 }
 0x149   :  { %219 = vsyncpa [#allocation3], 1 }
 0x14a   :  { %220 = vsyncpa [#allocation6], 1 }
 0x14b   :  { %221 = vsyncpa [#allocation4], 1 }

// kernel: vit_ensemble_forward.14
= control target key start
LH: loop header
LB: loop body
LE: loop exit
PB: predicated region body
PF: predicated region fallthrough
CT: control target
= control target key end

     0   :  { %12 = vsyncpa [#allocation3], 0  ;;  %s554_s0 = inlined_call_operand.hbm [shape: f32[2,32], index: 0, kind: input, shape index: {}]   ;;  %s555_s1 = inlined_call_operand.hbm [shape: f32[1,32], index: 1, kind: input, shape index: {}]   ;;  %s556_s2 = inlined_call_operand.hbm [shape: f32[1,32], index: 2, kind: input, shape index: {}]   ;;  %s557_s3 = inlined_call_operand.hbm [shape: bf16[32,128], index: 3, kind: input, shape index: {}]   ;;  %s558_s4 = inlined_call_operand.hbm [shape: f32[1,128], index: 4, kind: input, shape index: {}]   ;;  %s559_s5 = inlined_call_operand.hbm [shape: f32[2,128], index: 5, kind: output, shape index: {0}]   ;;  %s560_s6 = inlined_call_operand.hbm [shape: f32[2,32], index: 6, kind: output, shape index: {1}]  }
   0x1   :  { %13 = vsyncpa [#allocation6], 0 }
   0x2   :  { %14 = vsyncpa [#allocation9], 0 }
   0x3   :  { %15 = vsyncpa [#allocation4], 0 }
   0x4   :  { %16 = vsyncpa [#allocation13], 0  ;;  %s414_s21 = smov [#allocation5]   ;;  %s415_s23 = smov [#allocation8]  }
   0x5   :  { %s33_s22 = sshll.u32 %s414_s21, 4  ;;  %s52_s24 = sshll.u32 %s415_s23, 4  ;;  %s34_s22 = int_to_ptr.vmem [resolvable:$true] %s33_s22  ;;  %s460_s24 = int_to_ptr.vmem [resolvable:$true] %s52_s24 }
   0x6   :  { %s250_s27 = scalar_lea.hbm %s555_s1, 16 }
   0x7   :  { %p251_p0 = scmp.ne.s32.totalorder %s555_s1, %s250_s27  ;;  %p254_p1 = scmp.lt.u32.totalorder %s250_s27, %s555_s1 }
   0x9   :  { %p256_p2 = pnand %p254_p1, %p251_p0 }
   0xb   :  { %259 = shalt.err (!%p256_p2)
}
   0xc   :  { %s260_s8 = scalar_lea.vmem %s34_s22, 16  ;;  %s264_s9 = scalar_lea.vmem %s34_s22, 32 }
   0xd   :  { %p261_p3 = scmp.ne.s32.totalorder %s34_s22, %s260_s8  ;;  %p265_p4 = scmp.lt.s32.totalorder %s34_s22, %s34_s22 }
   0xe   :  { %p266_p5 = scmp.lt.s32.totalorder %s264_s9, %s260_s8 }
  0x10   :  { %p267_p6 = por %p266_p5, %p265_p4 }
  0x12   :  { %p268_p7 = pnand %p267_p6, %p261_p3 }
  0x14   :  { %271 = shalt.err (!%p268_p7)
}
  0x15   :  { %36 = dma.hbm_to_vmem [thread:$0]  %s555_s1, 16, %s34_s22, [#allocation6]  }
  0x16   :  { %s272_s14 = scalar_lea.hbm %s557_s3, 256 }
  0x17   :  { %p273_p8 = scmp.ne.s32.totalorder %s557_s3, %s272_s14  ;;  %p276_p9 = scmp.lt.u32.totalorder %s272_s14, %s557_s3 }
  0x19   :  { %p278_p10 = pnand %p276_p9, %p273_p8 }
  0x1b   :  { %281 = shalt.err (!%p278_p10)
}
  0x1c   :  { %s282_s19 = scalar_lea.vmem %s460_s24, 256  ;;  %p287_p12 = scmp.lt.s32.totalorder %s460_s24, %s460_s24 }
  0x1d   :  { %p283_p11 = scmp.ne.s32.totalorder %s460_s24, %s282_s19  ;;  %p288_p13 = scmp.lt.s32.totalorder %s282_s19, %s282_s19 }
  0x1f   :  { %p289_p0 = por %p288_p13, %p287_p12 }
  0x21   :  { %p290_p1 = pnand %p289_p0, %p283_p11 }
  0x23   :  { %293 = shalt.err (!%p290_p1)
}
  0x24   :  { %s416_s1 = smov 64   ;;  %s417_s20 = smov 4  }
  0x25   :  { %58 = dma.hbm_to_vmem [thread:$0]  %s557_s3, 256, %s460_s24, [#allocation9], %s416_s1, %s416_s1, %s417_s20  }
  0x26   :  { %s418_s23 = smov [#allocation2]   ;;  %s419_s26 = smov [#allocation7]  }
  0x27   :  { %s23_s25 = sshll.u32 %s418_s23, 4  ;;  %s43_s27 = sshll.u32 %s419_s26, 4  ;;  %s24_s25 = int_to_ptr.vmem [resolvable:$true] %s23_s25  ;;  %s44_s27 = int_to_ptr.vmem [resolvable:$true] %s43_s27 }
  0x28   :  { %s294_s30 = scalar_lea.hbm %s554_s0, 32 }
  0x29   :  { %p295_p2 = scmp.ne.s32.totalorder %s554_s0, %s294_s30  ;;  %p298_p3 = scmp.lt.u32.totalorder %s294_s30, %s554_s0 }
  0x2b   :  { %p300_p4 = pnand %p298_p3, %p295_p2 }
  0x2d   :  { %303 = shalt.err (!%p300_p4)
}
  0x2e   :  { %s304_s3 = scalar_lea.vmem %s24_s25, 32  ;;  %p309_p6 = scmp.lt.s32.totalorder %s24_s25, %s24_s25 }
  0x2f   :  { %p305_p5 = scmp.ne.s32.totalorder %s24_s25, %s304_s3  ;;  %p310_p7 = scmp.lt.s32.totalorder %s304_s3, %s304_s3 }
  0x31   :  { %p311_p8 = por %p310_p7, %p309_p6 }
  0x33   :  { %p312_p9 = pnand %p311_p8, %p305_p5 }
  0x35   :  { %315 = shalt.err (!%p312_p9)
}
  0x36   :  { %26 = dma.hbm_to_vmem [thread:$0]  %s554_s0, 32, %s24_s25, [#allocation3]  }
  0x37   :  { %s316_s14 = scalar_lea.hbm %s556_s2, 16 }
  0x38   :  { %p317_p10 = scmp.ne.s32.totalorder %s556_s2, %s316_s14  ;;  %p320_p11 = scmp.lt.u32.totalorder %s316_s14, %s556_s2 }
  0x3a   :  { %p322_p12 = pnand %p320_p11, %p317_p10 }
  0x3c   :  { %325 = shalt.err (!%p322_p12)
}
  0x3d   :  { %s326_s19 = scalar_lea.vmem %s44_s27, 16  ;;  %s330_s1 = scalar_lea.vmem %s44_s27, 32 }
  0x3e   :  { %p327_p13 = scmp.ne.s32.totalorder %s44_s27, %s326_s19  ;;  %p331_p0 = scmp.lt.s32.totalorder %s44_s27, %s44_s27 }
  0x3f   :  { %p332_p1 = scmp.lt.s32.totalorder %s330_s1, %s326_s19 }
  0x41   :  { %p333_p2 = por %p332_p1, %p331_p0 }
  0x43   :  { %p334_p3 = pnand %p333_p2, %p327_p13 }
  0x45   :  { %337 = shalt.err (!%p334_p3)
}
  0x46   :  { %46 = dma.hbm_to_vmem [thread:$0]  %s556_s2, 16, %s44_s27, [#allocation6]  }
  0x47   :  { %s420_s21 = smov [#allocation10]   ;;  %s338_s26 = scalar_lea.hbm %s558_s4, 16 }
  0x48   :  { %s65_s22 = sshll.u32 %s420_s21, 4  ;;  %p339_p4 = scmp.ne.s32.totalorder %s558_s4, %s338_s26  ;;  %s66_s22 = int_to_ptr.vmem [resolvable:$true] %s65_s22 }
  0x49   :  { %p342_p5 = scmp.lt.u32.totalorder %s338_s26, %s558_s4 }
  0x4b   :  { %p344_p6 = pnand %p342_p5, %p339_p4 }
  0x4d   :  { %347 = shalt.err (!%p344_p6)
}
  0x4e   :  { %s348_s8 = scalar_lea.vmem %s66_s22, 16  ;;  %s352_s2 = scalar_lea.vmem %s66_s22, 32 }
  0x4f   :  { %p349_p7 = scmp.ne.s32.totalorder %s66_s22, %s348_s8  ;;  %p353_p8 = scmp.lt.s32.totalorder %s66_s22, %s66_s22 }
  0x50   :  { %p354_p9 = scmp.lt.s32.totalorder %s352_s2, %s348_s8 }
  0x52   :  { %p355_p10 = por %p354_p9, %p353_p8 }
  0x54   :  { %p356_p11 = pnand %p355_p10, %p349_p7 }
  0x56   :  { %359 = shalt.err (!%p356_p11)
}
  0x57   :  { %68 = dma.hbm_to_vmem [thread:$0]  %s558_s4, 16, %s66_s22, [#allocation9]  }
  0x58   :  { %404 = dma.done.wait [#allocation3], 32  }
  0x59   :  { %405 = vsyncadd [#allocation3], 4294967264 }
  0x5a   :  { %406 = dma.done.wait [#allocation6], 32  }
  0x5b   :  { %407 = vsyncadd [#allocation6], 4294967264 }
  0x5c   :  { %408 = dma.done.wait [#allocation9], 272  }
  0x5d   :  { %409 = vsyncadd [#allocation9], 4294967024  ;;  %vm86_vm0 = vcmask 254976   ;;  %v85_v0 = vld [vmem:[#allocation2] sm:$0x3]  ;;  %v246_v7 = vld [vmem:[#allocation8] sm:$0xff]  }
  0x5e   :  { %v87_v1 = vsel %vm86_vm0, %v85_v0, 0.0  ;;  %v421_v8 = vmov 0.0   ;;  %v247_v9 = vld [vmem:[#allocation8 + $0x8] sm:$0xff]   ;;  %vm422_vm1 = vmmov 0   ;;  %v218_v14 = vld [vmem:[#allocation5] ss:$0 sm:$0xff] }
  0x5f   :  { %88 = vadd.xlane.f32.xlu0 %v87_v1  ;;  %227 = vmatprep.subr.bf16.mxu0 %v421_v8  ;;  %v219_v16 = vld [vmem:[#allocation7] ss:$0 sm:$0xff]  ;;  %vm142_vm2 = vcmask 261120   ;;  %s423_s4 = smov [#allocation12]  }
  0x60   :  { %228 = vmatpush3.bf16.msra.mxu0 %v246_v7  ;;  %231 = vmatprep.mubr.msk.bf16.mxu0 %vm422_vm1, %v421_v8  ;;  %s203_s10 = sshll.u32 %s423_s4, 4  ;;  %s204_s10 = int_to_ptr.vmem [resolvable:$true] %s203_s10 }
  0x61   :  { %229 = vmatprep.subr.bf16.mxu0 %v421_v8  ;;  %s360_s3 = scalar_lea.vmem %s204_s10, 32  ;;  %p365_p13 = scmp.lt.s32.totalorder %s204_s10, %s204_s10 }
  0x62   :  { %p361_p12 = scmp.ne.s32.totalorder %s204_s10, %s360_s3  ;;  %p366_p0 = scmp.lt.s32.totalorder %s360_s3, %s360_s3 }
  0x64   :  { %230 = vmatpush3.bf16.msra.mxu0 %v247_v9  ;;  %p367_p1 = por %p366_p0, %p365_p13 }
  0x66   :  { %p368_p2 = pnand %p367_p1, %p361_p12 }
  0xec   :  { %v89_v2 = vpop.xlane.xlu0 %88 }
  0xed   :  { %v91_v3 = vmul.f32 0.03125, %v89_v2 }
  0xef   :  { %v92_v4 = vsub.f32 %v85_v0, %v91_v3 }
  0xf1   :  { %v93_v5 = vmul.f32 %v92_v4, %v92_v4 }
  0xf3   :  { %v94_v6 = vsel %vm86_vm0, %v93_v5, 0.0 }
  0xf4   :  { %95 = vadd.xlane.f32.xlu0 %v94_v6 }
 0x181   :  { %v96_v10 = vpop.xlane.xlu0 %95 }
 0x182   :  { %v97_v11 = vmul.f32 0.03125, %v96_v10 }
 0x184   :  { %v98_v12 = vadd.f32 1e-06, %v97_v11 }
 0x186   :  { %248 = vrsqrt.f32 %v98_v12 }
 0x190   :  { %v249_v13 = vpop.eup %248 }
 0x191   :  { %v100_v15 = vmul.f32 %v249_v13, %v92_v4 }
 0x193   :  { %v108_v17 = vmul.f32 %v218_v14, %v100_v15 }
 0x195   :  { %v116_v18 = vadd.f32 %v219_v16, %v108_v17 }
 0x197   :  { %v118_v19 = vpack.c.bf16 %v116_v18, %v116_v18  ;;  %117 = vst.msk [vmem:[#allocation12] sm:$0x3] %vm86_vm0, %v116_v18 }
 0x199   :  { %232 = vmatmul.mubr.msk.bf16.vlgmr.msra.gmra.mrb[0].mxu0 %vm142_vm2, %v118_v19 }
 0x19a   :  { %371 = shalt.err (!%p368_p2)
}
 0x19b   :  { %s372_s12 = scalar_lea.hbm %s560_s6, 32 }
 0x19c   :  { %p373_p3 = scmp.ne.s32.totalorder %s560_s6, %s372_s12  ;;  %p376_p4 = scmp.lt.u32.totalorder %s372_s12, %s560_s6 }
 0x19e   :  { %p378_p5 = pnand %p376_p4, %p373_p3 }
 0x1a0   :  { %381 = shalt.err (!%p378_p5)
}
 0x1a1   :  { %206 = dma.vmem_to_hbm [thread:$0]  %s204_s10, 32, %s560_s6, [#allocation13]   ;;  %v220_v20 = vld [vmem:[#allocation10] ss:$0 sm:$0xff] }
 0x1a2   :  { %s424_s19 = smov [#allocation11]  }
 0x1a3   :  { %s193_s1 = sshll.u32 %s424_s19, 4  ;;  %s194_s1 = int_to_ptr.vmem [resolvable:$true] %s193_s1 }
 0x1a4   :  { %s382_s0 = scalar_lea.vmem %s194_s1, 32  ;;  %p387_p7 = scmp.lt.s32.totalorder %s194_s1, %s194_s1 }
 0x1a5   :  { %p383_p6 = scmp.ne.s32.totalorder %s194_s1, %s382_s0  ;;  %p388_p8 = scmp.lt.s32.totalorder %s382_s0, %s382_s0 }
 0x1a7   :  { %p389_p9 = por %p388_p8, %p387_p7 }
 0x1a9   :  { %p390_p10 = pnand %p389_p9, %p383_p6 }
 0x26c   :  { %v180_v21 = vpop.f32.mrb[0].mxu0 }
 0x26d   :  { %v181_v22 = vadd.f32 %v220_v20, %v180_v21  ;;  %v233_v23 = vpop.f32.mrb[1].mxu0 }
 0x26e   :  { %v183_v24 = vpop.f32.mrb[2].mxu0 }
 0x26f   :  { %186 = vst [vmem:[#allocation11] sm:$0x3] %v181_v22  ;;  %v234_v25 = vpop.f32.mrb[3].mxu0 }
 0x270   :  { %393 = shalt.err (!%p390_p10)
}
 0x271   :  { %s394_s6 = scalar_lea.hbm %s559_s5, 32 }
 0x272   :  { %p395_p11 = scmp.ne.s32.totalorder %s559_s5, %s394_s6  ;;  %p398_p12 = scmp.lt.u32.totalorder %s394_s6, %s559_s5 }
 0x274   :  { %p400_p13 = pnand %p398_p12, %p395_p11 }
 0x276   :  { %403 = shalt.err (!%p400_p13)
}
 0x277   :  { %196 = dma.vmem_to_hbm [thread:$0]  %s194_s1, 32, %s559_s5, [#allocation4]  }
 0x278   :  { %410 = dma.done.wait [#allocation4], 32  }
 0x279   :  { %411 = vsyncadd [#allocation4], 4294967264 }
 0x27a   :  { %412 = dma.done.wait [#allocation13], 32  }
 0x27b   :  { %413 = vsyncadd [#allocation13], 4294967264 }
 0x27c   :  { %213 = vsyncpa [#allocation3], 1 }
 0x27d   :  { %214 = vsyncpa [#allocation6], 1 }
 0x27e   :  { %215 = vsyncpa [#allocation9], 1 }
 0x27f   :  { %216 = vsyncpa [#allocation4], 1 }
 0x280   :  { %217 = vsyncpa [#allocation13], 1 }

// kernel: vit_ensemble_forward.10
= control target key start
LH: loop header
LB: loop body
LE: loop exit
PB: predicated region body
PF: predicated region fallthrough
CT: control target
= control target key end

     0   :  { %s3986_s0 = inlined_call_operand.hbm [shape: f32[2,5,32], index: 0, kind: input, shape index: {}]   ;;  %s3987_s1 = inlined_call_operand.hbm [shape: f32[2,1,32], index: 1, kind: input, shape index: {}]   ;;  %s3988_s2 = inlined_call_operand.hbm [shape: f32[2,1,32], index: 2, kind: input, shape index: {}]   ;;  %s3989_s3 = inlined_call_operand.hbm [shape: bf16[2,32,96], index: 3, kind: input, shape index: {}]   ;;  %s3990_s4 = inlined_call_operand.hbm [shape: f32[2,1,96], index: 4, kind: input, shape index: {}]   ;;  %s3991_s5 = inlined_call_operand.hbm [shape: bf16[2,32,32], index: 5, kind: input, shape index: {}]   ;;  %s3992_s6 = inlined_call_operand.hbm [shape: f32[2,1,32], index: 6, kind: input, shape index: {}]   ;;  %s3993_s7 = inlined_call_operand.hbm [shape: f32[2,1,32], index: 7, kind: input, shape index: {}]   ;;  %s3994_s8 = inlined_call_operand.hbm [shape: f32[2,1,32], index: 8, kind: input, shape index: {}]   ;;  %s3995_s9 = inlined_call_operand.hbm [shape: bf16[2,32,128], index: 9, kind: input, shape index: {}]   ;;  %s3996_s10 = inlined_call_operand.hbm [shape: f32[2,1,128], index: 10, kind: input, shape index: {}]   ;;  %s3997_s11 = inlined_call_operand.hbm [shape: bf16[2,128,32], index: 11, kind: input, shape index: {}]   ;;  %s3998_s12 = inlined_call_operand.hbm [shape: f32[2,1,32], index: 12, kind: input, shape index: {}]   ;;  %s3999_s13 = inlined_call_operand.hbm [shape: f32[2,5,32], index: 13, kind: output, shape index: {}]  }
   0x1   :  { %4036 = sst [smem:[#allocation44_spill]] %s3986_s0 }
   0x2   :  { %4037 = sst [smem:[#allocation45_spill]] %s3987_s1 }
   0x3   :  { %4038 = sst [smem:[#allocation46_spill]] %s3988_s2 }
   0x4   :  { %4039 = sst [smem:[#allocation47_spill]] %s3989_s3 }
   0x5   :  { %4040 = sst [smem:[#allocation48_spill]] %s3990_s4 }
   0x6   :  { %4041 = sst [smem:[#allocation49_spill]] %s3991_s5 }
   0x7   :  { %4042 = sst [smem:[#allocation50_spill]] %s3992_s6 }
   0x8   :  { %4043 = sst [smem:[#allocation51_spill]] %s3993_s7 }
   0x9   :  { %4044 = sst [smem:[#allocation52_spill]] %s3994_s8 }
   0xa   :  { %4045 = sst [smem:[#allocation53_spill]] %s3995_s9 }
   0xb   :  { %4046 = sst [smem:[#allocation54_spill]] %s3996_s10 }
   0xc   :  { %4047 = sst [smem:[#allocation55_spill]] %s3997_s11 }
   0xd   :  { %4048 = sst [smem:[#allocation56_spill]] %s3998_s12 }
   0xe   :  { %4049 = sst [smem:[#allocation57_spill]] %s3999_s13 }
   0xf   :  { %18 = vsyncpa [#allocation3], 0 }
  0x10   :  { %20 = vsyncpa [#allocation3 + $0x1], 0 }
  0x11   :  { %21 = vsyncpa [#allocation6], 0 }
  0x12   :  { %23 = vsyncpa [#allocation6 + $0x1], 0 }
  0x13   :  { %24 = vsyncpa [#allocation9], 0 }
  0x14   :  { %26 = vsyncpa [#allocation9 + $0x1], 0 }
  0x15   :  { %27 = vsyncpa [#allocation12], 0 }
  0x16   :  { %29 = vsyncpa [#allocation12 + $0x1], 0 }
  0x17   :  { %30 = vsyncpa [#allocation15], 0 }
  0x18   :  { %32 = vsyncpa [#allocation15 + $0x1], 0 }
  0x19   :  { %33 = vsyncpa [#allocation18], 0 }
  0x1a   :  { %35 = vsyncpa [#allocation18 + $0x1], 0 }
  0x1b   :  { %36 = vsyncpa [#allocation21], 0 }
  0x1c   :  { %38 = vsyncpa [#allocation21 + $0x1], 0 }
  0x1d   :  { %39 = vsyncpa [#allocation4], 0 }
  0x1e   :  { %41 = vsyncpa [#allocation4 + $0x1], 0  ;;  %s3120_s25 = smov 0   ;;  %s3122_s26 = smov 0  }
  0x1f   :  { %s3124_s27 = smov 0   ;;  %s3126_s28 = smov 0  }
  0x20   :  { %s3128_s29 = smov 0   ;;  %s3130_s30 = smov 0  }
  0x21   :  { %s3132_s14 = smov 0   ;;  %s3134_s15 = smov 0  }
  0x22   :  { %s3136_s16 = smov 0   ;;  %s3138_s17 = smov 0  }
  0x23   :  { %s3140_s18 = smov 0  }
  0x24 LB: > { %4050 = sst [smem:[#allocation32_spill]] %s2985_s26  ;;  %p4007_p0 = scmp.eq.s32.totalorder %s3021_s18, 0  ;;  %s3021_s18 = sphi %s3140_s18, %s47_s18   ;;  %s3017_s17 = sphi %s3138_s17, %s4126_s17   ;;  %s3013_s16 = sphi %s3136_s16, %s4125_s16   ;;  %s3009_s15 = sphi %s3134_s15, %s4124_s15   ;;  %s3005_s14 = sphi %s3132_s14, %s4123_s14   ;;  %s3001_s30 = sphi %s3130_s30, %s4122_s30   ;;  %s2997_s29 = sphi %s3128_s29, %s4128_s29   ;;  %s2993_s28 = sphi %s3126_s28, %s4127_s28   ;;  %s2989_s27 = sphi %s3124_s27, %s4120_s27   ;;  %s2985_s26 = sphi %s3122_s26, %s4119_s26   ;;  %s2981_s25 = sphi %s3120_s25, %s4118_s25  }
  0x25   : > { %4051 = sst [smem:[#allocation33_spill]] %s2989_s27  ;;  %p99_p1 = scmp.ne.s32.totalorder %s2989_s27, %s2985_s26 }
  0x26   : > { %4052 = sst [smem:[#allocation34_spill]] %s3001_s30  ;;  %p4006_p2 = scmp.lt.s32.totalorder %s3021_s18, 4 }
  0x27   : > { %4053 = sst [smem:[#allocation35_spill]] %s3005_s14  ;;  %p101_p3 = por %p99_p1, %p4007_p0 }
  0x28   : > { %4054 = sst [smem:[#allocation36_spill]] %s3009_s15  ;;  %s3182_s19 = sand.u32 1, %s3021_s18  }
  0x29   : > { %4055 = sst [smem:[#allocation37_spill]] %s3013_s16  ;;  %s3185_s20 = sand.u32 1, %s2989_s27  }
  0x2a   : > { %4056 = sst [smem:[#allocation38_spill]] %s3017_s17  ;;  %s3188_s21 = sshll.u32 %s3013_s16, 4 }
  0x2b   : > { %s4057_s1 = sld [smem:[#allocation45_spill]]  ;;  %s462_s13 = scalar_lea.vmem [#allocation5], %s3185_s20 }
  0x2c   : > { %s469_s15 = sshll.u32 %s462_s13, 4  ;;  %p3201_p4 = pnand %p4006_p2, %p101_p3  ;;  %s3197_s15 = int_to_ptr.vmem [resolvable:$true] %s469_s15 }
  0x2e   : > { %s4058_s14 = scalar_select %p3201_p4, 1, 0 }
  0x2f   : > { %p3212_p8 = pneg %p3201_p4 }
  0x31   : > { %s3194_s24 = scalar_lea.hbm %s4057_s1, %s3188_s21  ;;  %s2490_s8 = scalar_lea.hbm %s4057_s1, 32 }
  0x32   : > { %s2485_s22 = scalar_lea.hbm %s3194_s24, 16  ;;  %p2491_p11 = scmp.lt.u32.totalorder %s3194_s24, %s4057_s1 }
  0x33   : > { %p2486_p7 = scmp.ne.s32.totalorder %s3194_s24, %s2485_s22  ;;  %p2492_p12 = scmp.lt.u32.totalorder %s2490_s8, %s2485_s22 }
  0x34   : > { %p2494_p1 = scmp.lt.u32.totalorder %s2485_s22, %s3194_s24 }
  0x35   : > { %p2488_p9 = pnand %p3212_p8, %p2486_p7  ;;  %p2493_p13 = por %p2492_p12, %p2491_p11 }
  0x37   : > { %p2489_p10 = pneg %p2488_p9  ;;  %p2495_p3 = por %p2494_p1, %p2493_p13 }
  0x39   : > { %p2496_p2 = pnand %p2495_p3, %p2489_p10 }
  0x3b   : > { %2499 = shalt.err (!%p2496_p2)
}
  0x3c   : > { %s2500_s12 = scalar_lea.vmem %s3197_s15, 16  ;;  %s3023_s10 = smov [#allocation5]  }
  0x3d   : > { %p2501_p7 = scmp.ne.s32.totalorder %s3197_s15, %s2500_s12  ;;  %s2505_s13 = sshll.u32 %s3023_s10, 4  ;;  %s2506_s13 = int_to_ptr.vmem [resolvable:$false] %s2505_s13 }
  0x3e   : > { %s2507_s4 = scalar_lea.vmem %s2506_s13, 32  ;;  %p2508_p5 = scmp.lt.s32.totalorder %s3197_s15, %s2506_s13 }
  0x3f   : > { %p2503_p9 = pnand %p2501_p7, %p3212_p8  ;;  %p2509_p6 = scmp.lt.s32.totalorder %s2507_s4, %s2500_s12 }
  0x41   : > { %p2504_p0 = pneg %p2503_p9  ;;  %p2510_p11 = por %p2509_p6, %p2508_p5 }
  0x43   : > { %p2511_p12 = pnand %p2510_p11, %p2504_p0 }
  0x45   : > { %2514 = shalt.err (!%p2511_p12)
}
  0x46   : > { %s4060_s6 = scalar_lea.sflag [#allocation6], %s3182_s19  ;;  %p4061_p2 = scmp.lt.s32.totalorder %s3021_s18, 5 }
  0x47   : > { %2308 = dma.hbm_to_vmem [thread:$0]  (!%p3201_p4), %s3194_s24, 16, %s3197_s15, %s4060_s6  }
  0x48   : > { %p4062_p10 = scmp.ge.s32.totalorder %s3021_s18, 1  ;;  %s3246_s12 = sshll.u32 %s3185_s20, 4 }
  0x49   : > { %s3249_s22 = sshll.u32 %s3013_s16, 8  ;;  %s4065_s3 = sld [smem:[#allocation47_spill]] }
  0x4a   : > { %p3241_p13 = pnand %p4062_p10, %p4061_p2  ;;  %s497_s15 = scalar_lea.vmem [#allocation8], %s3246_s12 }
  0x4b   : > { %s504_s24 = sshll.u32 %s497_s15, 4  ;;  %s4012_s6 = scalar_lea.sflag [#allocation9], %s3182_s19  ;;  %s3258_s24 = int_to_ptr.vmem [resolvable:$true] %s504_s24 }
  0x4c   : > { %s4063_s8 = scalar_select %p3241_p13, 1, 0 }
  0x4e   : > { %4064 = sst [smem:[#allocation39_spill]] %s4063_s8 }
  0x4f   : > { %s3255_s4 = scalar_lea.hbm %s4065_s3, %s3249_s22  ;;  %s2520_s10 = scalar_lea.hbm %s4065_s3, 512 }
  0x50   : > { %s2515_s1 = scalar_lea.hbm %s3255_s4, 256  ;;  %p2521_p1 = scmp.lt.u32.totalorder %s3255_s4, %s4065_s3 }
  0x51   : > { %p2516_p0 = scmp.ne.s32.totalorder %s3255_s4, %s2515_s1  ;;  %p2522_p3 = scmp.lt.u32.totalorder %s2520_s10, %s2515_s1 }
  0x52   : > { %p2524_p9 = scmp.lt.u32.totalorder %s2515_s1, %s3255_s4 }
  0x53   : > { %p2518_p5 = pnand %p2516_p0, %p3212_p8  ;;  %p2523_p7 = por %p2522_p3, %p2521_p1 }
  0x55   : > { %p2519_p6 = pneg %p2518_p5  ;;  %p2525_p11 = por %p2524_p9, %p2523_p7 }
  0x57   : > { %p2526_p12 = pnand %p2525_p11, %p2519_p6 }
  0x59   : > { %2529 = shalt.err (!%p2526_p12)
}
  0x5a   : > { %s2530_s15 = scalar_lea.vmem %s3258_s24, 256  ;;  %s3024_s2 = smov [#allocation8]  }
  0x5b   : > { %p2531_p2 = scmp.ne.s32.totalorder %s3258_s24, %s2530_s15  ;;  %s2535_s8 = sshll.u32 %s3024_s2, 4  ;;  %s2536_s8 = int_to_ptr.vmem [resolvable:$false] %s2535_s8 }
  0x5c   : > { %s2537_s0 = scalar_lea.vmem %s2536_s8, 512  ;;  %p2538_p5 = scmp.lt.s32.totalorder %s3258_s24, %s2536_s8 }
  0x5d   : > { %p2533_p10 = pnand %p2531_p2, %p3212_p8  ;;  %p2539_p13 = scmp.lt.s32.totalorder %s2537_s0, %s2530_s15 }
  0x5f   : > { %p2534_p0 = pneg %p2533_p10  ;;  %p2540_p1 = por %p2539_p13, %p2538_p5 }
  0x61   : > { %p2541_p3 = pnand %p2540_p1, %p2534_p0 }
  0x63   : > { %2544 = shalt.err (!%p2541_p3)
}
  0x64   : > { %s4014_s1 = smov 64   ;;  %s3026_s10 = smov 4  }
  0x65   : > { %2314 = dma.hbm_to_vmem [thread:$0]  (!%p3201_p4), %s3255_s4, 256, %s3258_s24, %s4012_s6, %s4014_s1, %s4014_s1, %s3026_s10  }
  0x66   : > { %s4066_s5 = sld [smem:[#allocation49_spill]]  ;;  %s535_s8 = scalar_lea.vmem [#allocation11], %s3246_s12 }
  0x67   : > { %s542_s0 = sshll.u32 %s535_s8, 4  ;;  %s4013_s3 = scalar_lea.sflag [#allocation12], %s3182_s19  ;;  %s3294_s0 = int_to_ptr.vmem [resolvable:$true] %s542_s0 }
  0x6c   : > { %s3291_s2 = scalar_lea.hbm %s4066_s5, %s3249_s22  ;;  %s2550_s13 = scalar_lea.hbm %s4066_s5, 512 }
  0x6d   : > { %s2545_s26 = scalar_lea.hbm %s3291_s2, 256  ;;  %p2551_p9 = scmp.lt.u32.totalorder %s3291_s2, %s4066_s5 }
  0x6e   : > { %p2546_p13 = scmp.ne.s32.totalorder %s3291_s2, %s2545_s26  ;;  %p2552_p11 = scmp.lt.u32.totalorder %s2550_s13, %s2545_s26 }
  0x6f   : > { %p2554_p2 = scmp.lt.u32.totalorder %s2545_s26, %s3291_s2 }
  0x70   : > { %p2548_p6 = pnand %p2546_p13, %p3212_p8  ;;  %p2553_p12 = por %p2552_p11, %p2551_p9 }
  0x72   : > { %p2549_p7 = pneg %p2548_p6  ;;  %p2555_p10 = por %p2554_p2, %p2553_p12 }
  0x74   : > { %p2556_p0 = pnand %p2555_p10, %p2549_p7 }
  0x76   : > { %2559 = shalt.err (!%p2556_p0)
}
  0x77   : > { %s2560_s8 = scalar_lea.vmem %s3294_s0, 256  ;;  %s3027_s4 = smov [#allocation11]  }
  0x78   : > { %p2561_p5 = scmp.ne.s32.totalorder %s3294_s0, %s2560_s8  ;;  %s2565_s24 = sshll.u32 %s3027_s4, 4  ;;  %s2566_s24 = int_to_ptr.vmem [resolvable:$false] %s2565_s24 }
  0x79   : > { %s2567_s6 = scalar_lea.vmem %s2566_s24, 512  ;;  %p2568_p13 = scmp.lt.s32.totalorder %s3294_s0, %s2566_s24 }
  0x7a   : > { %p2563_p1 = pnand %p2561_p5, %p3212_p8  ;;  %p2569_p6 = scmp.lt.s32.totalorder %s2567_s6, %s2560_s8 }
  0x7c   : > { %p2564_p3 = pneg %p2563_p1  ;;  %p2570_p9 = por %p2569_p6, %p2568_p13 }
  0x7e   : > { %p2571_p11 = pnand %p2570_p9, %p2564_p3 }
  0x80   : > { %2574 = shalt.err (!%p2571_p11)
}
  0x81   : > { %2320 = dma.hbm_to_vmem [thread:$0]  (!%p3201_p4), %s3291_s2, 256, %s3294_s0, %s4013_s3, %s4014_s1, %s4014_s1, %s3026_s10  }
  0x82   : > { %s4067_s7 = sld [smem:[#allocation51_spill]]  ;;  %s572_s8 = scalar_lea.vmem [#allocation14], %s3185_s20 }
  0x83   : > { %s579_s4 = sshll.u32 %s572_s8, 4  ;;  %s4020_s24 = scalar_lea.sflag [#allocation15], %s3182_s19  ;;  %s580_s4 = int_to_ptr.vmem [resolvable:$true] %s579_s4 }
  0x88   : > { %s3327_s15 = scalar_lea.hbm %s4067_s7, %s3188_s21  ;;  %s2580_s0 = scalar_lea.hbm %s4067_s7, 32 }
  0x89   : > { %s2575_s6 = scalar_lea.hbm %s3327_s15, 16  ;;  %p2581_p10 = scmp.lt.u32.totalorder %s3327_s15, %s4067_s7 }
  0x8a   : > { %p2576_p7 = scmp.ne.s32.totalorder %s3327_s15, %s2575_s6  ;;  %p2582_p0 = scmp.lt.u32.totalorder %s2580_s0, %s2575_s6 }
  0x8b   : > { %p2584_p1 = scmp.lt.u32.totalorder %s2575_s6, %s3327_s15 }
  0x8c   : > { %p2578_p12 = pnand %p2576_p7, %p3212_p8  ;;  %p2583_p5 = por %p2582_p0, %p2581_p10 }
  0x8e   : > { %p2579_p2 = pneg %p2578_p12  ;;  %p2585_p3 = por %p2584_p1, %p2583_p5 }
  0x90   : > { %p2586_p13 = pnand %p2585_p3, %p2579_p2 }
  0x92   : > { %2589 = shalt.err (!%p2586_p13)
}
  0x93   : > { %s2590_s8 = scalar_lea.vmem %s580_s4, 16  ;;  %s3028_s3 = smov [#allocation14]  }
  0x94   : > { %p2591_p6 = scmp.ne.s32.totalorder %s580_s4, %s2590_s8  ;;  %s2595_s1 = sshll.u32 %s3028_s3, 4  ;;  %s2596_s1 = int_to_ptr.vmem [resolvable:$false] %s2595_s1 }
  0x95   : > { %s2597_s5 = scalar_lea.vmem %s2596_s1, 32  ;;  %p2598_p7 = scmp.lt.s32.totalorder %s580_s4, %s2596_s1 }
  0x96   : > { %p2593_p9 = pnand %p2591_p6, %p3212_p8  ;;  %p2599_p12 = scmp.lt.s32.totalorder %s2597_s5, %s2590_s8 }
  0x98   : > { %p2594_p11 = pneg %p2593_p9  ;;  %p2600_p4 = por %p2599_p12, %p2598_p7 }
  0x9a   : > { %p2601_p0 = pnand %p2600_p4, %p2594_p11 }
  0x9c   : > { %2604 = shalt.err (!%p2601_p0)
}
  0x9d   : > { %p4068_p10 = scmp.ne.s32.totalorder %s4058_s14, 0  ;;  %s4069_s9 = sld [smem:[#allocation53_spill]] }
  0x9e   : > { %s607_s1 = scalar_lea.vmem [#allocation17], %s3246_s12  ;;  %s2095_s26 = sshll.u32 %s3185_s20, 6 }
  0x9f   : > { %2326 = dma.hbm_to_vmem [thread:$0]  (!%p4068_p10), %s3327_s15, 16, %s580_s4, %s4020_s24  }
  0xa0   : > { %s614_s0 = sshll.u32 %s607_s1, 4  ;;  %s4019_s13 = scalar_lea.sflag [#allocation18], %s3182_s19  ;;  %s3357_s0 = int_to_ptr.vmem [resolvable:$true] %s614_s0 }
  0xa3   : > { %s3354_s2 = scalar_lea.hbm %s4069_s9, %s3249_s22  ;;  %s2610_s22 = scalar_lea.hbm %s4069_s9, 512 }
  0xa4   : > { %s2605_s8 = scalar_lea.hbm %s3354_s2, 256  ;;  %p2611_p1 = scmp.lt.u32.totalorder %s3354_s2, %s4069_s9 }
  0xa5   : > { %p2606_p4 = scmp.ne.s32.totalorder %s3354_s2, %s2605_s8  ;;  %p2612_p3 = scmp.lt.u32.totalorder %s2610_s22, %s2605_s8 }
  0xa6   : > { %p2614_p6 = scmp.lt.u32.totalorder %s2605_s8, %s3354_s2 }
  0xa7   : > { %p2608_p2 = pnand %p2606_p4, %p3212_p8  ;;  %p2613_p13 = por %p2612_p3, %p2611_p1 }
  0xa9   : > { %p2609_p5 = pneg %p2608_p2  ;;  %p2615_p9 = por %p2614_p6, %p2613_p13 }
  0xab   : > { %p2616_p11 = pnand %p2615_p9, %p2609_p5 }
  0xad   : > { %2619 = shalt.err (!%p2616_p11)
}
  0xae   : > { %s2620_s12 = scalar_lea.vmem %s3357_s0, 256  ;;  %s3029_s3 = smov [#allocation17]  }
  0xaf   : > { %p2621_p7 = scmp.ne.s32.totalorder %s3357_s0, %s2620_s12  ;;  %s2625_s1 = sshll.u32 %s3029_s3, 4  ;;  %s2626_s1 = int_to_ptr.vmem [resolvable:$false] %s2625_s1 }
  0xb0   : > { %s2627_s15 = scalar_lea.vmem %s2626_s1, 512  ;;  %p2628_p4 = scmp.lt.s32.totalorder %s3357_s0, %s2626_s1 }
  0xb1   : > { %p2623_p12 = pnand %p2621_p7, %p3212_p8  ;;  %p2629_p2 = scmp.lt.s32.totalorder %s2627_s15, %s2620_s12 }
  0xb3   : > { %p2624_p0 = pneg %p2623_p12  ;;  %p2630_p1 = por %p2629_p2, %p2628_p4 }
  0xb5   : > { %p2631_p3 = pnand %p2630_p1, %p2624_p0 }
  0xb7   : > { %2634 = shalt.err (!%p2631_p3)
}
  0xb8   : > { %s4070_s8 = smov 64   ;;  %s2147_s4 = sshll.u32 %s3013_s16, 10 }
  0xb9   : > { %2332 = dma.hbm_to_vmem [thread:$0]  (!%p4068_p10), %s3354_s2, 256, %s3357_s0, %s4019_s13, %s4070_s8, %s4070_s8, %s3026_s10  }
  0xba   : > { %s4071_s11 = sld [smem:[#allocation55_spill]]  ;;  %s645_s12 = scalar_lea.vmem [#allocation20], %s2095_s26 }
  0xbb   : > { %s652_s3 = sshll.u32 %s645_s12, 4  ;;  %s4018_s1 = scalar_lea.sflag [#allocation21], %s3182_s19  ;;  %s3395_s3 = int_to_ptr.vmem [resolvable:$true] %s652_s3 }
  0xc0   : > { %s3391_s6 = scalar_lea.hbm %s4071_s11, %s2147_s4  ;;  %s2640_s4 = scalar_lea.hbm %s4071_s11, 2048 }
  0xc1   : > { %s2635_s15 = scalar_lea.hbm %s3391_s6, 1024  ;;  %p2641_p9 = scmp.lt.u32.totalorder %s3391_s6, %s4071_s11 }
  0xc2   : > { %p2636_p5 = scmp.ne.s32.totalorder %s3391_s6, %s2635_s15  ;;  %p2642_p11 = scmp.lt.u32.totalorder %s2640_s4, %s2635_s15 }
  0xc3   : > { %p2644_p12 = scmp.lt.u32.totalorder %s2635_s15, %s3391_s6 }
  0xc4   : > { %p2638_p13 = pnand %p2636_p5, %p3212_p8  ;;  %p2643_p7 = por %p2642_p11, %p2641_p9 }
  0xc6   : > { %p2639_p6 = pneg %p2638_p13  ;;  %p2645_p0 = por %p2644_p12, %p2643_p7 }
  0xc8   : > { %p2646_p4 = pnand %p2645_p0, %p2639_p6 }
  0xca   : > { %2649 = shalt.err (!%p2646_p4)
}
  0xcb   : > { %s2650_s26 = scalar_lea.vmem %s3395_s3, 1024  ;;  %s3030_s12 = smov [#allocation20]  }
  0xcc   : > { %p2651_p2 = scmp.ne.s32.totalorder %s3395_s3, %s2650_s26  ;;  %s2655_s2 = sshll.u32 %s3030_s12, 4  ;;  %s2656_s2 = int_to_ptr.vmem [resolvable:$false] %s2655_s2 }
  0xcd   : > { %s2657_s0 = scalar_lea.vmem %s2656_s2, 2048  ;;  %p2658_p5 = scmp.lt.s32.totalorder %s3395_s3, %s2656_s2 }
  0xce   : > { %p2653_p1 = pnand %p2651_p2, %p3212_p8  ;;  %p2659_p13 = scmp.lt.s32.totalorder %s2657_s0, %s2650_s26 }
  0xd0   : > { %p2654_p3 = pneg %p2653_p1  ;;  %p2660_p9 = por %p2659_p13, %p2658_p5 }
  0xd2   : > { %p2661_p11 = pnand %p2660_p9, %p2654_p3 }
  0xd4   : > { %2664 = shalt.err (!%p2661_p11)
}
  0xd5   : > { %2338 = dma.hbm_to_vmem [thread:$0]  (!%p4068_p10), %s3391_s6, 1024, %s3395_s3, %s4018_s1, %s4070_s8, %s4070_s8, %s3026_s10  }
  0xd6   : > { %s3425_s15 = sadd.s32 4294967295, %s3021_s18   ;;  %s2074_s4 = sadd.s32 4294967294, %s3021_s18  }
  0xd7   : > { %s56_s22 = sadd.s32 1, %s3013_s16  ;;  %s4072_s5 = sld [smem:[#allocation32_spill]] }
  0xd8   : > { %p57_p6 = scmp.ge.s32.totalorder %s56_s22, 2  ;;  %s59_s26 = sadd.s32 1, %s3017_s17 }
  0xd9   : > { %s66_s12 = sadd.s32 1, %s3001_s30  ;;  %p73_p7 = scmp.ne.s32.totalorder %s3001_s30, %s2997_s29 }
  0xda   : > { %s4130_s22 = smov (%p57_p6, %s56_s22), 0  ;;  %s4132_s26 = smov (!%p57_p6, %s59_s26), %s3017_s17 }
  0xdb   : > { %4073 = sst [smem:[#allocation40_spill]] %s4130_s22  ;;  %p4074_p12 = scmp.eq.s32.totalorder %s3021_s18, 0 }
  0xdc   : > { %p79_p4 = scmp.ne.s32.totalorder %s2997_s29, %s2993_s28  ;;  %p61_p2 = scmp.ge.s32.totalorder %s4132_s26, 2 }
  0xdd   : > { %p3441_p0 = por %p4074_p12, %p73_p7  ;;  %p80_p1 = scmp.eq.s32.totalorder %s3425_s15, 0 }
  0xde   : > { %s89_s8 = ssub.s32 %s3013_s16, %s4130_s22  ;;  %s92_s6 = sadd.s32 1, %s2989_s27 }
  0xdf   : > { %s4134_s26 = smov (%p61_p2, %s4132_s26), 0  ;;  %p3456_p3 = por %p80_p1, %p79_p4 }
  0xe0   : > { %4076 = sst [smem:[#allocation41_spill]] %s4134_s26  ;;  %p90_p5 = scmp.eq.s32.totalorder %s89_s8, 0 }
  0xe1   : > { %s4077_s3 = scalar_select %p3456_p3, 1, 0 }
  0xe2   : > { %s63_s2 = ssub.s32 %s3017_s17, %s4134_s26  ;;  %p105_p13 = scmp.ne.s32.totalorder %s4072_s5, %s2981_s25 }
  0xe3   : > { %p64_p9 = scmp.eq.s32.totalorder %s63_s2, 0  ;;  %p415_p11 = scmp.eq.s32.totalorder %s3425_s15, 3 }
  0xe4   : > { %s3466_s0 = scalar_select %p90_p5, %s2989_s27, %s92_s6  }
  0xe5   : > { %s3469_s1 = scalar_select %p64_p9, %s3001_s30, %s66_s12  }
  0xe6   : > { %4078 = sst [smem:[#allocation42_spill]] %s3466_s0  ;;  %p3471_p6 = por %p105_p13, %p80_p1 }
  0xe7   : > { %4079 = sst [smem:[#allocation43_spill]] %s3469_s1  ;;  %p3478_p12 = por %p415_p11, %p73_p7 }
  0xe8   : > { %s4080_s13 = scalar_select %p3471_p6, 1, 0 }
  0xe9   : > { %s4081_s24 = scalar_select %p3478_p12, 1, 0 }
  0xea   : > { %p421_p2 = scmp.eq.s32.totalorder %s2074_s4, 3  ;;  %s441_s25 = sand.u32 1, %s3001_s30  }
  0xeb   : > { %s2077_s5 = sshll.u32 %s441_s25, 3  ;;  %s2078_s6 = sshll.u32 %s3017_s17, 7 }
  0xec   : > { %p3486_p3 = por %p421_p2, %p79_p4  ;;  %s445_s12 = scalar_lea.vmem [#allocation2], %s2077_s5 }
  0xed   : > { %s452_s2 = sshll.u32 %s445_s12, 4  ;;  %s4083_s11 = sld [smem:[#allocation44_spill]]  ;;  %s3496_s2 = int_to_ptr.vmem [resolvable:$true] %s452_s2 }
  0xee   : > { %s4082_s8 = scalar_select %p3486_p3, 1, 0 }
  0xef   : > { %p4084_p7 = scmp.lt.s32.totalorder %s3021_s18, 4  ;;  %s4086_s12 = sld [smem:[#allocation46_spill]] }
  0xf0   : > { %s479_s9 = scalar_lea.vmem [#allocation7], %s3185_s20  ;;  %s442_s17 = scalar_lea.sflag [#allocation3], %s441_s25 }
  0xf1   : > { %p3502_p4 = pnand %p4084_p7, %p3441_p0 }
  0xf3   : > { %s3494_s26 = scalar_lea.hbm %s4083_s11, %s2078_s6  ;;  %s486_s6 = sshll.u32 %s479_s9, 4  ;;  %s3513_s6 = int_to_ptr.vmem [resolvable:$true] %s486_s6 }
  0xf4   : > { %s2665_s16 = scalar_lea.hbm %s3494_s26, 128  ;;  %p2667_p5 = pneg %p3502_p4 }
  0xf5   : > { %s3510_s7 = scalar_lea.hbm %s4086_s12, %s3188_s21  ;;  %p2666_p1 = scmp.ne.s32.totalorder %s3494_s26, %s2665_s16 }
  0xf6   : > { %s2670_s22 = scalar_lea.hbm %s4083_s11, 256  ;;  %p2671_p9 = scmp.lt.u32.totalorder %s3494_s26, %s4083_s11 }
  0xf7   : > { %p2668_p0 = pnand %p2667_p5, %p2666_p1  ;;  %p2672_p11 = scmp.lt.u32.totalorder %s2670_s22, %s2665_s16 }
  0xf8   : > { %p2674_p7 = scmp.lt.u32.totalorder %s2665_s16, %s3494_s26 }
  0xf9   : > { %p2669_p13 = pneg %p2668_p0  ;;  %p2673_p2 = por %p2672_p11, %p2671_p9 }
  0xfb   : > { %p2675_p3 = por %p2674_p7, %p2673_p2 }
  0xfd   : > { %p2676_p12 = pnand %p2675_p3, %p2669_p13 }
  0xff   : > { %2679 = shalt.err (!%p2676_p12)
}
 0x100   : > { %s2680_s25 = scalar_lea.vmem %s3496_s2, 128  ;;  %s3031_s1 = smov [#allocation2]  }
 0x101   : > { %p2681_p1 = scmp.ne.s32.totalorder %s3496_s2, %s2680_s25  ;;  %s2685_s9 = sshll.u32 %s3031_s1, 4  ;;  %s2686_s9 = int_to_ptr.vmem [resolvable:$false] %s2685_s9 }
 0x102   : > { %s2687_s30 = scalar_lea.vmem %s2686_s9, 256  ;;  %p2688_p10 = scmp.lt.s32.totalorder %s3496_s2, %s2686_s9 }
 0x103   : > { %p2683_p0 = pnand %p2681_p1, %p2667_p5  ;;  %p2689_p9 = scmp.lt.s32.totalorder %s2687_s30, %s2680_s25 }
 0x105   : > { %p2684_p6 = pneg %p2683_p0  ;;  %p2690_p11 = por %p2689_p9, %p2688_p10 }
 0x107   : > { %p2691_p2 = pnand %p2690_p11, %p2684_p6 }
 0x109   : > { %2694 = shalt.err (!%p2691_p2)
}
 0x10a   : > { %2305 = dma.hbm_to_vmem [thread:$0]  (!%p3502_p4), %s3494_s26, 128, %s3496_s2, %s442_s17  }
 0x10b   : > { %s2695_s16 = scalar_lea.hbm %s3510_s7, 16  ;;  %s2700_s5 = scalar_lea.hbm %s4086_s12, 32 }
 0x10c   : > { %p2696_p3 = scmp.ne.s32.totalorder %s3510_s7, %s2695_s16  ;;  %p2701_p10 = scmp.lt.u32.totalorder %s3510_s7, %s4086_s12 }
 0x10d   : > { %p2702_p6 = scmp.lt.u32.totalorder %s2700_s5, %s2695_s16  ;;  %p2704_p7 = scmp.lt.u32.totalorder %s2695_s16, %s3510_s7 }
 0x10e   : > { %p2698_p12 = pnand %p2696_p3, %p3212_p8 }
 0x10f   : > { %p2703_p13 = por %p2702_p6, %p2701_p10 }
 0x110   : > { %p2699_p5 = pneg %p2698_p12 }
 0x111   : > { %p2705_p1 = por %p2704_p7, %p2703_p13 }
 0x113   : > { %p2706_p0 = pnand %p2705_p1, %p2699_p5 }
 0x115   : > { %2709 = shalt.err (!%p2706_p0)
}
 0x116   : > { %s2710_s17 = scalar_lea.vmem %s3513_s6, 16  ;;  %s3032_s26 = smov [#allocation7]  }
 0x117   : > { %p2711_p4 = scmp.ne.s32.totalorder %s3513_s6, %s2710_s17  ;;  %s2715_s2 = sshll.u32 %s3032_s26, 4  ;;  %s2716_s2 = int_to_ptr.vmem [resolvable:$false] %s2715_s2 }
 0x118   : > { %s2717_s4 = scalar_lea.vmem %s2716_s2, 32  ;;  %p2718_p2 = scmp.lt.s32.totalorder %s3513_s6, %s2716_s2 }
 0x119   : > { %p2713_p9 = pnand %p2711_p4, %p3212_p8  ;;  %p2719_p3 = scmp.lt.s32.totalorder %s2717_s4, %s2710_s17 }
 0x11b   : > { %p2714_p11 = pneg %p2713_p9  ;;  %p2720_p12 = por %p2719_p3, %p2718_p2 }
 0x11d   : > { %p2721_p10 = pnand %p2720_p12, %p2714_p11 }
 0x11f   : > { %2724 = shalt.err (!%p2721_p10)
}
 0x120   : > { %p4087_p5 = scmp.ne.s32.totalorder %s4058_s14, 0  ;;  %s4088_s9 = scalar_lea.sflag [#allocation6], %s3182_s19 }
 0x121   : > { %s4089_s10 = sld [smem:[#allocation48_spill]]  ;;  %s517_s5 = scalar_lea.vmem [#allocation10], %s3185_s20 }
 0x122   : > { %2311 = dma.hbm_to_vmem [thread:$0]  (!%p4087_p5), %s3510_s7, 16, %s3513_s6, %s4088_s9  }
 0x123   : > { %s524_s25 = sshll.u32 %s517_s5, 4  ;;  %s4090_s26 = sld [smem:[#allocation50_spill]]  ;;  %s525_s25 = int_to_ptr.vmem [resolvable:$true] %s524_s25 }
 0x127   : > { %s3567_s22 = scalar_lea.hbm %s4089_s10, %s3188_s21  ;;  %s2730_s9 = scalar_lea.hbm %s4089_s10, 32 }
 0x128   : > { %s2725_s11 = scalar_lea.hbm %s3567_s22, 16  ;;  %p2731_p1 = scmp.lt.u32.totalorder %s3567_s22, %s4089_s10 }
 0x129   : > { %s4091_s2 = smov %s4090_s26  ;;  %s3574_s4 = scalar_lea.hbm %s4090_s26, %s3188_s21 }
 0x12a   : > { %p2726_p6 = scmp.ne.s32.totalorder %s3567_s22, %s2725_s11  ;;  %p2732_p0 = scmp.lt.u32.totalorder %s2730_s9, %s2725_s11 }
 0x12b   : > { %p2734_p9 = scmp.lt.u32.totalorder %s2725_s11, %s3567_s22 }
 0x12c   : > { %p2728_p13 = pnand %p2726_p6, %p3212_p8  ;;  %p2733_p4 = por %p2732_p0, %p2731_p1 }
 0x12e   : > { %p2729_p7 = pneg %p2728_p13  ;;  %p2735_p11 = por %p2734_p9, %p2733_p4 }
 0x130   : > { %p2736_p2 = pnand %p2735_p11, %p2729_p7 }
 0x132   : > { %2739 = shalt.err (!%p2736_p2)
}
 0x133   : > { %s2740_s5 = scalar_lea.vmem %s525_s25, 16  ;;  %s3033_s1 = smov [#allocation10]  }
 0x134   : > { %p2741_p3 = scmp.ne.s32.totalorder %s525_s25, %s2740_s5  ;;  %s2745_s17 = sshll.u32 %s3033_s1, 4  ;;  %s2746_s17 = int_to_ptr.vmem [resolvable:$false] %s2745_s17 }
 0x135   : > { %s2747_s26 = scalar_lea.vmem %s2746_s17, 32  ;;  %p2748_p6 = scmp.lt.s32.totalorder %s525_s25, %s2746_s17 }
 0x136   : > { %p2743_p12 = pnand %p2741_p3, %p3212_p8  ;;  %p2749_p13 = scmp.lt.s32.totalorder %s2747_s26, %s2740_s5 }
 0x138   : > { %p2744_p10 = pneg %p2743_p12  ;;  %p2750_p5 = por %p2749_p13, %p2748_p6 }
 0x13a   : > { %p2751_p0 = pnand %p2750_p5, %p2744_p10 }
 0x13c   : > { %2754 = shalt.err (!%p2751_p0)
}
 0x13d   : > { %p4092_p1 = scmp.ne.s32.totalorder %s4058_s14, 0  ;;  %s4093_s11 = scalar_lea.sflag [#allocation9], %s3182_s19 }
 0x13e   : > { %s555_s7 = scalar_lea.vmem [#allocation13], %s3185_s20  ;;  %s4094_s16 = sld [smem:[#allocation52_spill]] }
 0x13f   : > { %2317 = dma.hbm_to_vmem [thread:$0]  (!%p4092_p1), %s3567_s22, 16, %s525_s25, %s4093_s11  }
 0x140   : > { %s562_s6 = sshll.u32 %s555_s7, 4  ;;  %s2755_s17 = scalar_lea.hbm %s3574_s4, 16  ;;  %s563_s6 = int_to_ptr.vmem [resolvable:$true] %s562_s6 }
 0x141   : > { %p2756_p5 = scmp.ne.s32.totalorder %s3574_s4, %s2755_s17  ;;  %s2760_s12 = scalar_lea.hbm %s4091_s2, 32 }
 0x142   : > { %p2761_p9 = scmp.lt.u32.totalorder %s3574_s4, %s4091_s2  ;;  %p2762_p11 = scmp.lt.u32.totalorder %s2760_s12, %s2755_s17 }
 0x143   : > { %p2758_p7 = pnand %p2756_p5, %p3212_p8  ;;  %p2764_p3 = scmp.lt.u32.totalorder %s2755_s17, %s3574_s4 }
 0x144   : > { %s4095_s5 = smov %s4094_s16  ;;  %s3600_s1 = scalar_lea.hbm %s4094_s16, %s3188_s21 }
 0x145   : > { %p2759_p4 = pneg %p2758_p7  ;;  %p2763_p2 = por %p2762_p11, %p2761_p9 }
 0x147   : > { %p2765_p12 = por %p2764_p3, %p2763_p2 }
 0x149   : > { %p2766_p10 = pnand %p2765_p12, %p2759_p4 }
 0x14b   : > { %2769 = shalt.err (!%p2766_p10)
}
 0x14c   : > { %s2770_s22 = scalar_lea.vmem %s563_s6, 16  ;;  %s3034_s25 = smov [#allocation13]  }
 0x14d   : > { %p2771_p6 = scmp.ne.s32.totalorder %s563_s6, %s2770_s22  ;;  %s2775_s11 = sshll.u32 %s3034_s25, 4  ;;  %s2776_s11 = int_to_ptr.vmem [resolvable:$false] %s2775_s11 }
 0x14e   : > { %s2777_s10 = scalar_lea.vmem %s2776_s11, 32  ;;  %p2778_p5 = scmp.lt.s32.totalorder %s563_s6, %s2776_s11 }
 0x14f   : > { %p2773_p13 = pnand %p2771_p6, %p3212_p8  ;;  %p2779_p7 = scmp.lt.s32.totalorder %s2777_s10, %s2770_s22 }
 0x151   : > { %p2774_p0 = pneg %p2773_p13  ;;  %p2780_p1 = por %p2779_p7, %p2778_p5 }
 0x153   : > { %p2781_p9 = pnand %p2780_p1, %p2774_p0 }
 0x155   : > { %2784 = shalt.err (!%p2781_p9)
}
 0x156   : > { %p4096_p11 = scmp.ne.s32.totalorder %s4058_s14, 0  ;;  %s4097_s27 = scalar_lea.sflag [#allocation12], %s3182_s19 }
 0x157   : > { %s589_s0 = scalar_lea.vmem [#allocation16], %s3185_s20  ;;  %s4098_s30 = sld [smem:[#allocation54_spill]] }
 0x158   : > { %2323 = dma.hbm_to_vmem [thread:$0]  (!%p4096_p11), %s3574_s4, 16, %s563_s6, %s4097_s27  }
 0x159   : > { %s596_s12 = sshll.u32 %s589_s0, 4  ;;  %s2785_s17 = scalar_lea.hbm %s3600_s1, 16  ;;  %s597_s12 = int_to_ptr.vmem [resolvable:$true] %s596_s12 }
 0x15a   : > { %p2786_p1 = scmp.ne.s32.totalorder %s3600_s1, %s2785_s17  ;;  %s2790_s11 = scalar_lea.hbm %s4095_s5, 32 }
 0x15b   : > { %p2791_p3 = scmp.lt.u32.totalorder %s3600_s1, %s4095_s5  ;;  %p2792_p12 = scmp.lt.u32.totalorder %s2790_s11, %s2785_s17 }
 0x15c   : > { %p2788_p4 = pnand %p2786_p1, %p3212_p8  ;;  %p2794_p6 = scmp.lt.u32.totalorder %s2785_s17, %s3600_s1 }
 0x15d   : > { %s4099_s22 = smov %s4098_s30  ;;  %s3626_s16 = scalar_lea.hbm %s4098_s30, %s3188_s21 }
 0x15e   : > { %p2789_p2 = pneg %p2788_p4  ;;  %p2793_p10 = por %p2792_p12, %p2791_p3 }
 0x160   : > { %p2795_p13 = por %p2794_p6, %p2793_p10 }
 0x162   : > { %p2796_p0 = pnand %p2795_p13, %p2789_p2 }
 0x164   : > { %2799 = shalt.err (!%p2796_p0)
}
 0x165   : > { %s2800_s4 = scalar_lea.vmem %s597_s12, 16  ;;  %s3035_s6 = smov [#allocation16]  }
 0x166   : > { %p2801_p5 = scmp.ne.s32.totalorder %s597_s12, %s2800_s4  ;;  %s2805_s27 = sshll.u32 %s3035_s6, 4  ;;  %s2806_s27 = int_to_ptr.vmem [resolvable:$false] %s2805_s27 }
 0x167   : > { %s2807_s0 = scalar_lea.vmem %s2806_s27, 32  ;;  %p2808_p1 = scmp.lt.s32.totalorder %s597_s12, %s2806_s27 }
 0x168   : > { %p2803_p7 = pnand %p2801_p5, %p3212_p8  ;;  %p2809_p4 = scmp.lt.s32.totalorder %s2807_s0, %s2800_s4 }
 0x16a   : > { %p2804_p9 = pneg %p2803_p7  ;;  %p2810_p11 = por %p2809_p4, %p2808_p1 }
 0x16c   : > { %p2811_p3 = pnand %p2810_p11, %p2804_p9 }
 0x16e   : > { %2814 = shalt.err (!%p2811_p3)
}
 0x16f   : > { %p4100_p12 = scmp.ne.s32.totalorder %s4058_s14, 0  ;;  %s4101_s2 = scalar_lea.sflag [#allocation15], %s3182_s19 }
 0x170   : > { %s627_s7 = scalar_lea.vmem [#allocation19], %s3185_s20  ;;  %s4102_s26 = sld [smem:[#allocation56_spill]] }
 0x171   : > { %2329 = dma.hbm_to_vmem [thread:$0]  (!%p4100_p12), %s3600_s1, 16, %s597_s12, %s4101_s2  }
 0x172   : > { %s634_s9 = sshll.u32 %s627_s7, 4  ;;  %s2815_s10 = scalar_lea.hbm %s3626_s16, 16  ;;  %s635_s9 = int_to_ptr.vmem [resolvable:$true] %s634_s9 }
 0x173   : > { %p2816_p11 = scmp.ne.s32.totalorder %s3626_s16, %s2815_s10  ;;  %s2820_s27 = scalar_lea.hbm %s4099_s22, 32 }
 0x174   : > { %p2821_p6 = scmp.lt.u32.totalorder %s3626_s16, %s4099_s22  ;;  %p2822_p13 = scmp.lt.u32.totalorder %s2820_s27, %s2815_s10 }
 0x175   : > { %p2818_p2 = pnand %p2816_p11, %p3212_p8  ;;  %p2824_p5 = scmp.lt.u32.totalorder %s2815_s10, %s3626_s16 }
 0x176   : > { %s4103_s11 = smov %s4102_s26  ;;  %s3652_s25 = scalar_lea.hbm %s4102_s26, %s3188_s21 }
 0x177   : > { %p2819_p10 = pneg %p2818_p2  ;;  %p2823_p0 = por %p2822_p13, %p2821_p6 }
 0x179   : > { %p2825_p7 = por %p2824_p5, %p2823_p0 }
 0x17b   : > { %p2826_p9 = pnand %p2825_p7, %p2819_p10 }
 0x17d   : > { %2829 = shalt.err (!%p2826_p9)
}
 0x17e   : > { %s2830_s21 = scalar_lea.vmem %s635_s9, 16  ;;  %s3036_s1 = smov [#allocation19]  }
 0x17f   : > { %p2831_p1 = scmp.ne.s32.totalorder %s635_s9, %s2830_s21  ;;  %s2835_s12 = sshll.u32 %s3036_s1, 4  ;;  %s2836_s12 = int_to_ptr.vmem [resolvable:$false] %s2835_s12 }
 0x180   : > { %s2837_s2 = scalar_lea.vmem %s2836_s12, 32  ;;  %p2838_p11 = scmp.lt.s32.totalorder %s635_s9, %s2836_s12 }
 0x181   : > { %p2833_p4 = pnand %p2831_p1, %p3212_p8  ;;  %p2839_p2 = scmp.lt.s32.totalorder %s2837_s2, %s2830_s21 }
 0x183   : > { %p2834_p3 = pneg %p2833_p4  ;;  %p2840_p12 = por %p2839_p2, %p2838_p11 }
 0x185   : > { %p2841_p6 = pnand %p2840_p12, %p2834_p3 }
 0x187   : > { %2844 = shalt.err (!%p2841_p6)
}
 0x188   : > { %p4104_p13 = scmp.ne.s32.totalorder %s4058_s14, 0  ;;  %s4105_s5 = scalar_lea.sflag [#allocation18], %s3182_s19 }
 0x189   : > { %s665_s7 = scalar_lea.vmem [#allocation22], %s3185_s20  ;;  %s2845_s17 = scalar_lea.hbm %s3652_s25, 16 }
 0x18a   : > { %2335 = dma.hbm_to_vmem [thread:$0]  (!%p4104_p13), %s3626_s16, 16, %s635_s9, %s4105_s5  }
 0x18b   : > { %s672_s30 = sshll.u32 %s665_s7, 4  ;;  %p2846_p10 = scmp.ne.s32.totalorder %s3652_s25, %s2845_s17  ;;  %s673_s30 = int_to_ptr.vmem [resolvable:$true] %s672_s30 }
 0x18c   : > { %s2850_s4 = scalar_lea.hbm %s4103_s11, 32  ;;  %p2851_p5 = scmp.lt.u32.totalorder %s3652_s25, %s4103_s11 }
 0x18d   : > { %p2848_p12 = pnand %p2846_p10, %p3212_p8  ;;  %p2852_p7 = scmp.lt.u32.totalorder %s2850_s4, %s2845_s17 }
 0x18e   : > { %p2854_p1 = scmp.lt.u32.totalorder %s2845_s17, %s3652_s25 }
 0x18f   : > { %p2849_p0 = pneg %p2848_p12  ;;  %p2853_p9 = por %p2852_p7, %p2851_p5 }
 0x191   : > { %p2855_p4 = por %p2854_p1, %p2853_p9 }
 0x193   : > { %p2856_p3 = pnand %p2855_p4, %p2849_p0 }
 0x195   : > { %2859 = shalt.err (!%p2856_p3)
}
 0x196   : > { %s2860_s20 = scalar_lea.vmem %s673_s30, 16  ;;  %s3037_s16 = smov [#allocation22]  }
 0x197   : > { %p2861_p11 = scmp.ne.s32.totalorder %s673_s30, %s2860_s20  ;;  %s2865_s9 = sshll.u32 %s3037_s16, 4  ;;  %s2866_s9 = int_to_ptr.vmem [resolvable:$false] %s2865_s9 }
 0x198   : > { %s2867_s0 = scalar_lea.vmem %s2866_s9, 32  ;;  %p2868_p10 = scmp.lt.s32.totalorder %s673_s30, %s2866_s9 }
 0x199   : > { %p2863_p2 = pnand %p2861_p11, %p3212_p8  ;;  %p2869_p12 = scmp.lt.s32.totalorder %s2867_s0, %s2860_s20 }
 0x19b   : > { %p2864_p6 = pneg %p2863_p2  ;;  %p2870_p13 = por %p2869_p12, %p2868_p10 }
 0x19d   : > { %p2871_p5 = pnand %p2870_p13, %p2864_p6 }
 0x19f   : > { %2874 = shalt.err (!%p2871_p5)
}
 0x1a0   : > { %p4106_p7 = scmp.ne.s32.totalorder %s4058_s14, 0  ;;  %s4107_s21 = scalar_lea.sflag [#allocation21], %s3182_s19 }
 0x1a1   : > { %s4108_s1 = sld [smem:[#allocation39_spill]] }
 0x1a2   : > { %2341 = dma.hbm_to_vmem [thread:$0]  (!%p4106_p7), %s3652_s25, 16, %s673_s30, %s4107_s21  }
 0x1a7   : > { %p4109_p0 = scmp.ne.s32.totalorder %s4108_s1, 0 }
 0x1a8   : > { %s3696_s23 = sand.u32 (!%p4109_p0), 1, %s2997_s29   ;;  %p4110_p8 = scmp.ne.s32.totalorder (!%p4109_p0), %s4077_s3, 0 }
 0x1a9   : > { %681 = sbr.rel (%p4109_p0) target bundleno = 3115 (0xc2b), region = 72  ;;  %s2100_s12 = sshll.u32 (!%p4109_p0), %s3696_s23, 3 }
 0x1aa   : > { %s684_s2 = scalar_lea.sflag (!%p4109_p0), [#allocation3], %s3696_s23  ;;  %s3702_s5 = scalar_lea.vmem (!%p4109_p0), [#allocation2], %s2100_s12 }
 0x1b0   : > { %2948 = dma.done.wait (%p4110_p8), %s684_s2, 128  }
 0x1b1   : > { %2950 = vsyncadd (%p4110_p8), %s684_s2, 4294967168  ;;  %s4111_s14 = sld [smem:[#allocation32_spill]]  ;;  %s3709_s19 = sand.u32 1, %s3425_s15  }
 0x1b2   : > { %s693_s7 = scalar_lea.sflag [#allocation6], %s3709_s19  ;;  %p4112_p13 = scmp.ne.s32.totalorder %s4080_s13, 0 }
 0x1b7   : > { %s3712_s25 = sand.u32 1, %s4111_s14  }
 0x1b8   : > { %s695_s30 = scalar_lea.vmem [#allocation5], %s3712_s25 }
 0x1b9   : > { %2952 = dma.done.wait (%p4112_p13), %s693_s7, 32  }
 0x1ba   : > { %2954 = vsyncadd (%p4112_p13), %s693_s7, 4294967264  ;;  %s3721_s3 = sshll.u32 %s3712_s25, 4  ;;  %s703_s15 = scalar_lea.vmem [#allocation7], %s3712_s25 }
 0x1bb   : > { %s709_s17 = scalar_lea.sflag [#allocation9], %s3709_s19  ;;  %s712_s26 = scalar_lea.vmem [#allocation8], %s3721_s3 }
 0x1bc   : > { %2956 = dma.done.wait (%p4112_p13), %s709_s17, 272  }
 0x1bd   : > { %2958 = vsyncadd (%p4112_p13), %s709_s17, 4294967024  ;;  %s720_s10 = scalar_lea.vmem [#allocation10], %s3712_s25  ;;  %s726_s4 = scalar_lea.sflag [#allocation12], %s3709_s19 }
 0x1be   : > { %s729_s6 = scalar_lea.vmem [#allocation11], %s3721_s3 }
 0x1bf   : > { %2960 = dma.done.wait (%p4112_p13), %s726_s4, 272  }
 0x1c0   : > { %2962 = vsyncadd (%p4112_p13), %s726_s4, 4294967024  ;;  %s737_s27 = scalar_lea.vmem [#allocation13], %s3712_s25  ;;  %s743_s20 = scalar_lea.sflag [#allocation15], %s3709_s19 }
 0x1c1   : > { %s745_s16 = scalar_lea.vmem [#allocation14], %s3712_s25 }
 0x1c2   : > { %2964 = dma.done.wait (%p4112_p13), %s743_s20, 32  }
 0x1c3   : > { %2966 = vsyncadd (%p4112_p13), %s743_s20, 4294967264  ;;  %s753_s9 = scalar_lea.vmem [#allocation16], %s3712_s25  ;;  %s759_s0 = scalar_lea.sflag [#allocation18], %s3709_s19 }
 0x1c4   : > { %s762_s21 = scalar_lea.vmem [#allocation17], %s3721_s3 }
 0x1c5   : > { %2968 = dma.done.wait (%p4112_p13), %s759_s0, 272  }
 0x1c6   : > { %2970 = vsyncadd (%p4112_p13), %s759_s0, 4294967024  ;;  %s2104_s1 = sshll.u32 %s3712_s25, 6  ;;  %s770_s2 = scalar_lea.vmem [#allocation19], %s3712_s25 }
 0x1c7   : > { %s776_s14 = scalar_lea.sflag [#allocation21], %s3709_s19  ;;  %s3754_s7 = scalar_lea.vmem [#allocation20], %s2104_s1 }
 0x1c8   : > { %2972 = dma.done.wait (%p4112_p13), %s776_s14, 1040  }
 0x1c9   : > { %2974 = vsyncadd (%p4112_p13), %s776_s14, 4294966256  ;;  %s787_s17 = scalar_lea.vmem [#allocation22], %s3712_s25  ;;  %s3763_s4 = scalar_lea.vmem [#allocation23], %s2100_s12 }
 0x1ca   : > { %s4113_s20 = sld [smem:[#allocation35_spill]] }
 0x1d0   : > { %p2106_p9 = scmp.ne.s32.totalorder %s4113_s20, 0 }
 0x1d1   : > { %v887_v0 = vld [vmem:[%s3702_s5] sm:$0x1f] (!%p2106_p9)  ;;  %vm888_vm0 = vcmask (!%p2106_p9), 258048  }
 0x1d2   : > { %886 = sbr.rel (%p2106_p9) target bundleno = 473 (0x1d9), region = 128  ;;  %889 = vst.msk [vmem:[%s3763_s4] sm:$0x1f] (!%p2106_p9), %vm888_vm0, %v887_v0 }
 0x1d9 PF: > { %v3769_v1 = vld [vmem:[%s3763_s4] sm:$0x1f]  ;;  %vm891_vm1 = vcmask 258048   ;;  %v3038_v9 = vmov 0.0   ;;  %vm3039_vm2 = vmmov 0   ;;  %vm946_vm3 = vcmask 261120  }
 0x1da   : > { %v892_v2 = vsel %vm891_vm1, %v3769_v1, 0.0  ;;  %v2449_v8 = vld [vmem:[%s712_s26] sm:$0xff]   ;;  %2182 = vmatprep.subr.bf16.mxu0 %v3038_v9  ;;  %2186 = vmatprep.mubr.msk.bf16.mxu0 %vm3039_vm2, %v3038_v9  ;;  %v2450_v10 = vld [vmem:[%s712_s26 + $0x8] sm:$0xff]   ;;  %s3040_s13 = smov 104   ;;  %s3041_s12 = smov 120   ;;  %vm1000_vm4 = vcmask 64512  }
 0x1db   : > { %893 = vadd.xlane.f32.xlu0 %v892_v2  ;;  %2183 = vmatpush3.bf16.msra.mxu0 %v2449_v8  ;;  %v2107_v15 = vld [vmem:[%s695_s30] ss:$0 sm:$0xff]  ;;  %s3042_s5 = smov 112   ;;  %s3043_s19 = smov 96   ;;  %vm1191_vm5 = vcmask 36864   ;;  %vm1246_vm6 = vcmask 1041408  }
 0x1dc   : > { %2202 = vmatprep.subr.bf16.mxu1 %v3038_v9  ;;  %2184 = vmatprep.subr.bf16.mxu0 %v3038_v9  ;;  %v2108_v17 = vld [vmem:[%s703_s15] ss:$0 sm:$0xff]  ;;  %s3044_s30 = smov 64   ;;  %vm1247_vm7 = vcmask 1042432   ;;  %vm1242_vm8 = vcmask 39936   ;;  %s3046_s15 = smov 8  }
 0x1dd   : > { %2204 = vmatprep.mubr.msk.bf16.mxu1 %vm3039_vm2, %v3038_v9  ;;  %v2109_v21 = vld [vmem:[%s720_s10] ss:$0 sm:$0xff]  ;;  %s3047_s26 = smov 16   ;;  %s3048_s10 = smov 24   ;;  %vm1453_vm9 = vcmask 130048   ;;  %vm1456_vm10 = vcmask 195584  }
 0x1de   : > { %s4114_s3 = sld [smem:[#allocation36_spill]]  ;;  %s4115_s0 = sld [smem:[#allocation57_spill]] }
 0x1df   : > { %2185 = vmatpush3.bf16.msra.mxu0 %v2450_v10  ;;  %s1745_s25 = scalar_lea.sflag [#allocation4], %s3696_s23  ;;  %p4116_p4 = scmp.ne.s32.totalorder %s4081_s24, 0 }
 0x1e0   : > { %2190 = vmatprep.subr.bf16.mxu0 %v3038_v9 }
 0x268   : > { %v894_v3 = vpop.xlane.xlu0 %893 }
 0x269   : > { %v896_v4 = vmul.f32 0.03125, %v894_v3 }
 0x26b   : > { %v897_v5 = vsub.f32 %v3769_v1, %v896_v4  ;;  %v3045_v4 = vmov 65535  }
 0x26d   : > { %v898_v6 = vmul.f32 %v897_v5, %v897_v5 }
 0x26f   : > { %v899_v7 = vsel %vm891_vm1, %v898_v6, 0.0 }
 0x270   : > { %900 = vadd.xlane.f32.xlu0 %v899_v7 }
 0x2fd   : > { %v901_v11 = vpop.xlane.xlu0 %900 }
 0x2fe   : > { %v902_v12 = vmul.f32 0.03125, %v901_v11 }
 0x300   : > { %v903_v13 = vadd.f32 1e-06, %v902_v12 }
 0x302   : > { %2463 = vrsqrt.f32 %v903_v13 }
 0x30c   : > { %v2464_v14 = vpop.eup %2463 }
 0x30d   : > { %v905_v16 = vmul.f32 %v2464_v14, %v897_v5  ;;  %v1248_v5 = vsel %vm1246_vm6, 4294967295, %v3045_v4 }
 0x30e   : > { %v1249_v8 = vsel %vm1247_vm7, %v1248_v5, 0 }
 0x30f   : > { %v913_v18 = vmul.f32 %v2107_v15, %v905_v16 }
 0x311   : > { %v921_v19 = vadd.f32 %v2108_v17, %v913_v18 }
 0x313   : > { %v922_v20 = vpack.c.bf16 %v921_v19, %v921_v19 }
 0x315   : > { %2187 = vmatmul.mubr.msk.bf16.vlgmr.msra.gmra.mrb[0].mxu0 %vm946_vm3, %v922_v20 }
 0x316   : > { %2192 = vmatprep.mubr.msk.bf16.mxu0 %vm3039_vm2, %v3038_v9 }
 0x3e8   : > { %v984_v22 = vpop.f32.mrb[0].mxu0 }
 0x3e9   : > { %v985_v23 = vadd.f32 %v2109_v21, %v984_v22  ;;  %v2188_v24 = vpop.f32.mrb[1].mxu0 }
 0x3ea   : > { %v987_v25 = vpop.f32.mrb[2].mxu0 }
 0x3eb   : > { %v3796_v26 = vpack.c.bf16 %v985_v23, %v985_v23  ;;  %v2189_v27 = vpop.f32.mrb[3].mxu0 }
 0x3ed   : > { %996 = vrot.lane.b32.xlu0 %v3796_v26, %s3040_s13  ;;  %992 = vrot.lane.b32.xlu1 %v3796_v26, %s3041_s12 }
 0x3f1   : > { %994 = vrot.lane.b32.xlu1 %v3796_v26, %s3042_s5 }
 0x3f5   : > { %998 = vrot.lane.b32.xlu1 %v3796_v26, %s3043_s19 }
 0x45f   : > { %v3802_v28 = vpop.permute.xlu1 %992  ;;  %v3808_v30 = vpop.permute.xlu0 %996 }
 0x460   : > { %1047 = vrot.lane.b32.xlu1 %v3802_v28, %s3043_s19 }
 0x463   : > { %v3805_v29 = vpop.permute.xlu1 %994 }
 0x464   : > { %1095 = vrot.lane.b32.xlu1 %v3805_v29, %s3043_s19 }
 0x467   : > { %v999_v31 = vpop.permute.xlu1 %998 }
 0x468   : > { %v1005_v32 = vsel %vm1000_vm4, %v999_v31, 0  ;;  %1143 = vrot.lane.b32.xlu1 %v3808_v30, %s3043_s19 }
 0x469   : > { %2191 = vmatpush3.bf16.xpose.msra.mxu0 %v1005_v32 }
 0x46a   : > { %2196 = vmatprep.subr.bf16.mxu0 %v3038_v9 }
 0x470   : > { %2193 = vmatmul.mubr.msk.bf16.vlgmr.msra.gmra.mrb[4].mxu0 %vm1000_vm4, %v3796_v26 }
 0x471   : > { %2198 = vmatprep.mubr.msk.bf16.mxu0 %vm3039_vm2, %v3038_v9 }
 0x4d2   : > { %v1048_v33 = vpop.permute.xlu1 %1047 }
 0x4d3   : > { %v1053_v34 = vsel %vm1000_vm4, %v1048_v33, 0 }
 0x4d4   : > { %2197 = vmatpush3.bf16.xpose.msra.mxu0 %v1053_v34 }
 0x4d5   : > { %2208 = vmatprep.subr.bf16.mxu0 %v3038_v9 }
 0x4d6   : > { %v1096_v35 = vpop.permute.xlu1 %1095 }
 0x4d7   : > { %v1101_v36 = vsel %vm1000_vm4, %v1096_v35, 0 }
 0x4d8   : > { %2203 = vmatpush3.bf16.xpose.msra.mxu1 %v1101_v36 }
 0x4d9   : > { %2214 = vmatprep.subr.bf16.mxu1 %v3038_v9 }
 0x4da   : > { %v1144_v37 = vpop.permute.xlu1 %1143 }
 0x4db   : > { %v1149_v38 = vsel %vm1000_vm4, %v1144_v37, 0  ;;  %2199 = vmatmul.mubr.msk.bf16.vlgmr.msra.gmra.mrb[8].mxu0 %vm1000_vm4, %v3802_v28 }
 0x4dc   : > { %2209 = vmatpush3.bf16.xpose.msra.mxu0 %v1149_v38  ;;  %2210 = vmatprep.mubr.msk.bf16.mxu0 %vm3039_vm2, %v3038_v9 }
 0x4dd   : > { %2220 = vmatprep.subr.bf16.mxu0 %v3038_v9 }
 0x4df   : > { %2205 = vmatmul.mubr.msk.bf16.vlgmr.msra.gmra.mrb[0].mxu1 %vm1000_vm4, %v3805_v29 }
 0x4e0   : > { %2216 = vmatprep.mubr.msk.bf16.mxu1 %vm3039_vm2, %v3038_v9 }
 0x4e3   : > { %2211 = vmatmul.mubr.msk.bf16.vlgmr.msra.gmra.mrb[12].mxu0 %vm1000_vm4, %v3808_v30 }
 0x4e4   : > { %2222 = vmatprep.mubr.msk.bf16.mxu0 %vm3039_vm2, %v3038_v9 }
 0x543   : > { %v1041_v39 = vpop.f32.mrb[4].mxu0 }
 0x544   : > { %v2194_v40 = vpop.f32.mrb[5].mxu0  ;;  %v1192_v41 = vsel %vm1191_vm5, %v1041_v39, -inf }
 0x545   : > { %1193 = vmax.xlane.f32.xlu1 %v1192_v41  ;;  %v1044_v42 = vpop.f32.mrb[6].mxu0 }
 0x546   : > { %v2195_v43 = vpop.f32.mrb[7].mxu0 }
 0x5ae   : > { %v1089_v44 = vpop.f32.mrb[8].mxu0 }
 0x5af   : > { %v2200_v45 = vpop.f32.mrb[9].mxu0  ;;  %v1195_v46 = vsel %vm1191_vm5, %v1089_v44, -inf }
 0x5b0   : > { %1196 = vmax.xlane.f32.xlu0 %v1195_v46  ;;  %v1092_v47 = vpop.f32.mrb[10].mxu0 }
 0x5b1   : > { %v2201_v48 = vpop.f32.mrb[11].mxu0 }
 0x5b2   : > { %v1137_v49 = vpop.f32.mrb[0].mxu1  ;;  %v2451_v48 = vld [vmem:[%s729_s6] sm:$0xff]  }
 0x5b3   : > { %v2206_v50 = vpop.f32.mrb[1].mxu1  ;;  %v1198_v51 = vsel %vm1191_vm5, %v1137_v49, -inf }
 0x5b4   : > { %v1140_v52 = vpop.f32.mrb[2].mxu1  ;;  %1199 = vmax.xlane.f32.xlu1 %v1198_v51 }
 0x5b5   : > { %v2207_v53 = vpop.f32.mrb[3].mxu1 }
 0x5b6   : > { %v1185_v54 = vpop.f32.mrb[12].mxu0 }
 0x5b7   : > { %v2212_v55 = vpop.f32.mrb[13].mxu0  ;;  %v1201_v56 = vsel %vm1191_vm5, %v1185_v54, -inf }
 0x5b8   : > { %1202 = vmax.xlane.f32.xlu0 %v1201_v56  ;;  %v1188_v57 = vpop.f32.mrb[14].mxu0 }
 0x5b9   : > { %v2213_v58 = vpop.f32.mrb[15].mxu0 }
 0x5c5   : > { %1240 = vrot.lane.b32.xlu1 %v3796_v26, %s3044_s30 }
 0x5d2   : > { %v1194_v59 = vpop.xlane.xlu1 %1193 }
 0x5d3   : > { %v1204_v60 = vsub.f32 %v1041_v39, %v1194_v59 }
 0x5d5   : > { %v1208_v61 = vmul.f32 1.442695, %v1204_v60 }
 0x5d7   : > { %2465 = vpow2.f32 %v1208_v61 }
 0x5e1   : > { %v2466_v62 = vpop.eup %2465 }
 0x5e2   : > { %v1216_v63 = vsel %vm1191_vm5, %v2466_v62, 0.0 }
 0x5e9   : > { %1217 = vadd.xlane.f32.xlu1 %v1216_v63 }
 0x63d   : > { %v1197_v0 = vpop.xlane.xlu0 %1196 }
 0x63e   : > { %v1205_v2 = vsub.f32 %v1089_v44, %v1197_v0 }
 0x640   : > { %v1210_v3 = vmul.f32 1.442695, %v1205_v2 }
 0x641   : > { %v1200_v6 = vpop.xlane.xlu1 %1199 }
 0x642   : > { %2467 = vpow2.f32 %v1210_v3  ;;  %v1206_v7 = vsub.f32 %v1137_v49, %v1200_v6  ;;  %v2452_v49 = vld [vmem:[%s729_s6 + $0x8] sm:$0xff]   ;;  %s2141_s6 = sshll.u32 %s4114_s3, 7 }
 0x644   : > { %v1212_v10 = vmul.f32 1.442695, %v1206_v7 }
 0x645   : > { %v1241_v11 = vpop.permute.xlu1 %1240  ;;  %v1203_v12 = vpop.xlane.xlu0 %1202 }
 0x646   : > { %2469 = vpow2.f32 %v1212_v10  ;;  %v1251_v13 = vand.u32 %v1249_v8, %v1241_v11  ;;  %v1207_v14 = vsub.f32 %v1185_v54, %v1203_v12  ;;  %v2121_v10 = vld [vmem:[%s737_s27] ss:$0 sm:$0xff]  ;;  %s1758_s27 = sshll.u32 %s3763_s4, 4  ;;  %s3923_s27 = int_to_ptr.vmem [resolvable:$true] %s1758_s27 }
 0x647   : > { %s2875_s1 = scalar_lea.vmem %s3923_s27, 128 }
 0x648   : > { %v1214_v15 = vmul.f32 1.442695, %v1207_v14  ;;  %2215 = vmatpush3.bf16.msra.mxu1 %v1251_v13  ;;  %p2876_p1 = scmp.ne.s32.totalorder %s3923_s27, %s2875_s1 }
 0x649   : > { %2226 = vmatprep.subr.bf16.mxu1 %v3038_v9 }
 0x64a   : > { %2471 = vpow2.f32 %v1214_v15  ;;  %p2877_p3 = pnand %p2876_p1, %p4116_p4 }
 0x64c   : > { %v2468_v16 = vpop.eup %2467  ;;  %p2878_p11 = pneg %p2877_p3 }
 0x64d   : > { %v1219_v17 = vsel %vm1191_vm5, %v2468_v16, 0.0 }
 0x64e   : > { %1220 = vadd.xlane.f32.xlu0 %v1219_v17 }
 0x650   : > { %v2470_v18 = vpop.eup %2469 }
 0x651   : > { %v1222_v19 = vsel %vm1191_vm5, %v2470_v18, 0.0 }
 0x652   : > { %1223 = vadd.xlane.f32.xlu1 %v1222_v19 }
 0x654   : > { %v2472_v20 = vpop.eup %2471 }
 0x655   : > { %v1225_v21 = vsel %vm1191_vm5, %v2472_v20, 0.0 }
 0x656   : > { %1226 = vadd.xlane.f32.xlu0 %v1225_v21 }
 0x663   : > { %1341 = vrot.lane.b32.xlu1 %v3805_v29, %s3044_s30 }
 0x667   : > { %1389 = vrot.lane.b32.xlu1 %v3808_v30, %s3044_s30 }
 0x66c   : > { %1293 = vrot.lane.b32.xlu0 %v3802_v28, %s3044_s30 }
 0x676   : > { %v1218_v22 = vpop.xlane.xlu1 %1217 }
 0x677   : > { %2473 = vrcp.f32 %v1218_v22 }
 0x681   : > { %v2474_v23 = vpop.eup %2473 }
 0x682   : > { %v1232_v24 = vmul.f32 %v2474_v23, %v2466_v62  ;;  %v2453_v23 = vld [vmem:[%s762_s21] sm:$0xff]  }
 0x684   : > { %v1236_v25 = vpack.c.bf16 %v1232_v24, %v1232_v24 }
 0x686   : > { %2217 = vmatmul.mubr.msk.bf16.vlgmr.msra.gmra.mrb[4].mxu1 %vm1242_vm8, %v1236_v25 }
 0x687   : > { %2228 = vmatprep.mubr.msk.bf16.mxu1 %vm3039_vm2, %v3038_v9 }
 0x6db   : > { %v1221_v26 = vpop.xlane.xlu0 %1220 }
 0x6dc   : > { %2475 = vrcp.f32 %v1221_v26 }
 0x6df   : > { %v1224_v27 = vpop.xlane.xlu1 %1223 }
 0x6e0   : > { %2477 = vrcp.f32 %v1224_v27 }
 0x6e3   : > { %v1342_v29 = vpop.permute.xlu1 %1341  ;;  %v1227_v30 = vpop.xlane.xlu0 %1226 }
 0x6e4   : > { %v1347_v31 = vand.u32 %v1342_v29, %v1249_v8  ;;  %2479 = vrcp.f32 %v1227_v30  ;;  %v2125_v29 = vld [vmem:[%s745_s16] ss:$0 sm:$0xff] }
 0x6e6   : > { %v2476_v28 = vpop.eup %2475  ;;  %2227 = vmatpush3.bf16.msra.mxu1 %v1347_v31  ;;  %v2126_v31 = vld [vmem:[%s753_s9] ss:$0 sm:$0xff] }
 0x6e7   : > { %v1233_v32 = vmul.f32 %v2476_v28, %v2468_v16  ;;  %v1294_v33 = vpop.permute.xlu0 %1293  ;;  %2238 = vmatprep.subr.bf16.mxu1 %v3038_v9  ;;  %v1390_v35 = vpop.permute.xlu1 %1389 }
 0x6e8   : > { %v1299_v34 = vand.u32 %v1294_v33, %v1249_v8  ;;  %v1395_v39 = vand.u32 %v1390_v35, %v1249_v8  ;;  %v2456_v35 = vld [vmem:[%s3754_s7 + $0x8] sm:$0xff]  }
 0x6e9   : > { %v1237_v38 = vpack.c.bf16 %v1233_v32, %v1233_v32 }
 0x6ea   : > { %v2478_v36 = vpop.eup %2477  ;;  %2221 = vmatpush3.bf16.msra.mxu0 %v1299_v34  ;;  %v2455_v34 = vld [vmem:[%s3754_s7] sm:$0xff]  }
 0x6eb   : > { %v1234_v37 = vmul.f32 %v2478_v36, %v2470_v18  ;;  %2232 = vmatprep.subr.bf16.mxu0 %v3038_v9  ;;  %v2457_v36 = vld [vmem:[%s3754_s7 + $0x10] sm:$0xff]  }
 0x6ed   : > { %2223 = vmatmul.mubr.msk.bf16.vlgmr.msra.gmra.mrb[16].mxu0 %vm1242_vm8, %v1237_v38  ;;  %v1238_v40 = vpack.c.bf16 %v1234_v37, %v1234_v37  ;;  %v2458_v37 = vld [vmem:[%s3754_s7 + $0x18] sm:$0xff]   ;;  %v2459_v38 = vld [vmem:[%s3754_s7 + $0x20] sm:$0xff]  }
 0x6ee   : > { %v2480_v41 = vpop.eup %2479  ;;  %2233 = vmatpush3.bf16.msra.mxu0 %v1395_v39  ;;  %2234 = vmatprep.mubr.msk.bf16.mxu0 %vm3039_vm2, %v3038_v9  ;;  %v2460_v39 = vld [vmem:[%s3754_s7 + $0x28] sm:$0xff]  }
 0x6ef   : > { %v1235_v42 = vmul.f32 %v2480_v41, %v2472_v20  ;;  %2229 = vmatmul.mubr.msk.bf16.vlgmr.msra.gmra.mrb[8].mxu1 %vm1242_vm8, %v1238_v40  ;;  %2246 = vmatprep.subr.bf16.mxu0 %v3038_v9  ;;  %v2461_v40 = vld [vmem:[%s3754_s7 + $0x30] sm:$0xff]   ;;  %v2462_v41 = vld [vmem:[%s3754_s7 + $0x38] sm:$0xff]  }
 0x6f0   : > { %2242 = vmatprep.mubr.msk.bf16.mxu1 %vm3039_vm2, %v3038_v9  ;;  %2239 = vmatpush3.bf16.msra.mxu1 %v2451_v48 }
 0x6f1   : > { %v1239_v43 = vpack.c.bf16 %v1235_v42, %v1235_v42  ;;  %2240 = vmatprep.subr.bf16.mxu1 %v3038_v9  ;;  %v2127_v42 = vld [vmem:[%s770_s2] ss:$0 sm:$0xff]  ;;  %s3049_s2 = smov [#allocation23]  }
 0x6f2   : > { %s2879_s14 = sshll.u32 %s3049_s2, 4  ;;  %s2880_s14 = int_to_ptr.vmem [resolvable:$false] %s2879_s14 }
 0x6f3   : > { %s2881_s7 = scalar_lea.vmem %s2880_s14, 256  ;;  %p2882_p2 = scmp.lt.s32.totalorder %s3923_s27, %s2880_s14 }
 0x6f4   : > { %2241 = vmatpush3.bf16.msra.mxu1 %v2452_v49  ;;  %p2883_p6 = scmp.lt.s32.totalorder %s2881_s7, %s2875_s1 }
 0x6f5   : > { %2235 = vmatmul.mubr.msk.bf16.vlgmr.msra.gmra.mrb[20].mxu0 %vm1242_vm8, %v1239_v43  ;;  %2254 = vmatprep.subr.bf16.mxu1 %v3038_v9 }
 0x6f6   : > { %2250 = vmatprep.mubr.msk.bf16.mxu0 %vm3039_vm2, %v3038_v9  ;;  %2247 = vmatpush3.bf16.msra.mxu0 %v2453_v23  ;;  %p2884_p10 = por %p2883_p6, %p2882_p2 }
 0x6f7   : > { %2248 = vmatprep.subr.bf16.mxu0 %v3038_v9 }
 0x6f8   : > { %p2885_p12 = pnand %p2884_p10, %p2878_p11 }
 0x759   : > { %v1287_v44 = vpop.f32.mrb[4].mxu1 }
 0x75a   : > { %v2218_v45 = vpop.f32.mrb[5].mxu1  ;;  %v1437_v3 = vpack.c.bf16 %v1287_v44, %v1287_v44 }
 0x75b   : > { %v1290_v46 = vpop.f32.mrb[6].mxu1 }
 0x75c   : > { %v2219_v47 = vpop.f32.mrb[7].mxu1 }
 0x7c0   : > { %v1335_v50 = vpop.f32.mrb[16].mxu0 }
 0x7c1   : > { %v1438_v51 = vpack.c.bf16 %v1335_v50, %v1335_v50  ;;  %v2224_v52 = vpop.f32.mrb[17].mxu0 }
 0x7c2   : > { %v1338_v53 = vpop.f32.mrb[18].mxu0  ;;  %v1383_v54 = vpop.f32.mrb[8].mxu1 }
 0x7c3   : > { %v1439_v55 = vpack.c.bf16 %v1383_v54, %v1383_v54  ;;  %v2230_v56 = vpop.f32.mrb[9].mxu1  ;;  %1442 = vrot.lane.b32.xlu0 %v1438_v51, %s3046_s15  ;;  %v2225_v57 = vpop.f32.mrb[19].mxu0 }
 0x7c4   : > { %v1386_v58 = vpop.f32.mrb[10].mxu1  ;;  %v2131_v57 = vld [vmem:[%s787_s17] ss:$0 sm:$0xff] }
 0x7c5   : > { %1445 = vrot.lane.b32.xlu1 %v1439_v55, %s3047_s26  ;;  %v2231_v59 = vpop.f32.mrb[11].mxu1 }
 0x7c8   : > { %v1431_v60 = vpop.f32.mrb[20].mxu0 }
 0x7c9   : > { %v1440_v61 = vpack.c.bf16 %v1431_v60, %v1431_v60  ;;  %v2236_v62 = vpop.f32.mrb[21].mxu0 }
 0x7ca   : > { %v1434_v63 = vpop.f32.mrb[22].mxu0 }
 0x7cb   : > { %1448 = vrot.lane.b32.xlu0 %v1440_v61, %s3048_s10  ;;  %v2237_v0 = vpop.f32.mrb[23].mxu0 }
 0x835   : > { %v1443_v2 = vpop.permute.xlu0 %1442 }
 0x836   : > { %v1452_v4 = vsel %vm1000_vm4, %v1437_v3, %v1443_v2 }
 0x837   : > { %v1446_v5 = vpop.permute.xlu1 %1445 }
 0x838   : > { %v1455_v6 = vsel %vm1453_vm9, %v1452_v4, %v1446_v5 }
 0x83d   : > { %v1449_v7 = vpop.permute.xlu0 %1448 }
 0x83e   : > { %v1458_v8 = vsel %vm1456_vm10, %v1455_v6, %v1449_v7 }
 0x83f   : > { %2243 = vmatmul.mubr.msk.bf16.vlgmr.msra.gmra.mrb[12].mxu1 %vm946_vm3, %v1458_v8 }
 0x840   : > { %2270 = vmatprep.mubr.msk.bf16.mxu1 %vm3039_vm2, %v3038_v9  ;;  %2255 = vmatpush3.bf16.msra.mxu1 %v2455_v34 }
 0x841   : > { %2256 = vmatprep.subr.bf16.mxu1 %v3038_v9 }
 0x844   : > { %2257 = vmatpush3.bf16.msra.mxu1 %v2456_v35 }
 0x845   : > { %2258 = vmatprep.subr.bf16.mxu1 %v3038_v9 }
 0x848   : > { %2259 = vmatpush3.bf16.msra.mxu1 %v2457_v36 }
 0x849   : > { %2260 = vmatprep.subr.bf16.mxu1 %v3038_v9 }
 0x84c   : > { %2261 = vmatpush3.bf16.msra.mxu1 %v2458_v37 }
 0x84d   : > { %2262 = vmatprep.subr.bf16.mxu1 %v3038_v9 }
 0x850   : > { %2263 = vmatpush3.bf16.msra.mxu1 %v2459_v38 }
 0x851   : > { %2264 = vmatprep.subr.bf16.mxu1 %v3038_v9 }
 0x854   : > { %2265 = vmatpush3.bf16.msra.mxu1 %v2460_v39 }
 0x855   : > { %2266 = vmatprep.subr.bf16.mxu1 %v3038_v9 }
 0x858   : > { %2267 = vmatpush3.bf16.msra.mxu1 %v2461_v40 }
 0x859   : > { %2268 = vmatprep.subr.bf16.mxu1 %v3038_v9 }
 0x85c   : > { %2269 = vmatpush3.bf16.msra.mxu1 %v2462_v41 }
 0x912   : > { %v1518_v11 = vpop.f32.mrb[12].mxu1 }
 0x913   : > { %v1519_v12 = vadd.f32 %v2121_v10, %v1518_v11  ;;  %v2244_v13 = vpop.f32.mrb[13].mxu1 }
 0x914   : > { %v1521_v14 = vpop.f32.mrb[14].mxu1 }
 0x915   : > { %v3880_v15 = vadd.f32 %v1519_v12, %v3769_v1  ;;  %v2245_v16 = vpop.f32.mrb[15].mxu1  ;;  %v2454_v1 = vld [vmem:[%s762_s21 + $0x8] sm:$0xff]   ;;  %s3921_s21 = scalar_lea.hbm %s4115_s0, %s2141_s6 }
 0x916   : > { %2249 = vmatpush3.bf16.msra.mxu0 %v2454_v1 }
 0x917   : > { %v1525_v17 = vsel %vm891_vm1, %v3880_v15, 0.0 }
 0x918   : > { %1526 = vadd.xlane.f32.xlu1 %v1525_v17 }
 0x9a5   : > { %v1527_v18 = vpop.xlane.xlu1 %1526 }
 0x9a6   : > { %v1528_v19 = vmul.f32 0.03125, %v1527_v18 }
 0x9a8   : > { %v1529_v20 = vsub.f32 %v3880_v15, %v1528_v19 }
 0x9aa   : > { %v1530_v21 = vmul.f32 %v1529_v20, %v1529_v20 }
 0x9ac   : > { %v1531_v22 = vsel %vm891_vm1, %v1530_v21, 0.0 }
 0x9ad   : > { %1532 = vadd.xlane.f32.xlu0 %v1531_v22 }
 0xa3a   : > { %v1533_v24 = vpop.xlane.xlu0 %1532 }
 0xa3b   : > { %v1534_v25 = vmul.f32 0.03125, %v1533_v24 }
 0xa3d   : > { %v1535_v26 = vadd.f32 1e-06, %v1534_v25 }
 0xa3f   : > { %2481 = vrsqrt.f32 %v1535_v26 }
 0xa49   : > { %v2482_v27 = vpop.eup %2481 }
 0xa4a   : > { %v1537_v30 = vmul.f32 %v2482_v27, %v1529_v20 }
 0xa4c   : > { %v1545_v28 = vmul.f32 %v2125_v29, %v1537_v30 }
 0xa4e   : > { %v1553_v32 = vadd.f32 %v2126_v31, %v1545_v28 }
 0xa50   : > { %v1554_v33 = vpack.c.bf16 %v1553_v32, %v1553_v32 }
 0xa52   : > { %2251 = vmatmul.mubr.msk.bf16.vlgmr.msra.gmra.mrb[24].mxu0 %vm946_vm3, %v1554_v33 }
 0xb25   : > { %v1615_v43 = vpop.f32.mrb[24].mxu0 }
 0xb26   : > { %v1616_v44 = vadd.f32 %v2127_v42, %v1615_v43  ;;  %v2252_v45 = vpop.f32.mrb[25].mxu0 }
 0xb27   : > { %v1618_v46 = vpop.f32.mrb[26].mxu0 }
 0xb28   : > { %v1621_v47 = vmul.f32 %v1616_v44, %v1616_v44  ;;  %v2253_v48 = vpop.f32.mrb[27].mxu0 }
 0xb2a   : > { %v1622_v49 = vmul.f32 %v1621_v47, %v1616_v44 }
 0xb2c   : > { %v1623_v50 = vmul.f32 0.044715, %v1622_v49 }
 0xb2e   : > { %v1624_v51 = vadd.f32 %v1623_v50, %v1616_v44 }
 0xb30   : > { %v1625_v52 = vmul.f32 0.7978846, %v1624_v51 }
 0xb32   : > { %2483 = vtanh.f32 %v1625_v52 }
 0xb3c   : > { %v2484_v53 = vpop.eup %2483 }
 0xb3d   : > { %v1627_v54 = vadd.f32 1.0, %v2484_v53 }
 0xb3f   : > { %v1628_v9 = vmul.f32 0.5, %v1627_v54 }
 0xb41   : > { %v1629_v55 = vmul.f32 %v1628_v9, %v1616_v44 }
 0xb43   : > { %v1630_v56 = vpack.c.bf16 %v1629_v55, %v1629_v55 }
 0xb45   : > { %2271 = vmatmul.mubr.bf16.vlgmr.msra.gmra.mrb[16].mxu1 %v1630_v56 }
 0xc18   : > { %v1736_v58 = vpop.f32.mrb[16].mxu1 }
 0xc19   : > { %v1737_v59 = vadd.f32 %v2131_v57, %v1736_v58  ;;  %v2272_v60 = vpop.f32.mrb[17].mxu1 }
 0xc1a   : > { %v1739_v61 = vpop.f32.mrb[18].mxu1 }
 0xc1b   : > { %v1742_v62 = vadd.f32 %v1737_v59, %v3880_v15  ;;  %v2273_v63 = vpop.f32.mrb[19].mxu1 }
 0xc1d   : > { %1743 = vst.msk [vmem:[%s3763_s4] sm:$0x1f] %vm891_vm1, %v1742_v62 }
 0xc1e   : > { %2888 = shalt.err (!%p2885_p12)
}
 0xc1f   : > { %s2889_s23 = scalar_lea.hbm %s3921_s21, 128  ;;  %s2893_s20 = scalar_lea.hbm %s4115_s0, 256 }
 0xc20   : > { %p2890_p5 = scmp.ne.s32.totalorder %s3921_s21, %s2889_s23  ;;  %p2894_p8 = scmp.lt.u32.totalorder %s3921_s21, %s4115_s0 }
 0xc21   : > { %p2895_p13 = scmp.lt.u32.totalorder %s2893_s20, %s2889_s23  ;;  %p2897_p1 = scmp.lt.u32.totalorder %s2889_s23, %s3921_s21 }
 0xc22   : > { %p2891_p7 = pnand %p2890_p5, %p4116_p4 }
 0xc23   : > { %p2896_p9 = por %p2895_p13, %p2894_p8 }
 0xc24   : > { %p2892_p0 = pneg %p2891_p7 }
 0xc25   : > { %p2898_p3 = por %p2897_p1, %p2896_p9 }
 0xc27   : > { %p2899_p11 = pnand %p2898_p3, %p2892_p0 }
 0xc29   : > { %2902 = shalt.err (!%p2899_p11)
}
 0xc2a   : > { %2300 = dma.vmem_to_hbm [thread:$0]  (%p4116_p4), %s3923_s27, 128, %s3921_s21, %s1745_s25  }
 0xc2b PF: > { %p2347_p2 = scmp.ge.s32.totalorder %s3021_s18, 2  ;;  %s1770_s5 = sand.u32 1, %s2993_s28  }
 0xc2c   : > { %p4117_p6 = scmp.ne.s32.totalorder %s4082_s8, 0  ;;  %s1771_s19 = scalar_lea.sflag [#allocation4], %s1770_s5 }
 0xc2e   : > { %p2343_p10 = pnand %p2347_p2, %p4117_p6 }
 0xc30   : > { %2976 = dma.done.wait (!%p2343_p10), %s1771_s19, 128  }
 0xc31   : > { %2978 = vsyncadd (!%p2343_p10), %s1771_s19, 4294967168  ;;  %s47_s18 = sadd.s32 1, %s3021_s18   ;;  %s4118_s25 = sld [smem:[#allocation32_spill]] }
 0xc32   : > { %p44_p12 = scmp.ge.s32.totalorder %s47_s18, 6   ;;  %s4119_s26 = sld [smem:[#allocation33_spill]] }
 0xc33   : > { %s4120_s27 = sld [smem:[#allocation42_spill]]  ;;  %s4121_s24 = sld [smem:[#allocation34_spill]] }
 0xc34   : > { %s4122_s30 = sld [smem:[#allocation43_spill]]  ;;  %s4123_s14 = sld [smem:[#allocation37_spill]] }
 0xc35   : > { %s4124_s15 = sld [smem:[#allocation38_spill]]  ;;  %s4125_s16 = sld [smem:[#allocation40_spill]] }
 0xc36   : > { %s4126_s17 = sld [smem:[#allocation41_spill]]  ;;  %s4127_s28 = smov %s2997_s29 }
 0xc37   :  { %46 = sbr.rel (!%p44_p12) target bundleno = 36 (0x24), region = 265 }
 0xc39   : > { %s4128_s29 = smov %s4121_s24 }
 0xc3e   :  { %1776 = vsyncpa [#allocation3], 1 }
 0xc3f   :  { %1778 = vsyncpa [#allocation3 + $0x1], 1 }
 0xc40   :  { %1779 = vsyncpa [#allocation6], 1 }
 0xc41   :  { %1781 = vsyncpa [#allocation6 + $0x1], 1 }
 0xc42   :  { %1782 = vsyncpa [#allocation9], 1 }
 0xc43   :  { %1784 = vsyncpa [#allocation9 + $0x1], 1 }
 0xc44   :  { %1785 = vsyncpa [#allocation12], 1 }
 0xc45   :  { %1787 = vsyncpa [#allocation12 + $0x1], 1 }
 0xc46   :  { %1788 = vsyncpa [#allocation15], 1 }
 0xc47   :  { %1790 = vsyncpa [#allocation15 + $0x1], 1 }
 0xc48   :  { %1791 = vsyncpa [#allocation18], 1 }
 0xc49   :  { %1793 = vsyncpa [#allocation18 + $0x1], 1 }
 0xc4a   :  { %1794 = vsyncpa [#allocation21], 1 }
 0xc4b   :  { %1796 = vsyncpa [#allocation21 + $0x1], 1 }
 0xc4c   :  { %1797 = vsyncpa [#allocation4], 1 }
 0xc4d   :  { %1799 = vsyncpa [#allocation4 + $0x1], 1 }

// kernel: vit_ensemble_forward.11
= control target key start
LH: loop header
LB: loop body
LE: loop exit
PB: predicated region body
PF: predicated region fallthrough
CT: control target
= control target key end

     0   :  { %s3384_s0 = inlined_call_operand.hbm [shape: f32[2,5,32], index: 0, kind: input, shape index: {}]   ;;  %s3385_s1 = inlined_call_operand.hbm [shape: f32[1,1,32], index: 1, kind: input, shape index: {}]   ;;  %s3386_s2 = inlined_call_operand.hbm [shape: f32[1,1,32], index: 2, kind: input, shape index: {}]   ;;  %s3387_s3 = inlined_call_operand.hbm [shape: bf16[1,32,96], index: 3, kind: input, shape index: {}]   ;;  %s3388_s4 = inlined_call_operand.hbm [shape: f32[1,1,96], index: 4, kind: input, shape index: {}]   ;;  %s3389_s5 = inlined_call_operand.hbm [shape: bf16[1,32,32], index: 5, kind: input, shape index: {}]   ;;  %s3390_s6 = inlined_call_operand.hbm [shape: f32[1,1,32], index: 6, kind: input, shape index: {}]   ;;  %s3391_s7 = inlined_call_operand.hbm [shape: f32[1,1,32], index: 7, kind: input, shape index: {}]   ;;  %s3392_s8 = inlined_call_operand.hbm [shape: f32[1,1,32], index: 8, kind: input, shape index: {}]   ;;  %s3393_s9 = inlined_call_operand.hbm [shape: bf16[1,32,128], index: 9, kind: input, shape index: {}]   ;;  %s3394_s10 = inlined_call_operand.hbm [shape: f32[1,1,128], index: 10, kind: input, shape index: {}]   ;;  %s3395_s11 = inlined_call_operand.hbm [shape: bf16[1,128,32], index: 11, kind: input, shape index: {}]   ;;  %s3396_s12 = inlined_call_operand.hbm [shape: f32[1,1,32], index: 12, kind: input, shape index: {}]   ;;  %s3397_s13 = inlined_call_operand.hbm [shape: f32[2,5,32], index: 13, kind: output, shape index: {}]  }
   0x1   :  { %3408 = sst [smem:[#allocation36_spill]] %s3384_s0 }
   0x2   :  { %3409 = sst [smem:[#allocation37_spill]] %s3385_s1 }
   0x3   :  { %3410 = sst [smem:[#allocation38_spill]] %s3386_s2 }
   0x4   :  { %3411 = sst [smem:[#allocation39_spill]] %s3387_s3 }
   0x5   :  { %3412 = sst [smem:[#allocation40_spill]] %s3397_s13 }
   0x6   :  { %18 = vsyncpa [#allocation3], 0 }
   0x7   :  { %20 = vsyncpa [#allocation3 + $0x1], 0 }
   0x8   :  { %21 = vsyncpa [#allocation6], 0 }
   0x9   :  { %22 = vsyncpa [#allocation9], 0 }
   0xa   :  { %23 = vsyncpa [#allocation12], 0 }
   0xb   :  { %24 = vsyncpa [#allocation15], 0 }
   0xc   :  { %25 = vsyncpa [#allocation18], 0 }
   0xd   :  { %26 = vsyncpa [#allocation21], 0 }
   0xe   :  { %27 = vsyncpa [#allocation4], 0 }
   0xf   :  { %29 = vsyncpa [#allocation4 + $0x1], 0  ;;  %s2805_s25 = smov 0   ;;  %s2807_s26 = smov 0  }
  0x10   :  { %s2809_s27 = smov 0   ;;  %s2811_s28 = smov 0  }
  0x11   :  { %s2813_s29 = smov 0   ;;  %s2815_s30 = smov 0  }
  0x12 LB: > { %3413 = sst [smem:[#allocation32_spill]] %s2686_s25  ;;  %s3398_s14 = sadd.s32 4294967295, %s2706_s30   ;;  %s2706_s30 = sphi %s2815_s30, %s35_s30   ;;  %s2702_s29 = sphi %s2813_s29, %s3448_s29   ;;  %s2698_s28 = sphi %s2811_s28, %s3447_s28   ;;  %s2694_s27 = sphi %s2809_s27, %s3446_s27   ;;  %s2690_s26 = sphi %s2807_s26, %s3445_s26   ;;  %s2686_s25 = sphi %s2805_s25, %s3444_s25  }
  0x13   : > { %3414 = sst [smem:[#allocation33_spill]] %s2698_s28  ;;  %p1808_p0 = scmp.ge.s32.totalorder %s2706_s30, 1 }
  0x14   : > { %p2839_p1 = scmp.eq.s32.totalorder %s3398_s14, 0  ;;  %p416_p2 = scmp.lt.s32.totalorder %s2706_s30, 3 }
  0x15   : > { %s2708_s17 = smov [#allocation5]   ;;  %s2709_s19 = smov [#allocation8]  }
  0x16   : > { %s3415_s15 = scalar_select %p2839_p1, 1, 0 }
  0x17   : > { %p2844_p3 = pnand %p1808_p0, %p416_p2  ;;  %s431_s18 = sshll.u32 %s2708_s17, 4  ;;  %s432_s18 = int_to_ptr.vmem [resolvable:$true] %s431_s18 }
  0x18   : > { %3416 = sst [smem:[#allocation34_spill]] %s3415_s15  ;;  %s457_s20 = sshll.u32 %s2709_s19, 4  ;;  %s2857_s20 = int_to_ptr.vmem [resolvable:$true] %s457_s20 }
  0x19   : > { %s3417_s16 = scalar_select %p2844_p3, 1, 0 }
  0x1a   : > { %p2054_p5 = pneg %p2844_p3  ;;  %s2710_s22 = smov [#allocation11]  }
  0x1b   : > { %3418 = sst [smem:[#allocation35_spill]] %s3417_s16  ;;  %s2859_s23 = sshll.u32 %s2710_s22, 4  ;;  %s487_s23 = int_to_ptr.vmem [resolvable:$true] %s2859_s23 }
  0x1c   : > { %p2853_p6 = pnand %p2054_p5, %p2839_p1  ;;  %s3420_s1 = sld [smem:[#allocation37_spill]] }
  0x1e   : > { %p2869_p8 = pneg %p2853_p6 }
  0x22   : > { %s2234_s17 = scalar_lea.hbm %s3420_s1, 16 }
  0x23   : > { %p2235_p7 = scmp.ne.s32.totalorder %s3420_s1, %s2234_s17  ;;  %p2241_p11 = scmp.lt.u32.totalorder %s2234_s17, %s3420_s1 }
  0x25   : > { %p2237_p9 = pnand %p2869_p8, %p2235_p7 }
  0x27   : > { %p2238_p10 = pneg %p2237_p9 }
  0x29   : > { %p2243_p12 = pnand %p2241_p11, %p2238_p10 }
  0x2b   : > { %2246 = shalt.err (!%p2243_p12)
}
  0x2c   : > { %s2247_s14 = scalar_lea.vmem %s432_s18, 16  ;;  %s2254_s13 = scalar_lea.vmem %s432_s18, 32 }
  0x2d   : > { %p2248_p13 = scmp.ne.s32.totalorder %s432_s18, %s2247_s14  ;;  %p2255_p5 = scmp.lt.s32.totalorder %s432_s18, %s432_s18 }
  0x2e   : > { %p2256_p4 = scmp.lt.s32.totalorder %s2254_s13, %s2247_s14 }
  0x2f   : > { %p2250_p0 = pnand %p2248_p13, %p2869_p8 }
  0x30   : > { %p2257_p3 = por %p2256_p4, %p2255_p5 }
  0x31   : > { %p2251_p2 = pneg %p2250_p0 }
  0x33   : > { %p2258_p1 = pnand %p2257_p3, %p2251_p2 }
  0x35   : > { %2261 = shalt.err (!%p2258_p1)
}
  0x36   : > { %2057 = dma.hbm_to_vmem [thread:$0]  (!%p2853_p6), %s3420_s1, 16, %s432_s18, [#allocation6]  }
  0x37   : > { %s3422_s3 = sld [smem:[#allocation39_spill]] }
  0x3d   : > { %s2262_s22 = scalar_lea.hbm %s3422_s3, 256 }
  0x3e   : > { %p2263_p7 = scmp.ne.s32.totalorder %s3422_s3, %s2262_s22  ;;  %p2269_p1 = scmp.lt.u32.totalorder %s2262_s22, %s3422_s3 }
  0x40   : > { %p2265_p9 = pnand %p2263_p7, %p2869_p8 }
  0x42   : > { %p2266_p4 = pneg %p2265_p9 }
  0x44   : > { %p2271_p3 = pnand %p2269_p1, %p2266_p4 }
  0x46   : > { %2274 = shalt.err (!%p2271_p3)
}
  0x47   : > { %s2275_s18 = scalar_lea.vmem %s2857_s20, 256  ;;  %p2283_p13 = scmp.lt.s32.totalorder %s2857_s20, %s2857_s20 }
  0x48   : > { %p2276_p10 = scmp.ne.s32.totalorder %s2857_s20, %s2275_s18  ;;  %p2284_p0 = scmp.lt.s32.totalorder %s2275_s18, %s2275_s18 }
  0x4a   : > { %p2278_p11 = pnand %p2276_p10, %p2869_p8  ;;  %p2285_p2 = por %p2284_p0, %p2283_p13 }
  0x4c   : > { %p2279_p12 = pneg %p2278_p11 }
  0x4e   : > { %p2286_p5 = pnand %p2285_p2, %p2279_p12 }
  0x50   : > { %2289 = shalt.err (!%p2286_p5)
}
  0x51   : > { %s2711_s0 = smov 64   ;;  %s2712_s15 = smov 4  }
  0x52   : > { %2063 = dma.hbm_to_vmem [thread:$0]  (!%p2853_p6), %s3422_s3, 256, %s2857_s20, [#allocation9], %s2711_s0, %s2711_s0, %s2712_s15  }
  0x53   : > { %s2290_s22 = scalar_lea.hbm %s3389_s5, 256 }
  0x54   : > { %p2291_p7 = scmp.ne.s32.totalorder %s3389_s5, %s2290_s22  ;;  %p2297_p1 = scmp.lt.u32.totalorder %s2290_s22, %s3389_s5 }
  0x56   : > { %p2293_p9 = pnand %p2291_p7, %p2869_p8 }
  0x58   : > { %p2294_p4 = pneg %p2293_p9 }
  0x5a   : > { %p2299_p3 = pnand %p2297_p1, %p2294_p4 }
  0x5c   : > { %2302 = shalt.err (!%p2299_p3)
}
  0x5d   : > { %s2303_s28 = scalar_lea.vmem %s487_s23, 256  ;;  %p2311_p13 = scmp.lt.s32.totalorder %s487_s23, %s487_s23 }
  0x5e   : > { %p2304_p10 = scmp.ne.s32.totalorder %s487_s23, %s2303_s28  ;;  %p2312_p0 = scmp.lt.s32.totalorder %s2303_s28, %s2303_s28 }
  0x60   : > { %p2306_p11 = pnand %p2304_p10, %p2869_p8  ;;  %p2313_p2 = por %p2312_p0, %p2311_p13 }
  0x62   : > { %p2307_p12 = pneg %p2306_p11 }
  0x64   : > { %p2314_p5 = pnand %p2313_p2, %p2307_p12 }
  0x66   : > { %2317 = shalt.err (!%p2314_p5)
}
  0x67   : > { %2069 = dma.hbm_to_vmem [thread:$0]  (!%p2853_p6), %s3389_s5, 256, %s487_s23, [#allocation12], %s2711_s0, %s2711_s0, %s2712_s15  }
  0x68   : > { %s2713_s24 = smov [#allocation14]   ;;  %s2714_s17 = smov [#allocation17]  }
  0x69   : > { %s515_s16 = sshll.u32 %s2713_s24, 4  ;;  %s541_s22 = sshll.u32 %s2714_s17, 4  ;;  %s516_s16 = int_to_ptr.vmem [resolvable:$true] %s515_s16  ;;  %s542_s22 = int_to_ptr.vmem [resolvable:$true] %s541_s22 }
  0x6a   : > { %s2318_s18 = scalar_lea.hbm %s3391_s7, 16 }
  0x6b   : > { %p2319_p7 = scmp.ne.s32.totalorder %s3391_s7, %s2318_s18  ;;  %p2325_p1 = scmp.lt.u32.totalorder %s2318_s18, %s3391_s7 }
  0x6d   : > { %p2321_p9 = pnand %p2319_p7, %p2869_p8 }
  0x6f   : > { %p2322_p4 = pneg %p2321_p9 }
  0x71   : > { %p2327_p3 = pnand %p2325_p1, %p2322_p4 }
  0x73   : > { %2330 = shalt.err (!%p2327_p3)
}
  0x74   : > { %s2331_s23 = scalar_lea.vmem %s516_s16, 16  ;;  %s2338_s20 = scalar_lea.vmem %s516_s16, 32 }
  0x75   : > { %p2332_p10 = scmp.ne.s32.totalorder %s516_s16, %s2331_s23  ;;  %p2339_p13 = scmp.lt.s32.totalorder %s516_s16, %s516_s16 }
  0x76   : > { %p2340_p0 = scmp.lt.s32.totalorder %s2338_s20, %s2331_s23 }
  0x77   : > { %p2334_p11 = pnand %p2332_p10, %p2869_p8 }
  0x78   : > { %p2341_p2 = por %p2340_p0, %p2339_p13 }
  0x79   : > { %p2335_p12 = pneg %p2334_p11 }
  0x7b   : > { %p2342_p5 = pnand %p2341_p2, %p2335_p12 }
  0x7d   : > { %2345 = shalt.err (!%p2342_p5)
}
  0x7e   : > { %2075 = dma.hbm_to_vmem [thread:$0]  (!%p2853_p6), %s3391_s7, 16, %s516_s16, [#allocation15]  }
  0x7f   : > { %s2346_s14 = scalar_lea.hbm %s3393_s9, 256 }
  0x80   : > { %p2347_p7 = scmp.ne.s32.totalorder %s3393_s9, %s2346_s14  ;;  %p2353_p1 = scmp.lt.u32.totalorder %s2346_s14, %s3393_s9 }
  0x82   : > { %p2349_p9 = pnand %p2347_p7, %p2869_p8 }
  0x84   : > { %p2350_p4 = pneg %p2349_p9 }
  0x86   : > { %p2355_p3 = pnand %p2353_p1, %p2350_p4 }
  0x88   : > { %2358 = shalt.err (!%p2355_p3)
}
  0x89   : > { %s2359_s23 = scalar_lea.vmem %s542_s22, 256  ;;  %p2367_p13 = scmp.lt.s32.totalorder %s542_s22, %s542_s22 }
  0x8a   : > { %p2360_p10 = scmp.ne.s32.totalorder %s542_s22, %s2359_s23  ;;  %p2368_p0 = scmp.lt.s32.totalorder %s2359_s23, %s2359_s23 }
  0x8c   : > { %p2362_p11 = pnand %p2360_p10, %p2869_p8  ;;  %p2369_p2 = por %p2368_p0, %p2367_p13 }
  0x8e   : > { %p2363_p12 = pneg %p2362_p11 }
  0x90   : > { %p2370_p5 = pnand %p2369_p2, %p2363_p12 }
  0x92   : > { %2373 = shalt.err (!%p2370_p5)
}
  0x93   : > { %2081 = dma.hbm_to_vmem [thread:$0]  (!%p2853_p6), %s3393_s9, 256, %s542_s22, [#allocation18], %s2711_s0, %s2711_s0, %s2712_s15  }
  0x94   : > { %s2715_s3 = smov [#allocation20]   ;;  %s2716_s25 = smov [#allocation7]  }
  0x95   : > { %s570_s24 = sshll.u32 %s2715_s3, 4  ;;  %s444_s17 = sshll.u32 %s2716_s25, 4  ;;  %s571_s24 = int_to_ptr.vmem [resolvable:$true] %s570_s24  ;;  %s445_s17 = int_to_ptr.vmem [resolvable:$true] %s444_s17 }
  0x96   : > { %s2374_s18 = scalar_lea.hbm %s3395_s11, 1024 }
  0x97   : > { %p2375_p7 = scmp.ne.s32.totalorder %s3395_s11, %s2374_s18  ;;  %p2381_p1 = scmp.lt.u32.totalorder %s2374_s18, %s3395_s11 }
  0x99   : > { %p2377_p9 = pnand %p2375_p7, %p2869_p8 }
  0x9b   : > { %p2378_p4 = pneg %p2377_p9 }
  0x9d   : > { %p2383_p3 = pnand %p2381_p1, %p2378_p4 }
  0x9f   : > { %2386 = shalt.err (!%p2383_p3)
}
  0xa0   : > { %s2387_s22 = scalar_lea.vmem %s571_s24, 1024  ;;  %p2395_p13 = scmp.lt.s32.totalorder %s571_s24, %s571_s24 }
  0xa1   : > { %p2388_p10 = scmp.ne.s32.totalorder %s571_s24, %s2387_s22  ;;  %p2396_p0 = scmp.lt.s32.totalorder %s2387_s22, %s2387_s22 }
  0xa3   : > { %p2390_p11 = pnand %p2388_p10, %p2869_p8  ;;  %p2397_p2 = por %p2396_p0, %p2395_p13 }
  0xa5   : > { %p2391_p12 = pneg %p2390_p11 }
  0xa7   : > { %p2398_p5 = pnand %p2397_p2, %p2391_p12 }
  0xa9   : > { %2401 = shalt.err (!%p2398_p5)
}
  0xaa   : > { %2087 = dma.hbm_to_vmem [thread:$0]  (!%p2853_p6), %s3395_s11, 1024, %s571_s24, [#allocation21], %s2711_s0, %s2711_s0, %s2712_s15  }
  0xab   : > { %s3423_s2 = sld [smem:[#allocation38_spill]] }
  0xb1   : > { %s2402_s13 = scalar_lea.hbm %s3423_s2, 16 }
  0xb2   : > { %p2403_p7 = scmp.ne.s32.totalorder %s3423_s2, %s2402_s13  ;;  %p2409_p1 = scmp.lt.u32.totalorder %s2402_s13, %s3423_s2 }
  0xb4   : > { %p2405_p9 = pnand %p2403_p7, %p2869_p8 }
  0xb6   : > { %p2406_p4 = pneg %p2405_p9 }
  0xb8   : > { %p2411_p3 = pnand %p2409_p1, %p2406_p4 }
  0xba   : > { %2414 = shalt.err (!%p2411_p3)
}
  0xbb   : > { %s2415_s16 = scalar_lea.vmem %s445_s17, 16  ;;  %s2422_s0 = scalar_lea.vmem %s445_s17, 32 }
  0xbc   : > { %p2416_p10 = scmp.ne.s32.totalorder %s445_s17, %s2415_s16  ;;  %p2423_p13 = scmp.lt.s32.totalorder %s445_s17, %s445_s17 }
  0xbd   : > { %p2424_p0 = scmp.lt.s32.totalorder %s2422_s0, %s2415_s16 }
  0xbe   : > { %p2418_p11 = pnand %p2416_p10, %p2869_p8 }
  0xbf   : > { %p2425_p2 = por %p2424_p0, %p2423_p13 }
  0xc0   : > { %p2419_p12 = pneg %p2418_p11 }
  0xc2   : > { %p2426_p5 = pnand %p2425_p2, %p2419_p12 }
  0xc4   : > { %2429 = shalt.err (!%p2426_p5)
}
  0xc5   : > { %2060 = dma.hbm_to_vmem [thread:$0]  (!%p2853_p6), %s3423_s2, 16, %s445_s17, [#allocation6]  }
  0xc6   : > { %s2717_s22 = smov [#allocation10]   ;;  %s2718_s3 = smov [#allocation13]  }
  0xc7   : > { %s473_s20 = sshll.u32 %s2717_s22, 4  ;;  %s502_s25 = sshll.u32 %s2718_s3, 4  ;;  %s474_s20 = int_to_ptr.vmem [resolvable:$true] %s473_s20  ;;  %s503_s25 = int_to_ptr.vmem [resolvable:$true] %s502_s25 }
  0xc8   : > { %s2430_s18 = scalar_lea.hbm %s3388_s4, 16 }
  0xc9   : > { %p2431_p7 = scmp.ne.s32.totalorder %s3388_s4, %s2430_s18  ;;  %p2437_p1 = scmp.lt.u32.totalorder %s2430_s18, %s3388_s4 }
  0xcb   : > { %p2433_p9 = pnand %p2431_p7, %p2869_p8 }
  0xcd   : > { %p2434_p4 = pneg %p2433_p9 }
  0xcf   : > { %p2439_p3 = pnand %p2437_p1, %p2434_p4 }
  0xd1   : > { %2442 = shalt.err (!%p2439_p3)
}
  0xd2   : > { %s2443_s17 = scalar_lea.vmem %s474_s20, 16  ;;  %s2450_s0 = scalar_lea.vmem %s474_s20, 32 }
  0xd3   : > { %p2444_p10 = scmp.ne.s32.totalorder %s474_s20, %s2443_s17  ;;  %p2451_p13 = scmp.lt.s32.totalorder %s474_s20, %s474_s20 }
  0xd4   : > { %p2452_p0 = scmp.lt.s32.totalorder %s2450_s0, %s2443_s17 }
  0xd5   : > { %p2446_p11 = pnand %p2444_p10, %p2869_p8 }
  0xd6   : > { %p2453_p2 = por %p2452_p0, %p2451_p13 }
  0xd7   : > { %p2447_p12 = pneg %p2446_p11 }
  0xd9   : > { %p2454_p5 = pnand %p2453_p2, %p2447_p12 }
  0xdb   : > { %2457 = shalt.err (!%p2454_p5)
}
  0xdc   : > { %2066 = dma.hbm_to_vmem [thread:$0]  (!%p2853_p6), %s3388_s4, 16, %s474_s20, [#allocation9]  }
  0xdd   : > { %s2458_s14 = scalar_lea.hbm %s3390_s6, 16 }
  0xde   : > { %p2459_p7 = scmp.ne.s32.totalorder %s3390_s6, %s2458_s14  ;;  %p2465_p1 = scmp.lt.u32.totalorder %s2458_s14, %s3390_s6 }
  0xe0   : > { %p2461_p9 = pnand %p2459_p7, %p2869_p8 }
  0xe2   : > { %p2462_p4 = pneg %p2461_p9 }
  0xe4   : > { %p2467_p3 = pnand %p2465_p1, %p2462_p4 }
  0xe6   : > { %2470 = shalt.err (!%p2467_p3)
}
  0xe7   : > { %s2471_s23 = scalar_lea.vmem %s503_s25, 16  ;;  %s2478_s20 = scalar_lea.vmem %s503_s25, 32 }
  0xe8   : > { %p2472_p10 = scmp.ne.s32.totalorder %s503_s25, %s2471_s23  ;;  %p2479_p13 = scmp.lt.s32.totalorder %s503_s25, %s503_s25 }
  0xe9   : > { %p2480_p0 = scmp.lt.s32.totalorder %s2478_s20, %s2471_s23 }
  0xea   : > { %p2474_p11 = pnand %p2472_p10, %p2869_p8 }
  0xeb   : > { %p2481_p2 = por %p2480_p0, %p2479_p13 }
  0xec   : > { %p2475_p12 = pneg %p2474_p11 }
  0xee   : > { %p2482_p5 = pnand %p2481_p2, %p2475_p12 }
  0xf0   : > { %2485 = shalt.err (!%p2482_p5)
}
  0xf1   : > { %2072 = dma.hbm_to_vmem [thread:$0]  (!%p2853_p6), %s3390_s6, 16, %s503_s25, [#allocation12]  }
  0xf2   : > { %s2719_s0 = smov [#allocation16]   ;;  %s2720_s24 = smov [#allocation19]  }
  0xf3   : > { %s528_s15 = sshll.u32 %s2719_s0, 4  ;;  %s557_s22 = sshll.u32 %s2720_s24, 4  ;;  %s529_s15 = int_to_ptr.vmem [resolvable:$true] %s528_s15  ;;  %s558_s22 = int_to_ptr.vmem [resolvable:$true] %s557_s22 }
  0xf4   : > { %s2486_s13 = scalar_lea.hbm %s3392_s8, 16 }
  0xf5   : > { %p2487_p7 = scmp.ne.s32.totalorder %s3392_s8, %s2486_s13  ;;  %p2493_p1 = scmp.lt.u32.totalorder %s2486_s13, %s3392_s8 }
  0xf7   : > { %p2489_p9 = pnand %p2487_p7, %p2869_p8 }
  0xf9   : > { %p2490_p4 = pneg %p2489_p9 }
  0xfb   : > { %p2495_p3 = pnand %p2493_p1, %p2490_p4 }
  0xfd   : > { %2498 = shalt.err (!%p2495_p3)
}
  0xfe   : > { %s2499_s25 = scalar_lea.vmem %s529_s15, 16  ;;  %s2506_s20 = scalar_lea.vmem %s529_s15, 32 }
  0xff   : > { %p2500_p10 = scmp.ne.s32.totalorder %s529_s15, %s2499_s25  ;;  %p2507_p13 = scmp.lt.s32.totalorder %s529_s15, %s529_s15 }
 0x100   : > { %p2508_p0 = scmp.lt.s32.totalorder %s2506_s20, %s2499_s25 }
 0x101   : > { %p2502_p11 = pnand %p2500_p10, %p2869_p8 }
 0x102   : > { %p2509_p2 = por %p2508_p0, %p2507_p13 }
 0x103   : > { %p2503_p12 = pneg %p2502_p11 }
 0x105   : > { %p2510_p5 = pnand %p2509_p2, %p2503_p12 }
 0x107   : > { %2513 = shalt.err (!%p2510_p5)
}
 0x108   : > { %2078 = dma.hbm_to_vmem [thread:$0]  (!%p2853_p6), %s3392_s8, 16, %s529_s15, [#allocation15]  }
 0x109   : > { %s2514_s3 = scalar_lea.hbm %s3394_s10, 16 }
 0x10a   : > { %p2515_p7 = scmp.ne.s32.totalorder %s3394_s10, %s2514_s3  ;;  %p2521_p1 = scmp.lt.u32.totalorder %s2514_s3, %s3394_s10 }
 0x10c   : > { %p2517_p9 = pnand %p2515_p7, %p2869_p8 }
 0x10e   : > { %p2518_p4 = pneg %p2517_p9 }
 0x110   : > { %p2523_p3 = pnand %p2521_p1, %p2518_p4 }
 0x112   : > { %2526 = shalt.err (!%p2523_p3)
}
 0x113   : > { %s2527_s1 = scalar_lea.vmem %s558_s22, 16  ;;  %s2534_s15 = scalar_lea.vmem %s558_s22, 32 }
 0x114   : > { %p2528_p10 = scmp.ne.s32.totalorder %s558_s22, %s2527_s1  ;;  %p2535_p13 = scmp.lt.s32.totalorder %s558_s22, %s558_s22 }
 0x115   : > { %p2536_p0 = scmp.lt.s32.totalorder %s2534_s15, %s2527_s1 }
 0x116   : > { %p2530_p11 = pnand %p2528_p10, %p2869_p8 }
 0x117   : > { %p2537_p2 = por %p2536_p0, %p2535_p13 }
 0x118   : > { %p2531_p12 = pneg %p2530_p11 }
 0x11a   : > { %p2538_p5 = pnand %p2537_p2, %p2531_p12 }
 0x11c   : > { %2541 = shalt.err (!%p2538_p5)
}
 0x11d   : > { %2084 = dma.hbm_to_vmem [thread:$0]  (!%p2853_p6), %s3394_s10, 16, %s558_s22, [#allocation18]  }
 0x11e   : > { %s2721_s20 = smov [#allocation22]   ;;  %s2542_s24 = scalar_lea.hbm %s3396_s12, 16 }
 0x11f   : > { %s586_s16 = sshll.u32 %s2721_s20, 4  ;;  %p2543_p7 = scmp.ne.s32.totalorder %s3396_s12, %s2542_s24  ;;  %s587_s16 = int_to_ptr.vmem [resolvable:$true] %s586_s16 }
 0x120   : > { %p2549_p1 = scmp.lt.u32.totalorder %s2542_s24, %s3396_s12 }
 0x121   : > { %p2545_p9 = pnand %p2543_p7, %p2869_p8 }
 0x123   : > { %p2546_p4 = pneg %p2545_p9 }
 0x125   : > { %p2551_p3 = pnand %p2549_p1, %p2546_p4 }
 0x127   : > { %2554 = shalt.err (!%p2551_p3)
}
 0x128   : > { %s2555_s22 = scalar_lea.vmem %s587_s16, 16  ;;  %s2562_s28 = scalar_lea.vmem %s587_s16, 32 }
 0x129   : > { %p2556_p10 = scmp.ne.s32.totalorder %s587_s16, %s2555_s22  ;;  %p2563_p13 = scmp.lt.s32.totalorder %s587_s16, %s587_s16 }
 0x12a   : > { %p2564_p0 = scmp.lt.s32.totalorder %s2562_s28, %s2555_s22 }
 0x12b   : > { %p2558_p11 = pnand %p2556_p10, %p2869_p8 }
 0x12c   : > { %p2565_p2 = por %p2564_p0, %p2563_p13 }
 0x12d   : > { %p2559_p12 = pneg %p2558_p11 }
 0x12f   : > { %p2566_p5 = pnand %p2565_p2, %p2559_p12 }
 0x131   : > { %2569 = shalt.err (!%p2566_p5)
}
 0x132   : > { %s3424_s19 = sld [smem:[#allocation32_spill]]  ;;  %s3425_s23 = sld [smem:[#allocation34_spill]] }
 0x133   : > { %2090 = dma.hbm_to_vmem [thread:$0]  (!%p2853_p6), %s3396_s12, 16, %s587_s16, [#allocation21]  }
 0x134   : > { %s1807_s25 = sadd.s32 4294967294, %s2706_s30   ;;  %s47_s20 = sadd.s32 1, %s2702_s29 }
 0x135   : > { %p49_p8 = scmp.ge.s32.totalorder %s47_s20, 2  ;;  %s54_s21 = sadd.s32 1, %s2694_s27 }
 0x136   : > { %p61_p7 = scmp.ne.s32.totalorder %s2694_s27, %s2690_s26  ;;  %p62_p9 = scmp.eq.s32.totalorder %s2706_s30, 0 }
 0x137   : > { %s3450_s20 = smov (%p49_p8, %s47_s20), 0  ;;  %s3427_s0 = sadd.s32 4294967295, %s2706_s30  }
 0x138   : > { %p3109_p4 = por %p62_p9, %p61_p7  ;;  %p67_p1 = scmp.ne.s32.totalorder %s2690_s26, %s3424_s19 }
 0x139   : > { %s51_s16 = ssub.s32 %s2702_s29, %s3450_s20  ;;  %p403_p6 = scmp.eq.s32.totalorder %s3427_s0, 1 }
 0x13a   : > { %p52_p3 = scmp.eq.s32.totalorder %s51_s16, 0  ;;  %p3428_p10 = scmp.ne.s32.totalorder %s3425_s23, 0 }
 0x13b   : > { %p3125_p12 = por %p403_p6, %p61_p7  ;;  %p409_p13 = scmp.eq.s32.totalorder %s1807_s25, 1 }
 0x13c   : > { %p3121_p11 = por %p3428_p10, %p67_p1  ;;  %p2111_p2 = scmp.lt.s32.totalorder %s2706_s30, 2 }
 0x13d   : > { %s3430_s3 = scalar_select %p3125_p12, 1, 0 }
 0x13e   : > { %s3130_s14 = scalar_select %p52_p3, %s2694_s27, %s54_s21  }
 0x13f   : > { %p3132_p0 = por %p409_p13, %p67_p1  ;;  %s597_s18 = sand.u32 1, %s2694_s27  }
 0x140   : > { %s1823_s22 = sshll.u32 %s2702_s29, 7  ;;  %s1822_s28 = sshll.u32 %s597_s18, 3 }
 0x141   : > { %s3431_s13 = scalar_select %p3132_p0, 1, 0 }
 0x142   : > { %s3432_s19 = sld [smem:[#allocation36_spill]]  ;;  %s601_s25 = scalar_lea.vmem [#allocation2], %s1822_s28 }
 0x143   : > { %s608_s21 = sshll.u32 %s601_s25, 4  ;;  %p3146_p5 = pnand %p2111_p2, %p3109_p4  ;;  %s3150_s21 = int_to_ptr.vmem [resolvable:$true] %s608_s21 }
 0x144   : > { %s598_s0 = scalar_lea.sflag [#allocation3], %s597_s18 }
 0x145   : > { %p2572_p7 = pneg %p3146_p5 }
 0x148   : > { %s3142_s23 = scalar_lea.hbm %s3432_s19, %s1823_s22  ;;  %s2575_s17 = scalar_lea.hbm %s3432_s19, 256 }
 0x149   : > { %s2570_s2 = scalar_lea.hbm %s3142_s23, 128  ;;  %p2576_p4 = scmp.lt.u32.totalorder %s3142_s23, %s3432_s19 }
 0x14a   : > { %p2571_p8 = scmp.ne.s32.totalorder %s3142_s23, %s2570_s2  ;;  %p2577_p6 = scmp.lt.u32.totalorder %s2575_s17, %s2570_s2 }
 0x14b   : > { %p2579_p10 = scmp.lt.u32.totalorder %s2570_s2, %s3142_s23 }
 0x14c   : > { %p2573_p9 = pnand %p2572_p7, %p2571_p8  ;;  %p2578_p3 = por %p2577_p6, %p2576_p4 }
 0x14e   : > { %p2574_p1 = pneg %p2573_p9  ;;  %p2580_p13 = por %p2579_p10, %p2578_p3 }
 0x150   : > { %p2581_p2 = pnand %p2580_p13, %p2574_p1 }
 0x152   : > { %2584 = shalt.err (!%p2581_p2)
}
 0x153   : > { %s2585_s18 = scalar_lea.vmem %s3150_s21, 128  ;;  %s2722_s25 = smov [#allocation2]  }
 0x154   : > { %p2586_p8 = scmp.ne.s32.totalorder %s3150_s21, %s2585_s18  ;;  %s2590_s22 = sshll.u32 %s2722_s25, 4  ;;  %s2591_s22 = int_to_ptr.vmem [resolvable:$false] %s2590_s22 }
 0x155   : > { %s2592_s28 = scalar_lea.vmem %s2591_s22, 256  ;;  %p2593_p12 = scmp.lt.s32.totalorder %s3150_s21, %s2591_s22 }
 0x156   : > { %p2588_p9 = pnand %p2586_p8, %p2572_p7  ;;  %p2594_p4 = scmp.lt.s32.totalorder %s2592_s28, %s2585_s18 }
 0x158   : > { %p2589_p0 = pneg %p2588_p9  ;;  %p2595_p6 = por %p2594_p4, %p2593_p12 }
 0x15a   : > { %p2596_p3 = pnand %p2595_p6, %p2589_p0 }
 0x15c   : > { %2599 = shalt.err (!%p2596_p3)
}
 0x15d   : > { %2094 = dma.hbm_to_vmem [thread:$0]  (!%p3146_p5), %s3142_s23, 128, %s3150_s21, %s598_s0  }
 0x15e   : > { %s3434_s2 = sld [smem:[#allocation35_spill]] }
 0x164   : > { %p3435_p1 = scmp.ne.s32.totalorder %s3434_s2, 0 }
 0x165   : > { %s3180_s17 = sand.u32 (!%p3435_p1), 1, %s2690_s26  }
 0x166   : > { %617 = sbr.rel (%p3435_p1) target bundleno = 3035 (0xbdb), region = 72  ;;  %s1825_s1 = sshll.u32 (!%p3435_p1), %s3180_s17, 3 }
 0x167   : > { %s620_s15 = scalar_lea.sflag (!%p3435_p1), [#allocation3], %s3180_s17  ;;  %s623_s18 = scalar_lea.vmem (!%p3435_p1), [#allocation2], %s1825_s1 }
 0x16d   : > { %2653 = dma.done.wait (%p3121_p11), %s620_s15, 128  }
 0x16e   : > { %2655 = vsyncadd (%p3121_p11), %s620_s15, 4294967168  ;;  %s3436_s16 = sld [smem:[#allocation34_spill]] }
 0x174   : > { %p3437_p12 = scmp.ne.s32.totalorder %s3436_s16, 0 }
 0x176   : > { %2657 = dma.done.wait (%p3437_p12), [#allocation6], 32  }
 0x177   : > { %2659 = vsyncadd (%p3437_p12), [#allocation6], 4294967264 }
 0x178   : > { %2661 = dma.done.wait (%p3437_p12), [#allocation9], 272  }
 0x179   : > { %2663 = vsyncadd (%p3437_p12), [#allocation9], 4294967024 }
 0x17a   : > { %2665 = dma.done.wait (%p3437_p12), [#allocation12], 272  }
 0x17b   : > { %2667 = vsyncadd (%p3437_p12), [#allocation12], 4294967024 }
 0x17c   : > { %2669 = dma.done.wait (%p3437_p12), [#allocation15], 32  }
 0x17d   : > { %2671 = vsyncadd (%p3437_p12), [#allocation15], 4294967264 }
 0x17e   : > { %2673 = dma.done.wait (%p3437_p12), [#allocation18], 272  }
 0x17f   : > { %2675 = vsyncadd (%p3437_p12), [#allocation18], 4294967024 }
 0x180   : > { %2677 = dma.done.wait (%p3437_p12), [#allocation21], 1040  }
 0x181   : > { %2679 = vsyncadd (%p3437_p12), [#allocation21], 4294966256  ;;  %vm720_vm0 = vcmask 258048   ;;  %v719_v0 = vld [vmem:[%s623_s18] sm:$0x1f]  ;;  %s3212_s24 = scalar_lea.vmem [#allocation23], %s1825_s1 }
 0x182   : > { %721 = vst.msk [vmem:[%s3212_s24] sm:$0x1f] %vm720_vm0, %v719_v0  ;;  %v2198_v8 = vld [vmem:[#allocation8] sm:$0xff]   ;;  %v2723_v9 = vmov 0.0   ;;  %vm2724_vm1 = vmmov 0   ;;  %v2199_v10 = vld [vmem:[#allocation8 + $0x8] sm:$0xff]  }
 0x183   : > { %1910 = vmatprep.subr.bf16.mxu0 %v2723_v9  ;;  %1914 = vmatprep.mubr.msk.bf16.mxu0 %vm2724_vm1, %v2723_v9  ;;  %v1839_v15 = vld [vmem:[#allocation5] ss:$0 sm:$0xff]  ;;  %v1840_v17 = vld [vmem:[#allocation7] ss:$0 sm:$0xff]  ;;  %vm778_vm2 = vcmask 261120   ;;  %s2725_s23 = smov 104  }
 0x184   : > { %1911 = vmatpush3.bf16.msra.mxu0 %v2198_v8  ;;  %1930 = vmatprep.subr.bf16.mxu1 %v2723_v9  ;;  %v1841_v21 = vld [vmem:[#allocation10] ss:$0 sm:$0xff]  ;;  %s2726_s21 = smov 120   ;;  %s2727_s0 = smov 112   ;;  %vm832_vm3 = vcmask 64512   ;;  %vm1023_vm4 = vcmask 36864  }
 0x185   : > { %1912 = vmatprep.subr.bf16.mxu0 %v2723_v9  ;;  %1932 = vmatprep.mubr.msk.bf16.mxu1 %vm2724_vm1, %v2723_v9  ;;  %s2728_s25 = smov 96   ;;  %s2729_s22 = smov 64   ;;  %vm1078_vm5 = vcmask 1041408   ;;  %vm1079_vm6 = vcmask 1042432   ;;  %vm1074_vm7 = vcmask 39936   ;;  %vm1285_vm8 = vcmask 130048  }
 0x186   : > { %s2731_s28 = smov 8   ;;  %s2732_s2 = smov 16   ;;  %vm1288_vm9 = vcmask 195584  }
 0x187   : > { %s2733_s1 = smov 24   ;;  %s3438_s15 = sld [smem:[#allocation33_spill]] }
 0x188   : > { %1913 = vmatpush3.bf16.msra.mxu0 %v2199_v10  ;;  %s1590_s16 = sshll.u32 %s3212_s24, 4  ;;  %p3440_p0 = scmp.ne.s32.totalorder %s3430_s3, 0  ;;  %s3335_s16 = int_to_ptr.vmem [resolvable:$true] %s1590_s16 }
 0x189   : > { %v3217_v1 = vld [vmem:[%s3212_s24] sm:$0x1f]  ;;  %1918 = vmatprep.subr.bf16.mxu0 %v2723_v9 }
 0x18a   : > { %v724_v2 = vsel %vm720_vm0, %v3217_v1, 0.0 }
 0x18b   : > { %725 = vadd.xlane.f32.xlu0 %v724_v2 }
 0x18d   : > { %s1873_s18 = sshll.u32 %s3438_s15, 7 }
 0x218   : > { %v726_v3 = vpop.xlane.xlu0 %725 }
 0x219   : > { %v728_v4 = vmul.f32 0.03125, %v726_v3 }
 0x21b   : > { %v729_v5 = vsub.f32 %v3217_v1, %v728_v4  ;;  %v2730_v4 = vmov 65535  }
 0x21d   : > { %v730_v6 = vmul.f32 %v729_v5, %v729_v5 }
 0x21f   : > { %v731_v7 = vsel %vm720_vm0, %v730_v6, 0.0 }
 0x220   : > { %732 = vadd.xlane.f32.xlu0 %v731_v7 }
 0x2ad   : > { %v733_v11 = vpop.xlane.xlu0 %732 }
 0x2ae   : > { %v734_v12 = vmul.f32 0.03125, %v733_v11 }
 0x2b0   : > { %v735_v13 = vadd.f32 1e-06, %v734_v12 }
 0x2b2   : > { %2212 = vrsqrt.f32 %v735_v13 }
 0x2bc   : > { %v2213_v14 = vpop.eup %2212 }
 0x2bd   : > { %v737_v16 = vmul.f32 %v2213_v14, %v729_v5  ;;  %v1080_v5 = vsel %vm1078_vm5, 4294967295, %v2730_v4 }
 0x2be   : > { %v1081_v8 = vsel %vm1079_vm6, %v1080_v5, 0 }
 0x2bf   : > { %v745_v18 = vmul.f32 %v1839_v15, %v737_v16 }
 0x2c1   : > { %v753_v19 = vadd.f32 %v1840_v17, %v745_v18 }
 0x2c3   : > { %v754_v20 = vpack.c.bf16 %v753_v19, %v753_v19 }
 0x2c5   : > { %1915 = vmatmul.mubr.msk.bf16.vlgmr.msra.gmra.mrb[0].mxu0 %vm778_vm2, %v754_v20 }
 0x2c6   : > { %1920 = vmatprep.mubr.msk.bf16.mxu0 %vm2724_vm1, %v2723_v9 }
 0x398   : > { %v816_v22 = vpop.f32.mrb[0].mxu0 }
 0x399   : > { %v817_v23 = vadd.f32 %v1841_v21, %v816_v22  ;;  %v1916_v24 = vpop.f32.mrb[1].mxu0 }
 0x39a   : > { %v819_v25 = vpop.f32.mrb[2].mxu0 }
 0x39b   : > { %v3234_v26 = vpack.c.bf16 %v817_v23, %v817_v23  ;;  %v1917_v27 = vpop.f32.mrb[3].mxu0 }
 0x39d   : > { %828 = vrot.lane.b32.xlu0 %v3234_v26, %s2725_s23  ;;  %824 = vrot.lane.b32.xlu1 %v3234_v26, %s2726_s21 }
 0x3a1   : > { %826 = vrot.lane.b32.xlu1 %v3234_v26, %s2727_s0  ;;  %s3439_s0 = sld [smem:[#allocation40_spill]] }
 0x3a5   : > { %830 = vrot.lane.b32.xlu1 %v3234_v26, %s2728_s25 }
 0x40f   : > { %v3240_v28 = vpop.permute.xlu1 %824  ;;  %v3246_v30 = vpop.permute.xlu0 %828 }
 0x410   : > { %879 = vrot.lane.b32.xlu1 %v3240_v28, %s2728_s25 }
 0x413   : > { %v3243_v29 = vpop.permute.xlu1 %826 }
 0x414   : > { %927 = vrot.lane.b32.xlu1 %v3243_v29, %s2728_s25 }
 0x417   : > { %v831_v31 = vpop.permute.xlu1 %830 }
 0x418   : > { %v837_v32 = vsel %vm832_vm3, %v831_v31, 0  ;;  %975 = vrot.lane.b32.xlu1 %v3246_v30, %s2728_s25  ;;  %s3333_s25 = scalar_lea.hbm %s3439_s0, %s1873_s18 }
 0x419   : > { %1919 = vmatpush3.bf16.xpose.msra.mxu0 %v837_v32 }
 0x41a   : > { %1924 = vmatprep.subr.bf16.mxu0 %v2723_v9 }
 0x420   : > { %1921 = vmatmul.mubr.msk.bf16.vlgmr.msra.gmra.mrb[4].mxu0 %vm832_vm3, %v3234_v26 }
 0x421   : > { %1926 = vmatprep.mubr.msk.bf16.mxu0 %vm2724_vm1, %v2723_v9 }
 0x482   : > { %v880_v33 = vpop.permute.xlu1 %879 }
 0x483   : > { %v885_v34 = vsel %vm832_vm3, %v880_v33, 0 }
 0x484   : > { %1925 = vmatpush3.bf16.xpose.msra.mxu0 %v885_v34 }
 0x485   : > { %1936 = vmatprep.subr.bf16.mxu0 %v2723_v9 }
 0x486   : > { %v928_v35 = vpop.permute.xlu1 %927 }
 0x487   : > { %v933_v36 = vsel %vm832_vm3, %v928_v35, 0 }
 0x488   : > { %1931 = vmatpush3.bf16.xpose.msra.mxu1 %v933_v36 }
 0x489   : > { %1942 = vmatprep.subr.bf16.mxu1 %v2723_v9 }
 0x48a   : > { %v976_v37 = vpop.permute.xlu1 %975 }
 0x48b   : > { %v981_v38 = vsel %vm832_vm3, %v976_v37, 0  ;;  %1927 = vmatmul.mubr.msk.bf16.vlgmr.msra.gmra.mrb[8].mxu0 %vm832_vm3, %v3240_v28 }
 0x48c   : > { %1937 = vmatpush3.bf16.xpose.msra.mxu0 %v981_v38  ;;  %1938 = vmatprep.mubr.msk.bf16.mxu0 %vm2724_vm1, %v2723_v9 }
 0x48d   : > { %1948 = vmatprep.subr.bf16.mxu0 %v2723_v9 }
 0x48f   : > { %1933 = vmatmul.mubr.msk.bf16.vlgmr.msra.gmra.mrb[0].mxu1 %vm832_vm3, %v3243_v29 }
 0x490   : > { %1944 = vmatprep.mubr.msk.bf16.mxu1 %vm2724_vm1, %v2723_v9 }
 0x493   : > { %1939 = vmatmul.mubr.msk.bf16.vlgmr.msra.gmra.mrb[12].mxu0 %vm832_vm3, %v3246_v30 }
 0x494   : > { %1950 = vmatprep.mubr.msk.bf16.mxu0 %vm2724_vm1, %v2723_v9 }
 0x4f3   : > { %v873_v39 = vpop.f32.mrb[4].mxu0 }
 0x4f4   : > { %v1922_v40 = vpop.f32.mrb[5].mxu0  ;;  %v1024_v41 = vsel %vm1023_vm4, %v873_v39, -inf }
 0x4f5   : > { %1025 = vmax.xlane.f32.xlu1 %v1024_v41  ;;  %v876_v42 = vpop.f32.mrb[6].mxu0 }
 0x4f6   : > { %v1923_v43 = vpop.f32.mrb[7].mxu0 }
 0x55e   : > { %v921_v44 = vpop.f32.mrb[8].mxu0 }
 0x55f   : > { %v1928_v45 = vpop.f32.mrb[9].mxu0  ;;  %v1027_v46 = vsel %vm1023_vm4, %v921_v44, -inf }
 0x560   : > { %1028 = vmax.xlane.f32.xlu0 %v1027_v46  ;;  %v924_v47 = vpop.f32.mrb[10].mxu0 }
 0x561   : > { %v1929_v48 = vpop.f32.mrb[11].mxu0 }
 0x562   : > { %v969_v49 = vpop.f32.mrb[0].mxu1  ;;  %v2200_v48 = vld [vmem:[#allocation11] sm:$0xff]  }
 0x563   : > { %v1934_v50 = vpop.f32.mrb[1].mxu1  ;;  %v1030_v51 = vsel %vm1023_vm4, %v969_v49, -inf }
 0x564   : > { %v972_v52 = vpop.f32.mrb[2].mxu1  ;;  %1031 = vmax.xlane.f32.xlu1 %v1030_v51 }
 0x565   : > { %v1935_v53 = vpop.f32.mrb[3].mxu1 }
 0x566   : > { %v1017_v54 = vpop.f32.mrb[12].mxu0 }
 0x567   : > { %v1940_v55 = vpop.f32.mrb[13].mxu0  ;;  %v1033_v56 = vsel %vm1023_vm4, %v1017_v54, -inf }
 0x568   : > { %1034 = vmax.xlane.f32.xlu0 %v1033_v56  ;;  %v1020_v57 = vpop.f32.mrb[14].mxu0 }
 0x569   : > { %v1941_v58 = vpop.f32.mrb[15].mxu0 }
 0x575   : > { %1072 = vrot.lane.b32.xlu1 %v3234_v26, %s2729_s22 }
 0x582   : > { %v1026_v59 = vpop.xlane.xlu1 %1025 }
 0x583   : > { %v1036_v60 = vsub.f32 %v873_v39, %v1026_v59 }
 0x585   : > { %v1040_v61 = vmul.f32 1.442695, %v1036_v60 }
 0x587   : > { %2214 = vpow2.f32 %v1040_v61 }
 0x591   : > { %v2215_v62 = vpop.eup %2214 }
 0x592   : > { %v1048_v63 = vsel %vm1023_vm4, %v2215_v62, 0.0 }
 0x599   : > { %1049 = vadd.xlane.f32.xlu1 %v1048_v63 }
 0x5ed   : > { %v1029_v0 = vpop.xlane.xlu0 %1028 }
 0x5ee   : > { %v1037_v2 = vsub.f32 %v921_v44, %v1029_v0 }
 0x5f0   : > { %v1042_v3 = vmul.f32 1.442695, %v1037_v2 }
 0x5f1   : > { %v1032_v6 = vpop.xlane.xlu1 %1031 }
 0x5f2   : > { %2216 = vpow2.f32 %v1042_v3  ;;  %v1038_v7 = vsub.f32 %v969_v49, %v1032_v6  ;;  %v2201_v49 = vld [vmem:[#allocation11 + $0x8] sm:$0xff]  }
 0x5f4   : > { %v1044_v10 = vmul.f32 1.442695, %v1038_v7 }
 0x5f5   : > { %v1073_v11 = vpop.permute.xlu1 %1072  ;;  %v1035_v12 = vpop.xlane.xlu0 %1034 }
 0x5f6   : > { %2218 = vpow2.f32 %v1044_v10  ;;  %v1083_v13 = vand.u32 %v1081_v8, %v1073_v11  ;;  %v1039_v14 = vsub.f32 %v1017_v54, %v1035_v12  ;;  %v1853_v10 = vld [vmem:[#allocation13] ss:$0 sm:$0xff] }
 0x5f8   : > { %v1046_v15 = vmul.f32 1.442695, %v1039_v14  ;;  %1943 = vmatpush3.bf16.msra.mxu1 %v1083_v13 }
 0x5f9   : > { %1954 = vmatprep.subr.bf16.mxu1 %v2723_v9 }
 0x5fa   : > { %2220 = vpow2.f32 %v1046_v15 }
 0x5fc   : > { %v2217_v16 = vpop.eup %2216 }
 0x5fd   : > { %v1051_v17 = vsel %vm1023_vm4, %v2217_v16, 0.0 }
 0x5fe   : > { %1052 = vadd.xlane.f32.xlu0 %v1051_v17 }
 0x600   : > { %v2219_v18 = vpop.eup %2218 }
 0x601   : > { %v1054_v19 = vsel %vm1023_vm4, %v2219_v18, 0.0 }
 0x602   : > { %1055 = vadd.xlane.f32.xlu1 %v1054_v19 }
 0x604   : > { %v2221_v20 = vpop.eup %2220 }
 0x605   : > { %v1057_v21 = vsel %vm1023_vm4, %v2221_v20, 0.0 }
 0x606   : > { %1058 = vadd.xlane.f32.xlu0 %v1057_v21 }
 0x613   : > { %1173 = vrot.lane.b32.xlu1 %v3243_v29, %s2729_s22 }
 0x617   : > { %1221 = vrot.lane.b32.xlu1 %v3246_v30, %s2729_s22 }
 0x61c   : > { %1125 = vrot.lane.b32.xlu0 %v3240_v28, %s2729_s22  ;;  %s1577_s22 = scalar_lea.sflag [#allocation4], %s3180_s17 }
 0x626   : > { %v1050_v22 = vpop.xlane.xlu1 %1049 }
 0x627   : > { %2222 = vrcp.f32 %v1050_v22 }
 0x631   : > { %v2223_v23 = vpop.eup %2222 }
 0x632   : > { %v1064_v24 = vmul.f32 %v2223_v23, %v2215_v62  ;;  %v2202_v23 = vld [vmem:[#allocation17] sm:$0xff]  }
 0x634   : > { %v1068_v25 = vpack.c.bf16 %v1064_v24, %v1064_v24  ;;  %v2203_v24 = vld [vmem:[#allocation17 + $0x8] sm:$0xff]  }
 0x636   : > { %1945 = vmatmul.mubr.msk.bf16.vlgmr.msra.gmra.mrb[4].mxu1 %vm1074_vm7, %v1068_v25 }
 0x637   : > { %1956 = vmatprep.mubr.msk.bf16.mxu1 %vm2724_vm1, %v2723_v9 }
 0x68b   : > { %v1053_v26 = vpop.xlane.xlu0 %1052 }
 0x68c   : > { %2224 = vrcp.f32 %v1053_v26 }
 0x68f   : > { %v1056_v27 = vpop.xlane.xlu1 %1055 }
 0x690   : > { %2226 = vrcp.f32 %v1056_v27 }
 0x693   : > { %v1174_v29 = vpop.permute.xlu1 %1173  ;;  %v1059_v30 = vpop.xlane.xlu0 %1058 }
 0x694   : > { %v1179_v31 = vand.u32 %v1174_v29, %v1081_v8  ;;  %2228 = vrcp.f32 %v1059_v30  ;;  %v1857_v29 = vld [vmem:[#allocation14] ss:$0 sm:$0xff] }
 0x696   : > { %v2225_v28 = vpop.eup %2224  ;;  %1955 = vmatpush3.bf16.msra.mxu1 %v1179_v31  ;;  %v1858_v31 = vld [vmem:[#allocation16] ss:$0 sm:$0xff] }
 0x697   : > { %v1065_v32 = vmul.f32 %v2225_v28, %v2217_v16  ;;  %v1126_v33 = vpop.permute.xlu0 %1125  ;;  %1966 = vmatprep.subr.bf16.mxu1 %v2723_v9  ;;  %v1222_v35 = vpop.permute.xlu1 %1221 }
 0x698   : > { %v1131_v34 = vand.u32 %v1126_v33, %v1081_v8  ;;  %v1227_v39 = vand.u32 %v1222_v35, %v1081_v8  ;;  %v2205_v35 = vld [vmem:[#allocation20 + $0x8] sm:$0xff]  }
 0x699   : > { %v1069_v38 = vpack.c.bf16 %v1065_v32, %v1065_v32 }
 0x69a   : > { %v2227_v36 = vpop.eup %2226  ;;  %1949 = vmatpush3.bf16.msra.mxu0 %v1131_v34  ;;  %v2204_v34 = vld [vmem:[#allocation20] sm:$0xff]  }
 0x69b   : > { %v1066_v37 = vmul.f32 %v2227_v36, %v2219_v18  ;;  %1960 = vmatprep.subr.bf16.mxu0 %v2723_v9  ;;  %v2206_v36 = vld [vmem:[#allocation20 + $0x10] sm:$0xff]  }
 0x69d   : > { %1951 = vmatmul.mubr.msk.bf16.vlgmr.msra.gmra.mrb[16].mxu0 %vm1074_vm7, %v1069_v38  ;;  %v1070_v40 = vpack.c.bf16 %v1066_v37, %v1066_v37  ;;  %v2207_v37 = vld [vmem:[#allocation20 + $0x18] sm:$0xff]   ;;  %v2208_v38 = vld [vmem:[#allocation20 + $0x20] sm:$0xff]  }
 0x69e   : > { %v2229_v41 = vpop.eup %2228  ;;  %1961 = vmatpush3.bf16.msra.mxu0 %v1227_v39  ;;  %1962 = vmatprep.mubr.msk.bf16.mxu0 %vm2724_vm1, %v2723_v9  ;;  %v2209_v39 = vld [vmem:[#allocation20 + $0x28] sm:$0xff]  }
 0x69f   : > { %v1067_v42 = vmul.f32 %v2229_v41, %v2221_v20  ;;  %1957 = vmatmul.mubr.msk.bf16.vlgmr.msra.gmra.mrb[8].mxu1 %vm1074_vm7, %v1070_v40  ;;  %1974 = vmatprep.subr.bf16.mxu0 %v2723_v9  ;;  %v2210_v40 = vld [vmem:[#allocation20 + $0x30] sm:$0xff]   ;;  %v2211_v41 = vld [vmem:[#allocation20 + $0x38] sm:$0xff]  }
 0x6a0   : > { %1970 = vmatprep.mubr.msk.bf16.mxu1 %vm2724_vm1, %v2723_v9  ;;  %1967 = vmatpush3.bf16.msra.mxu1 %v2200_v48 }
 0x6a1   : > { %v1071_v43 = vpack.c.bf16 %v1067_v42, %v1067_v42  ;;  %1968 = vmatprep.subr.bf16.mxu1 %v2723_v9  ;;  %v1859_v42 = vld [vmem:[#allocation19] ss:$0 sm:$0xff] }
 0x6a4   : > { %1969 = vmatpush3.bf16.msra.mxu1 %v2201_v49 }
 0x6a5   : > { %1963 = vmatmul.mubr.msk.bf16.vlgmr.msra.gmra.mrb[20].mxu0 %vm1074_vm7, %v1071_v43  ;;  %1982 = vmatprep.subr.bf16.mxu1 %v2723_v9 }
 0x6a6   : > { %1978 = vmatprep.mubr.msk.bf16.mxu0 %vm2724_vm1, %v2723_v9  ;;  %1975 = vmatpush3.bf16.msra.mxu0 %v2202_v23 }
 0x6a7   : > { %1976 = vmatprep.subr.bf16.mxu0 %v2723_v9 }
 0x6aa   : > { %1977 = vmatpush3.bf16.msra.mxu0 %v2203_v24 }
 0x709   : > { %v1119_v44 = vpop.f32.mrb[4].mxu1 }
 0x70a   : > { %v1946_v45 = vpop.f32.mrb[5].mxu1  ;;  %v1269_v3 = vpack.c.bf16 %v1119_v44, %v1119_v44 }
 0x70b   : > { %v1122_v46 = vpop.f32.mrb[6].mxu1 }
 0x70c   : > { %v1947_v47 = vpop.f32.mrb[7].mxu1 }
 0x770   : > { %v1167_v50 = vpop.f32.mrb[16].mxu0 }
 0x771   : > { %v1270_v51 = vpack.c.bf16 %v1167_v50, %v1167_v50  ;;  %v1952_v52 = vpop.f32.mrb[17].mxu0 }
 0x772   : > { %v1170_v53 = vpop.f32.mrb[18].mxu0  ;;  %v1215_v54 = vpop.f32.mrb[8].mxu1 }
 0x773   : > { %v1271_v55 = vpack.c.bf16 %v1215_v54, %v1215_v54  ;;  %v1958_v56 = vpop.f32.mrb[9].mxu1  ;;  %1274 = vrot.lane.b32.xlu0 %v1270_v51, %s2731_s28  ;;  %v1953_v57 = vpop.f32.mrb[19].mxu0  ;;  %s2600_s28 = scalar_lea.vmem %s3335_s16, 128 }
 0x774   : > { %v1218_v58 = vpop.f32.mrb[10].mxu1  ;;  %v1863_v57 = vld [vmem:[#allocation22] ss:$0 sm:$0xff]  ;;  %p2601_p11 = scmp.ne.s32.totalorder %s3335_s16, %s2600_s28 }
 0x775   : > { %1277 = vrot.lane.b32.xlu1 %v1271_v55, %s2732_s2  ;;  %v1959_v59 = vpop.f32.mrb[11].mxu1  ;;  %s2734_s2 = smov [#allocation23]  }
 0x776   : > { %p2602_p5 = pnand %p2601_p11, %p3440_p0 }
 0x778   : > { %v1263_v60 = vpop.f32.mrb[20].mxu0  ;;  %p2603_p7 = pneg %p2602_p5 }
 0x779   : > { %v1272_v61 = vpack.c.bf16 %v1263_v60, %v1263_v60  ;;  %v1964_v62 = vpop.f32.mrb[21].mxu0 }
 0x77a   : > { %v1266_v63 = vpop.f32.mrb[22].mxu0 }
 0x77b   : > { %1280 = vrot.lane.b32.xlu0 %v1272_v61, %s2733_s1  ;;  %v1965_v0 = vpop.f32.mrb[23].mxu0  ;;  %s2604_s1 = sshll.u32 %s2734_s2, 4  ;;  %s2605_s1 = int_to_ptr.vmem [resolvable:$false] %s2604_s1 }
 0x77c   : > { %s2606_s15 = scalar_lea.vmem %s2605_s1, 256  ;;  %p2607_p10 = scmp.lt.s32.totalorder %s3335_s16, %s2605_s1 }
 0x77d   : > { %p2608_p13 = scmp.lt.s32.totalorder %s2606_s15, %s2600_s28 }
 0x77f   : > { %p2609_p2 = por %p2608_p13, %p2607_p10 }
 0x781   : > { %p2610_p8 = pnand %p2609_p2, %p2603_p7 }
 0x7e5   : > { %v1275_v2 = vpop.permute.xlu0 %1274 }
 0x7e6   : > { %v1284_v4 = vsel %vm832_vm3, %v1269_v3, %v1275_v2 }
 0x7e7   : > { %v1278_v5 = vpop.permute.xlu1 %1277 }
 0x7e8   : > { %v1287_v6 = vsel %vm1285_vm8, %v1284_v4, %v1278_v5 }
 0x7ed   : > { %v1281_v7 = vpop.permute.xlu0 %1280 }
 0x7ee   : > { %v1290_v8 = vsel %vm1288_vm9, %v1287_v6, %v1281_v7 }
 0x7ef   : > { %1971 = vmatmul.mubr.msk.bf16.vlgmr.msra.gmra.mrb[12].mxu1 %vm778_vm2, %v1290_v8 }
 0x7f0   : > { %1998 = vmatprep.mubr.msk.bf16.mxu1 %vm2724_vm1, %v2723_v9  ;;  %1983 = vmatpush3.bf16.msra.mxu1 %v2204_v34 }
 0x7f1   : > { %1984 = vmatprep.subr.bf16.mxu1 %v2723_v9 }
 0x7f4   : > { %1985 = vmatpush3.bf16.msra.mxu1 %v2205_v35 }
 0x7f5   : > { %1986 = vmatprep.subr.bf16.mxu1 %v2723_v9 }
 0x7f8   : > { %1987 = vmatpush3.bf16.msra.mxu1 %v2206_v36 }
 0x7f9   : > { %1988 = vmatprep.subr.bf16.mxu1 %v2723_v9 }
 0x7fc   : > { %1989 = vmatpush3.bf16.msra.mxu1 %v2207_v37 }
 0x7fd   : > { %1990 = vmatprep.subr.bf16.mxu1 %v2723_v9 }
 0x800   : > { %1991 = vmatpush3.bf16.msra.mxu1 %v2208_v38 }
 0x801   : > { %1992 = vmatprep.subr.bf16.mxu1 %v2723_v9 }
 0x804   : > { %1993 = vmatpush3.bf16.msra.mxu1 %v2209_v39 }
 0x805   : > { %1994 = vmatprep.subr.bf16.mxu1 %v2723_v9 }
 0x808   : > { %1995 = vmatpush3.bf16.msra.mxu1 %v2210_v40 }
 0x809   : > { %1996 = vmatprep.subr.bf16.mxu1 %v2723_v9 }
 0x80c   : > { %1997 = vmatpush3.bf16.msra.mxu1 %v2211_v41 }
 0x8c2   : > { %v1350_v11 = vpop.f32.mrb[12].mxu1 }
 0x8c3   : > { %v1351_v12 = vadd.f32 %v1853_v10, %v1350_v11  ;;  %v1972_v13 = vpop.f32.mrb[13].mxu1 }
 0x8c4   : > { %v1353_v14 = vpop.f32.mrb[14].mxu1 }
 0x8c5   : > { %v3312_v15 = vadd.f32 %v1351_v12, %v3217_v1  ;;  %v1973_v16 = vpop.f32.mrb[15].mxu1 }
 0x8c7   : > { %v1357_v17 = vsel %vm720_vm0, %v3312_v15, 0.0 }
 0x8c8   : > { %1358 = vadd.xlane.f32.xlu1 %v1357_v17 }
 0x955   : > { %v1359_v18 = vpop.xlane.xlu1 %1358 }
 0x956   : > { %v1360_v19 = vmul.f32 0.03125, %v1359_v18 }
 0x958   : > { %v1361_v20 = vsub.f32 %v3312_v15, %v1360_v19 }
 0x95a   : > { %v1362_v21 = vmul.f32 %v1361_v20, %v1361_v20 }
 0x95c   : > { %v1363_v22 = vsel %vm720_vm0, %v1362_v21, 0.0 }
 0x95d   : > { %1364 = vadd.xlane.f32.xlu0 %v1363_v22 }
 0x9ea   : > { %v1365_v1 = vpop.xlane.xlu0 %1364 }
 0x9eb   : > { %v1366_v25 = vmul.f32 0.03125, %v1365_v1 }
 0x9ed   : > { %v1367_v26 = vadd.f32 1e-06, %v1366_v25 }
 0x9ef   : > { %2230 = vrsqrt.f32 %v1367_v26 }
 0x9f9   : > { %v2231_v27 = vpop.eup %2230 }
 0x9fa   : > { %v1369_v30 = vmul.f32 %v2231_v27, %v1361_v20 }
 0x9fc   : > { %v1377_v28 = vmul.f32 %v1857_v29, %v1369_v30 }
 0x9fe   : > { %v1385_v32 = vadd.f32 %v1858_v31, %v1377_v28 }
 0xa00   : > { %v1386_v33 = vpack.c.bf16 %v1385_v32, %v1385_v32 }
 0xa02   : > { %1979 = vmatmul.mubr.msk.bf16.vlgmr.msra.gmra.mrb[24].mxu0 %vm778_vm2, %v1386_v33 }
 0xad5   : > { %v1447_v43 = vpop.f32.mrb[24].mxu0 }
 0xad6   : > { %v1448_v44 = vadd.f32 %v1859_v42, %v1447_v43  ;;  %v1980_v45 = vpop.f32.mrb[25].mxu0 }
 0xad7   : > { %v1450_v46 = vpop.f32.mrb[26].mxu0 }
 0xad8   : > { %v1453_v47 = vmul.f32 %v1448_v44, %v1448_v44  ;;  %v1981_v48 = vpop.f32.mrb[27].mxu0 }
 0xada   : > { %v1454_v49 = vmul.f32 %v1453_v47, %v1448_v44 }
 0xadc   : > { %v1455_v50 = vmul.f32 0.044715, %v1454_v49 }
 0xade   : > { %v1456_v51 = vadd.f32 %v1455_v50, %v1448_v44 }
 0xae0   : > { %v1457_v52 = vmul.f32 0.7978846, %v1456_v51 }
 0xae2   : > { %2232 = vtanh.f32 %v1457_v52 }
 0xaec   : > { %v2233_v53 = vpop.eup %2232 }
 0xaed   : > { %v1459_v54 = vadd.f32 1.0, %v2233_v53 }
 0xaef   : > { %v1460_v55 = vmul.f32 0.5, %v1459_v54 }
 0xaf1   : > { %v1461_v9 = vmul.f32 %v1460_v55, %v1448_v44 }
 0xaf3   : > { %v1462_v56 = vpack.c.bf16 %v1461_v9, %v1461_v9 }
 0xaf5   : > { %1999 = vmatmul.mubr.bf16.vlgmr.msra.gmra.mrb[16].mxu1 %v1462_v56 }
 0xbc8   : > { %v1568_v58 = vpop.f32.mrb[16].mxu1 }
 0xbc9   : > { %v1569_v59 = vadd.f32 %v1863_v57, %v1568_v58  ;;  %v2000_v60 = vpop.f32.mrb[17].mxu1 }
 0xbca   : > { %v1571_v61 = vpop.f32.mrb[18].mxu1 }
 0xbcb   : > { %v1574_v62 = vadd.f32 %v1569_v59, %v3312_v15  ;;  %v2001_v63 = vpop.f32.mrb[19].mxu1 }
 0xbcd   : > { %1575 = vst.msk [vmem:[%s3212_s24] sm:$0x1f] %vm720_vm0, %v1574_v62 }
 0xbce   : > { %2613 = shalt.err (!%p2610_p8)
}
 0xbcf   : > { %s2614_s17 = scalar_lea.hbm %s3333_s25, 128  ;;  %s2618_s23 = scalar_lea.hbm %s3439_s0, 256 }
 0xbd0   : > { %p2615_p9 = scmp.ne.s32.totalorder %s3333_s25, %s2614_s17  ;;  %p2619_p3 = scmp.lt.u32.totalorder %s3333_s25, %s3439_s0 }
 0xbd1   : > { %p2620_p1 = scmp.lt.u32.totalorder %s2618_s23, %s2614_s17  ;;  %p2622_p11 = scmp.lt.u32.totalorder %s2614_s17, %s3333_s25 }
 0xbd2   : > { %p2616_p4 = pnand %p2615_p9, %p3440_p0 }
 0xbd3   : > { %p2621_p12 = por %p2620_p1, %p2619_p3 }
 0xbd4   : > { %p2617_p6 = pneg %p2616_p4 }
 0xbd5   : > { %p2623_p5 = por %p2622_p11, %p2621_p12 }
 0xbd7   : > { %p2624_p7 = pnand %p2623_p5, %p2617_p6 }
 0xbd9   : > { %2627 = shalt.err (!%p2624_p7)
}
 0xbda   : > { %2052 = dma.vmem_to_hbm [thread:$0]  (%p3440_p0), %s3335_s16, 128, %s3333_s25, %s1577_s22  }
 0xbdb PF: > { %s3441_s28 = sld [smem:[#allocation32_spill]]  ;;  %p3442_p10 = scmp.ne.s32.totalorder %s3431_s13, 0 }
 0xbdc   : > { %p3443_p13 = scmp.ge.s32.totalorder %s2706_s30, 2 }
 0xbde   : > { %p2096_p2 = pnand %p3443_p13, %p3442_p10 }
 0xbe1   : > { %s1602_s1 = sand.u32 1, %s3441_s28  }
 0xbe2   : > { %s1603_s15 = scalar_lea.sflag [#allocation4], %s1602_s1 }
 0xbe3   : > { %2681 = dma.done.wait (!%p2096_p2), %s1603_s15, 128  }
 0xbe4   : > { %2683 = vsyncadd (!%p2096_p2), %s1603_s15, 4294967168  ;;  %s35_s30 = sadd.s32 1, %s2706_s30   ;;  %s3444_s25 = smov %s2690_s26 }
 0xbe5   : > { %p32_p8 = scmp.ge.s32.totalorder %s35_s30, 4   ;;  %s3445_s26 = smov %s2694_s27 }
 0xbe6   : > { %s3446_s27 = smov %s3130_s14  ;;  %s3447_s28 = smov %s2702_s29 }
 0xbe7   : > { %s3448_s29 = smov %s3450_s20  ;;  %34 = sbr.rel (!%p32_p8) target bundleno = 18 (0x12), region = 181 }
 0xbee   :  { %1608 = vsyncpa [#allocation3], 1 }
 0xbef   :  { %1610 = vsyncpa [#allocation3 + $0x1], 1 }
 0xbf0   :  { %1611 = vsyncpa [#allocation6], 1 }
 0xbf1   :  { %1612 = vsyncpa [#allocation9], 1 }
 0xbf2   :  { %1613 = vsyncpa [#allocation12], 1 }
 0xbf3   :  { %1614 = vsyncpa [#allocation15], 1 }
 0xbf4   :  { %1615 = vsyncpa [#allocation18], 1 }
 0xbf5   :  { %1616 = vsyncpa [#allocation21], 1 }
 0xbf6   :  { %1617 = vsyncpa [#allocation4], 1 }
 0xbf7   :  { %1619 = vsyncpa [#allocation4 + $0x1], 1 }

</bundles_post_ra>
